<compile_context>
chip_gen: v7x
topology: tpu7x:2x2x1
jax: 0.10.0
libtpu: 0.0.40
codegen_flags: <defaults>
</compile_context>

<pallas_src>
import functools

import numpy as np
import jax
import jax.numpy as jnp
from jax.experimental import pallas as pl
from jax.experimental.pallas import tpu as pltpu

MAX_LV = 3           # cmd_args.max_lv
LANE = 128           # TPU lane width; all feature dims zero-padded to this
MAX_N = 16           # node slots per graph (multiple of 16 for bf16 sublane packing)
GRAPH_TILE = 16      # graphs per grid step -> GRAPH_TILE * MAX_N = 256 node rows / tile
TN = GRAPH_TILE * MAX_N


def _classifier_kernel(num_class,
                       node_feat_ref, adj_ref, pool_ref,
                       wn2l_ref, bn2l_ref,
                       convw_ref, convb_ref,
                       outw_ref, outb_ref,
                       h1w_ref, h1b_ref,
                       h2w_ref, h2b_ref,
                       logp_ref, embed_ref):
    f32 = jnp.float32
    bf16 = jnp.bfloat16

    x = node_feat_ref[...]          # [TN, LANE]  bf16 one-hot node tags (zero-padded)
    adj = adj_ref[...]              # [TN, TN]    bf16, block-diagonal within the tile
    pool = pool_ref[...]            # [GT, TN]    bf16 0/1 membership (doubles as node mask)

    # Grid-invariant weight/bias loads hoisted out of the unrolled level loop.
    # bf16 weights keep the resident set small (no spill pressure at TN=256).
    w_n2l = wn2l_ref[...]           # bf16 [LANE, LANE]
    b_n2l = bn2l_ref[...]           # f32  [1, LANE]
    conv_w = convw_ref[...]         # bf16 [LANE, LANE]
    conv_b = convb_ref[...]         # f32  [1, LANE]

    # ---- s2v: EmbedMeanField ----
    input_msg = jnp.dot(x, w_n2l, preferred_element_type=f32) + b_n2l     # f32 [TN, LANE]
    cur_bf = jnp.maximum(input_msg, 0.0).astype(bf16)                     # bf16 working copy
    for _ in range(MAX_LV):          # static unroll of the message-passing rounds
        # dominant matmul: bf16 x bf16 -> f32 accumulate on the MXU
        n2npool = jnp.dot(adj, cur_bf, preferred_element_type=f32)        # f32 [TN, LANE]
        node_linear = jnp.dot(n2npool.astype(bf16), conv_w,
                              preferred_element_type=f32) + conv_b
        cur_bf = jnp.maximum(node_linear + input_msg, 0.0).astype(bf16)   # single cast / round

    # Graph sum-pool: per-tile membership matmul (padded node slots have zero rows).
    y_pot = jnp.dot(pool, cur_bf, preferred_element_type=f32)             # f32 [GT, LANE]
    embed = jnp.maximum(
        jnp.dot(y_pot.astype(bf16), outw_ref[...],
                preferred_element_type=f32) + outb_ref[...], 0.0)
    embed_ref[...] = embed                                                # lane-dense f32 store

    # ---- MLPClassifier ----  (M = GT rows; sits in MXU slack under the adj matmuls)
    h1 = jnp.maximum(
        jnp.dot(embed.astype(bf16), h1w_ref[...],
                preferred_element_type=f32) + h1b_ref[...], 0.0)
    logits = jnp.dot(h1.astype(bf16), h2w_ref[...],
                     preferred_element_type=f32) + h2b_ref[...]
    # Mask the padded class lanes, then stable log_softmax over real classes.
    col = jax.lax.broadcasted_iota(jnp.int32, logits.shape, 1)
    logits = jnp.where(col < num_class, logits, -1e30)
    m = jnp.max(logits, axis=1, keepdims=True)
    lse = jnp.log(jnp.sum(jnp.exp(logits - m), axis=1, keepdims=True)) + m
    logp_ref[...] = logits - lse                                          # lane-dense f32 store


def classifier_forward(node_feat_t, adj_t, pool_t, params, labels, num_class, out_dim):
    """node_feat_t: [NT*TN, LANE] bf16, adj_t: [NT*TN, TN] bf16 (block-diagonal tiles),
       pool_t: [NT*GT, TN] bf16, params: LANE-padded bf16 weights / f32 biases."""
    n_node_rows = node_feat_t.shape[0]
    assert n_node_rows % TN == 0
    nt = n_node_rows // TN
    n_graph_rows = pool_t.shape[0]
    n_graphs = labels.shape[0]

    weight_args = (params["w_n2l"], params["b_n2l"],
                   params["conv_w"], params["conv_b"],
                   params["out_w"], params["out_b"],
                   params["h1_w"], params["h1_b"],
                   params["h2_w"], params["h2_b"])

    def const_spec(a):
        # grid-invariant full-array block (constant index map -> no re-DMA per step)
        return pl.BlockSpec(a.shape, lambda i: (0,) * a.ndim)

    in_specs = [
        pl.BlockSpec((TN, LANE), lambda i: (i, 0)),        # bf16 node features for the tile
        pl.BlockSpec((TN, TN), lambda i: (i, 0)),          # bf16 block-diagonal adj tile
        pl.BlockSpec((GRAPH_TILE, TN), lambda i: (i, 0)),  # bf16 membership / padding mask
    ] + [const_spec(a) for a in weight_args]

    out_specs = (pl.BlockSpec((GRAPH_TILE, LANE), lambda i: (i, 0)),   # logp  (padded classes)
                 pl.BlockSpec((GRAPH_TILE, LANE), lambda i: (i, 0)))   # embed (padded lanes)
    out_shape = (jax.ShapeDtypeStruct((n_graph_rows, LANE), jnp.float32),
                 jax.ShapeDtypeStruct((n_graph_rows, LANE), jnp.float32))

    # Advisory cost estimate so XLA can schedule the surrounding glue around the call.
    flops_per_tile = (2 * TN * LANE * LANE * (1 + MAX_LV)          # input_msg + conv dots
                      + 2 * MAX_LV * TN * TN * LANE                # adjacency dots
                      + 2 * GRAPH_TILE * TN * LANE                 # pooling dot
                      + 6 * GRAPH_TILE * LANE * LANE)              # embed / h1 / logits dots
    bytes_accessed = (sum(int(a.size) * a.dtype.itemsize
                          for a in (node_feat_t, adj_t, pool_t) + weight_args)
                      + 2 * n_graph_rows * LANE * 4)
    cost = pl.CostEstimate(flops=int(nt * flops_per_tile),
                           transcendentals=int(n_graph_rows * LANE),
                           bytes_accessed=int(bytes_accessed))

    # VMEM budget derived from the actual per-tile footprint (double-buffered) + headroom.
    tile_io_bytes = (TN * LANE * 2          # bf16 node features
                     + TN * TN * 2          # bf16 adjacency
                     + GRAPH_TILE * TN * 2  # bf16 pooling
                     + 2 * GRAPH_TILE * LANE * 4)   # f32 logp + embed outputs
    weight_bytes = sum(int(a.size) * a.dtype.itemsize for a in weight_args)
    vmem_limit = int(min(2 * (tile_io_bytes + weight_bytes) + (6 << 20), 32 << 20))

    logp_pad, embed_pad = pl.pallas_call(
        functools.partial(_classifier_kernel, num_class),
        grid=(nt,),
        in_specs=in_specs,
        out_specs=out_specs,
        out_shape=out_shape,
        compiler_params=pltpu.CompilerParams(
            dimension_semantics=("parallel",),   # graph tiles are independent (megacore)
            vmem_limit_bytes=vmem_limit),
        cost_estimate=cost,
    )(node_feat_t, adj_t, pool_t, *weight_args)

    logp = logp_pad[:n_graphs, :num_class]
    embed = embed_pad[:n_graphs, :out_dim]

    # nll_loss + accuracy (scalar glue, matches MLPClassifier when labels given)
    loss = -jnp.mean(logp[jnp.arange(n_graphs), labels])
    pred = jnp.argmax(logp, axis=1)
    acc = jnp.mean((pred == labels).astype(jnp.float32))
    return logp, loss, acc, embed


def init_params(key, feat_dim, latent_dim, out_dim, hidden, num_class):
    ks = jax.random.split(key, 10)

    def lin(kw, kb, din, dout):
        w = jax.random.normal(kw, (din, dout), jnp.float32) * (1.0 / jnp.sqrt(din))
        b = jax.random.normal(kb, (1, dout), jnp.float32) * 0.01
        # Zero-pad to the full 128-lane width; padded lanes stay exactly zero
        # through the relu chain, so padding is semantically transparent.
        # Weights stored in bf16 (native MXU dtype); biases stay f32.
        w_p = jnp.zeros((LANE, LANE), jnp.float32).at[:din, :dout].set(w).astype(jnp.bfloat16)
        b_p = jnp.zeros((1, LANE), jnp.float32).at[:, :dout].set(b)
        return w_p, b_p

    w_n2l, b_n2l = lin(ks[0], ks[1], feat_dim, latent_dim)
    conv_w, conv_b = lin(ks[2], ks[3], latent_dim, latent_dim)
    out_w, out_b = lin(ks[4], ks[5], latent_dim, out_dim)
    h1_w, h1_b = lin(ks[6], ks[7], out_dim, hidden)
    h2_w, h2_b = lin(ks[8], ks[9], hidden, num_class)
    return dict(w_n2l=w_n2l, b_n2l=b_n2l, conv_w=conv_w, conv_b=conv_b,
                out_w=out_w, out_b=out_b, h1_w=h1_w, h1_b=h1_b,
                h2_w=h2_w, h2_b=h2_b)


def build_batch(key, n_graphs, feat_dim, num_class):
    """PrepareFeatureLabel-equivalent host glue: one-hot node tags, per-tile
    block-diagonal dense adjacency (bf16), graph-membership pooling, labels."""
    sizes = [5 + (g % 4) for g in range(n_graphs)]           # ragged ring graphs, 5..8 nodes
    k_tag, k_lab = jax.random.split(key)
    tags = np.asarray(jax.random.randint(k_tag, (sum(sizes),), 0, feat_dim))
    labels = jax.random.randint(k_lab, (n_graphs,), 0, num_class)

    nt = -(-n_graphs // GRAPH_TILE)                          # pad graph count to full tiles
    nt = nt + (nt % 2)                                       # even tile count -> both v7x TCs busy
    node_feat = np.zeros((nt * TN, LANE), np.float32)
    adj = np.zeros((nt * TN, TN), np.float32)
    pool = np.zeros((nt * GRAPH_TILE, TN), np.float32)

    off = 0
    for g in range(n_graphs):
        n_g = sizes[g]
        t, lg = divmod(g, GRAPH_TILE)
        row0 = t * TN + lg * MAX_N                           # global node-row base
        col0 = lg * MAX_N                                    # column base within the tile
        for i in range(n_g):
            node_feat[row0 + i, tags[off + i]] = 1.0
            pool[t * GRAPH_TILE + lg, col0 + i] = 1.0
            j = (i + 1) % n_g                                # ring edges
            adj[row0 + i, col0 + j] = 1.0
            adj[row0 + j, col0 + i] = 1.0
        off += n_g

    # 0/1 values -> exact in bf16; halves DMA bytes and matches the MXU dtype.
    return (jnp.asarray(node_feat, dtype=jnp.bfloat16),
            jnp.asarray(adj, dtype=jnp.bfloat16),
            jnp.asarray(pool, dtype=jnp.bfloat16),
            labels, sizes)


def reference_forward(node_feat_t, adj_t, pool_t, params, num_class, out_dim, n_graphs):
    """Pure-JAX reference on the same packed inputs, mirroring the kernel's
    bf16-operand / f32-accumulate numerics."""
    f32 = jnp.float32

    def bf(x):   # emulate a bf16 operand fed to an f32-accumulating matmul
        return x.astype(jnp.bfloat16).astype(f32)

    w_n2l = params["w_n2l"].astype(f32); b_n2l = params["b_n2l"]
    conv_w = params["conv_w"].astype(f32); conv_b = params["conv_b"]
    out_w = params["out_w"].astype(f32); out_b = params["out_b"]
    h1_w = params["h1_w"].astype(f32); h1_b = params["h1_b"]
    h2_w = params["h2_w"].astype(f32); h2_b = params["h2_b"]

    nt = node_feat_t.shape[0] // TN
    logps, embeds = [], []
    for t in range(nt):
        x = node_feat_t[t * TN:(t + 1) * TN].astype(f32)
        adj = adj_t[t * TN:(t + 1) * TN].astype(f32)
        pool = pool_t[t * GRAPH_TILE:(t + 1) * GRAPH_TILE].astype(f32)
        input_msg = x @ w_n2l + b_n2l
        cur = jnp.maximum(input_msg, 0.0)
        for _ in range(MAX_LV):
            n2npool = adj @ bf(cur)
            cur = jnp.maximum(bf(n2npool) @ conv_w + conv_b + input_msg, 0.0)
        y = pool @ bf(cur)
        emb = jnp.maximum(bf(y) @ out_w + out_b, 0.0)
        h1 = jnp.maximum(bf(emb) @ h1_w + h1_b, 0.0)
        logits = (bf(h1) @ h2_w + h2_b)[:, :num_class]
        logps.append(jax.nn.log_softmax(logits, axis=1))
        embeds.append(emb[:, :out_dim])
    return jnp.concatenate(logps)[:n_graphs], jnp.concatenate(embeds)[:n_graphs]


if __name__ == "__main__":
    n_graphs = 16       # -> 1 real graph tile, padded to 2 tiles (even, grid=(2,))
    feat_dim = 8        # one-hot node tags (use_tag=True)
    latent_dim = 32     # cmd_args.latent_dim
    out_dim = 32        # cmd_args.out_dim
    hidden = 16         # cmd_args.hidden
    num_class = 2       # cmd_args.num_class

    key = jax.random.PRNGKey(0)
    k_par, k_batch = jax.random.split(key)

    params = init_params(k_par, feat_dim, latent_dim, out_dim, hidden, num_class)
    node_feat_t, adj_t, pool_t, labels, sizes = build_batch(k_batch, n_graphs,
                                                            feat_dim, num_class)

    logp, loss, acc, embed = classifier_forward(node_feat_t, adj_t, pool_t,
                                                params, labels, num_class, out_dim)
    jax.block_until_ready((logp, loss, acc, embed))

    # sanity vs pure-JAX reference (same packed inputs / same bf16 matmul numerics)
    logp_ref, embed_ref = reference_forward(node_feat_t, adj_t, pool_t, params,
                                            num_class, out_dim, n_graphs)

    assert logp.shape == (n_graphs, num_class)
    assert embed.shape == (n_graphs, out_dim)
    assert bool(jnp.isfinite(loss))
    assert float(jnp.max(jnp.abs(logp - logp_ref))) < 1e-1
    assert float(jnp.max(jnp.abs(embed - embed_ref))) < 1e-1 * (
        1.0 + float(jnp.max(jnp.abs(embed_ref))))
    print("KERNEL_OK")
</pallas_src>

<mosaic_0001>
module attributes {stable_mosaic.version = 11 : i64} {
  func.func @_classifier_kernel(%arg0: i32, %arg1: memref<256x128xbf16, #tpu.memory_space<vmem>>, %arg2: memref<256x256xbf16, #tpu.memory_space<vmem>>, %arg3: memref<16x256xbf16, #tpu.memory_space<vmem>>, %arg4: memref<128x128xbf16, #tpu.memory_space<vmem>>, %arg5: memref<1x128xf32, #tpu.memory_space<vmem>>, %arg6: memref<128x128xbf16, #tpu.memory_space<vmem>>, %arg7: memref<1x128xf32, #tpu.memory_space<vmem>>, %arg8: memref<128x128xbf16, #tpu.memory_space<vmem>>, %arg9: memref<1x128xf32, #tpu.memory_space<vmem>>, %arg10: memref<128x128xbf16, #tpu.memory_space<vmem>>, %arg11: memref<1x128xf32, #tpu.memory_space<vmem>>, %arg12: memref<128x128xbf16, #tpu.memory_space<vmem>>, %arg13: memref<1x128xf32, #tpu.memory_space<vmem>>, %arg14: memref<16x128xf32, #tpu.memory_space<vmem>>, %arg15: memref<16x128xf32, #tpu.memory_space<vmem>>) attributes {dimension_semantics = [#tpu.dimension_semantics<parallel>], iteration_bounds = array<i64: 2>, scalar_prefetch = 0 : i64, scratch_operands = 0 : i64, tpu.core_type = #tpu.core_type<tc>, window_params = [{transform_indices = @transform_0, window_bounds = array<i64: 256, 128>}, {transform_indices = @transform_1, window_bounds = array<i64: 256, 256>}, {transform_indices = @transform_2, window_bounds = array<i64: 16, 256>}, {pipeline_mode = #tpu.pipeline_mode<synchronous>, transform_indices = @transform_3, window_bounds = array<i64: 128, 128>}, {pipeline_mode = #tpu.pipeline_mode<synchronous>, transform_indices = @transform_4, window_bounds = array<i64: 1, 128>}, {pipeline_mode = #tpu.pipeline_mode<synchronous>, transform_indices = @transform_5, window_bounds = array<i64: 128, 128>}, {pipeline_mode = #tpu.pipeline_mode<synchronous>, transform_indices = @transform_6, window_bounds = array<i64: 1, 128>}, {pipeline_mode = #tpu.pipeline_mode<synchronous>, transform_indices = @transform_7, window_bounds = array<i64: 128, 128>}, {pipeline_mode = #tpu.pipeline_mode<synchronous>, transform_indices = @transform_8, window_bounds = array<i64: 1, 128>}, {pipeline_mode = #tpu.pipeline_mode<synchronous>, transform_indices = @transform_9, window_bounds = array<i64: 128, 128>}, {pipeline_mode = #tpu.pipeline_mode<synchronous>, transform_indices = @transform_10, window_bounds = array<i64: 1, 128>}, {pipeline_mode = #tpu.pipeline_mode<synchronous>, transform_indices = @transform_11, window_bounds = array<i64: 128, 128>}, {pipeline_mode = #tpu.pipeline_mode<synchronous>, transform_indices = @transform_12, window_bounds = array<i64: 1, 128>}, {transform_indices = @transform_13, window_bounds = array<i64: 16, 128>}, {transform_indices = @transform_14, window_bounds = array<i64: 16, 128>}]} {
    %c0 = arith.constant 0 : index
    %c0_0 = arith.constant 0 : index
    %0 = vector.load %arg1[%c0, %c0_0] : memref<256x128xbf16, #tpu.memory_space<vmem>>, vector<256x128xbf16>
    %c0_1 = arith.constant 0 : index
    %c0_2 = arith.constant 0 : index
    %1 = vector.load %arg2[%c0_1, %c0_2] : memref<256x256xbf16, #tpu.memory_space<vmem>>, vector<256x256xbf16>
    %c0_3 = arith.constant 0 : index
    %c0_4 = arith.constant 0 : index
    %2 = vector.load %arg3[%c0_3, %c0_4] : memref<16x256xbf16, #tpu.memory_space<vmem>>, vector<16x256xbf16>
    %c0_5 = arith.constant 0 : index
    %c0_6 = arith.constant 0 : index
    %3 = vector.load %arg4[%c0_5, %c0_6] : memref<128x128xbf16, #tpu.memory_space<vmem>>, vector<128x128xbf16>
    %c0_7 = arith.constant 0 : index
    %c0_8 = arith.constant 0 : index
    %4 = vector.load %arg5[%c0_7, %c0_8] : memref<1x128xf32, #tpu.memory_space<vmem>>, vector<1x128xf32>
    %c0_9 = arith.constant 0 : index
    %c0_10 = arith.constant 0 : index
    %5 = vector.load %arg6[%c0_9, %c0_10] : memref<128x128xbf16, #tpu.memory_space<vmem>>, vector<128x128xbf16>
    %c0_11 = arith.constant 0 : index
    %c0_12 = arith.constant 0 : index
    %6 = vector.load %arg7[%c0_11, %c0_12] : memref<1x128xf32, #tpu.memory_space<vmem>>, vector<1x128xf32>
    %cst = arith.constant dense<0.000000e+00> : vector<256x128xf32>
    %7 = tpu.matmul %0, %3, %cst {dimension_numbers = #tpu.dot_dimension_numbers<[1], [0], [0], [1], [0, 0, 1, 1], [], []>} : vector<256x128xbf16>, vector<128x128xbf16>, vector<256x128xf32> -> vector<256x128xf32>
    %8 = vector.broadcast %4 : vector<1x128xf32> to vector<256x128xf32>
    %9 = arith.addf %7, %8 : vector<256x128xf32>
    %cst_13 = arith.constant 0.000000e+00 : f32
    %10 = vector.broadcast %cst_13 : f32 to vector<256x128xf32>
    %11 = arith.maximumf %9, %10 : vector<256x128xf32>
    %12 = arith.truncf %11 : vector<256x128xf32> to vector<256x128xbf16>
    %cst_14 = arith.constant dense<0.000000e+00> : vector<256x128xf32>
    %13 = tpu.matmul %1, %12, %cst_14 {dimension_numbers = #tpu.dot_dimension_numbers<[1], [0], [0], [1], [0, 0, 1, 1], [], []>} : vector<256x256xbf16>, vector<256x128xbf16>, vector<256x128xf32> -> vector<256x128xf32>
    %14 = arith.truncf %13 : vector<256x128xf32> to vector<256x128xbf16>
    %cst_15 = arith.constant dense<0.000000e+00> : vector<256x128xf32>
    %15 = tpu.matmul %14, %5, %cst_15 {dimension_numbers = #tpu.dot_dimension_numbers<[1], [0], [0], [1], [0, 0, 1, 1], [], []>} : vector<256x128xbf16>, vector<128x128xbf16>, vector<256x128xf32> -> vector<256x128xf32>
    %16 = vector.broadcast %6 : vector<1x128xf32> to vector<256x128xf32>
    %17 = arith.addf %15, %16 : vector<256x128xf32>
    %18 = arith.addf %17, %9 : vector<256x128xf32>
    %cst_16 = arith.constant 0.000000e+00 : f32
    %19 = vector.broadcast %cst_16 : f32 to vector<256x128xf32>
    %20 = arith.maximumf %18, %19 : vector<256x128xf32>
    %21 = arith.truncf %20 : vector<256x128xf32> to vector<256x128xbf16>
    %cst_17 = arith.constant dense<0.000000e+00> : vector<256x128xf32>
    %22 = tpu.matmul %1, %21, %cst_17 {dimension_numbers = #tpu.dot_dimension_numbers<[1], [0], [0], [1], [0, 0, 1, 1], [], []>} : vector<256x256xbf16>, vector<256x128xbf16>, vector<256x128xf32> -> vector<256x128xf32>
    %23 = arith.truncf %22 : vector<256x128xf32> to vector<256x128xbf16>
    %cst_18 = arith.constant dense<0.000000e+00> : vector<256x128xf32>
    %24 = tpu.matmul %23, %5, %cst_18 {dimension_numbers = #tpu.dot_dimension_numbers<[1], [0], [0], [1], [0, 0, 1, 1], [], []>} : vector<256x128xbf16>, vector<128x128xbf16>, vector<256x128xf32> -> vector<256x128xf32>
    %25 = vector.broadcast %6 : vector<1x128xf32> to vector<256x128xf32>
    %26 = arith.addf %24, %25 : vector<256x128xf32>
    %27 = arith.addf %26, %9 : vector<256x128xf32>
    %cst_19 = arith.constant 0.000000e+00 : f32
    %28 = vector.broadcast %cst_19 : f32 to vector<256x128xf32>
    %29 = arith.maximumf %27, %28 : vector<256x128xf32>
    %30 = arith.truncf %29 : vector<256x128xf32> to vector<256x128xbf16>
    %cst_20 = arith.constant dense<0.000000e+00> : vector<256x128xf32>
    %31 = tpu.matmul %1, %30, %cst_20 {dimension_numbers = #tpu.dot_dimension_numbers<[1], [0], [0], [1], [0, 0, 1, 1], [], []>} : vector<256x256xbf16>, vector<256x128xbf16>, vector<256x128xf32> -> vector<256x128xf32>
    %32 = arith.truncf %31 : vector<256x128xf32> to vector<256x128xbf16>
    %cst_21 = arith.constant dense<0.000000e+00> : vector<256x128xf32>
    %33 = tpu.matmul %32, %5, %cst_21 {dimension_numbers = #tpu.dot_dimension_numbers<[1], [0], [0], [1], [0, 0, 1, 1], [], []>} : vector<256x128xbf16>, vector<128x128xbf16>, vector<256x128xf32> -> vector<256x128xf32>
    %34 = vector.broadcast %6 : vector<1x128xf32> to vector<256x128xf32>
    %35 = arith.addf %33, %34 : vector<256x128xf32>
    %36 = arith.addf %35, %9 : vector<256x128xf32>
    %cst_22 = arith.constant 0.000000e+00 : f32
    %37 = vector.broadcast %cst_22 : f32 to vector<256x128xf32>
    %38 = arith.maximumf %36, %37 : vector<256x128xf32>
    %39 = arith.truncf %38 : vector<256x128xf32> to vector<256x128xbf16>
    %cst_23 = arith.constant dense<0.000000e+00> : vector<16x128xf32>
    %40 = tpu.matmul %2, %39, %cst_23 {dimension_numbers = #tpu.dot_dimension_numbers<[1], [0], [0], [1], [0, 0, 1, 1], [], []>} : vector<16x256xbf16>, vector<256x128xbf16>, vector<16x128xf32> -> vector<16x128xf32>
    %41 = arith.truncf %40 : vector<16x128xf32> to vector<16x128xbf16>
    %c0_24 = arith.constant 0 : index
    %c0_25 = arith.constant 0 : index
    %42 = vector.load %arg8[%c0_24, %c0_25] : memref<128x128xbf16, #tpu.memory_space<vmem>>, vector<128x128xbf16>
    %cst_26 = arith.constant dense<0.000000e+00> : vector<16x128xf32>
    %43 = tpu.matmul %41, %42, %cst_26 {dimension_numbers = #tpu.dot_dimension_numbers<[1], [0], [0], [1], [0, 0, 1, 1], [], []>} : vector<16x128xbf16>, vector<128x128xbf16>, vector<16x128xf32> -> vector<16x128xf32>
    %c0_27 = arith.constant 0 : index
    %c0_28 = arith.constant 0 : index
    %44 = vector.load %arg9[%c0_27, %c0_28] : memref<1x128xf32, #tpu.memory_space<vmem>>, vector<1x128xf32>
    %45 = vector.broadcast %44 : vector<1x128xf32> to vector<16x128xf32>
    %46 = arith.addf %43, %45 : vector<16x128xf32>
    %cst_29 = arith.constant 0.000000e+00 : f32
    %47 = vector.broadcast %cst_29 : f32 to vector<16x128xf32>
    %48 = arith.maximumf %46, %47 : vector<16x128xf32>
    %c0_30 = arith.constant 0 : index
    %c0_31 = arith.constant 0 : index
    %49 = vector.load %arg15[%c0_30, %c0_31] : memref<16x128xf32, #tpu.memory_space<vmem>>, vector<16x128xf32>
    tpu.vector_store %arg15[%c0_30, %c0_31], %48 {strides = array<i32>} : memref<16x128xf32, #tpu.memory_space<vmem>>, vector<16x128xf32>,
    %50 = arith.truncf %48 : vector<16x128xf32> to vector<16x128xbf16>
    %c0_32 = arith.constant 0 : index
    %c0_33 = arith.constant 0 : index
    %51 = vector.load %arg10[%c0_32, %c0_33] : memref<128x128xbf16, #tpu.memory_space<vmem>>, vector<128x128xbf16>
    %cst_34 = arith.constant dense<0.000000e+00> : vector<16x128xf32>
    %52 = tpu.matmul %50, %51, %cst_34 {dimension_numbers = #tpu.dot_dimension_numbers<[1], [0], [0], [1], [0, 0, 1, 1], [], []>} : vector<16x128xbf16>, vector<128x128xbf16>, vector<16x128xf32> -> vector<16x128xf32>
    %c0_35 = arith.constant 0 : index
    %c0_36 = arith.constant 0 : index
    %53 = vector.load %arg11[%c0_35, %c0_36] : memref<1x128xf32, #tpu.memory_space<vmem>>, vector<1x128xf32>
    %54 = vector.broadcast %53 : vector<1x128xf32> to vector<16x128xf32>
    %55 = arith.addf %52, %54 : vector<16x128xf32>
    %cst_37 = arith.constant 0.000000e+00 : f32
    %56 = vector.broadcast %cst_37 : f32 to vector<16x128xf32>
    %57 = arith.maximumf %55, %56 : vector<16x128xf32>
    %58 = arith.truncf %57 : vector<16x128xf32> to vector<16x128xbf16>
    %c0_38 = arith.constant 0 : index
    %c0_39 = arith.constant 0 : index
    %59 = vector.load %arg12[%c0_38, %c0_39] : memref<128x128xbf16, #tpu.memory_space<vmem>>, vector<128x128xbf16>
    %cst_40 = arith.constant dense<0.000000e+00> : vector<16x128xf32>
    %60 = tpu.matmul %58, %59, %cst_40 {dimension_numbers = #tpu.dot_dimension_numbers<[1], [0], [0], [1], [0, 0, 1, 1], [], []>} : vector<16x128xbf16>, vector<128x128xbf16>, vector<16x128xf32> -> vector<16x128xf32>
    %c0_41 = arith.constant 0 : index
    %c0_42 = arith.constant 0 : index
    %61 = vector.load %arg13[%c0_41, %c0_42] : memref<1x128xf32, #tpu.memory_space<vmem>>, vector<1x128xf32>
    %62 = vector.broadcast %61 : vector<1x128xf32> to vector<16x128xf32>
    %63 = arith.addf %60, %62 : vector<16x128xf32>
    %64 = tpu.iota {dimensions = array<i32: 1>} : vector<16x128xi32>
    %c2_i32 = arith.constant 2 : i32
    %65 = vector.broadcast %c2_i32 : i32 to vector<16x128xi32>
    %66 = arith.cmpi slt, %64, %65 : vector<16x128xi32>
    %cst_43 = arith.constant -1.000000e+30 : f32
    %67 = vector.broadcast %cst_43 : f32 to vector<16x128xf32>
    %68 = arith.select %66, %63, %67 : vector<16x128xi1>, vector<16x128xf32>
    %cst_44 = arith.constant dense<0xFF800000> : vector<16xf32>
    %69 = vector.multi_reduction <maximumf>, %68, %cst_44 [1] : vector<16x128xf32> to vector<16xf32>
    %70 = vector.shape_cast %69 : vector<16xf32> to vector<16x1xf32>
    %71 = vector.broadcast %70 : vector<16x1xf32> to vector<16x128xf32>
    %72 = arith.subf %68, %71 : vector<16x128xf32>
    %73 = math.exp %72 : vector<16x128xf32>
    %cst_45 = arith.constant dense<0.000000e+00> : vector<16xf32>
    %74 = vector.multi_reduction <add>, %73, %cst_45 [1] : vector<16x128xf32> to vector<16xf32>
    %75 = vector.shape_cast %74 : vector<16xf32> to vector<16x1xf32>
    %76 = math.log %75 : vector<16x1xf32>
    %77 = arith.addf %76, %70 : vector<16x1xf32>
    %78 = vector.broadcast %77 : vector<16x1xf32> to vector<16x128xf32>
    %79 = arith.subf %68, %78 : vector<16x128xf32>
    %c0_46 = arith.constant 0 : index
    %c0_47 = arith.constant 0 : index
    %80 = vector.load %arg14[%c0_46, %c0_47] : memref<16x128xf32, #tpu.memory_space<vmem>>, vector<16x128xf32>
    tpu.vector_store %arg14[%c0_46, %c0_47], %79 {strides = array<i32>} : memref<16x128xf32, #tpu.memory_space<vmem>>, vector<16x128xf32>,
    return
  }
  func.func @transform_0(%arg0: i32) -> (i32, i32) {
    %c0_i32 = arith.constant 0 : i32
    %c0_i32_0 = arith.constant 0 : i32
    return %arg0, %c0_i32 : i32, i32
  }
  func.func @transform_1(%arg0: i32) -> (i32, i32) {
    %c0_i32 = arith.constant 0 : i32
    %c0_i32_0 = arith.constant 0 : i32
    return %arg0, %c0_i32 : i32, i32
  }
  func.func @transform_2(%arg0: i32) -> (i32, i32) {
    %c0_i32 = arith.constant 0 : i32
    %c0_i32_0 = arith.constant 0 : i32
    return %arg0, %c0_i32 : i32, i32
  }
  func.func @transform_3(%arg0: i32) -> (i32, i32) {
    %c0_i32 = arith.constant 0 : i32
    %c0_i32_0 = arith.constant 0 : i32
    %c0_i32_1 = arith.constant 0 : i32
    return %c0_i32, %c0_i32_0 : i32, i32
  }
  func.func @transform_4(%arg0: i32) -> (i32, i32) {
    %c0_i32 = arith.constant 0 : i32
    %c0_i32_0 = arith.constant 0 : i32
    %c0_i32_1 = arith.constant 0 : i32
    return %c0_i32, %c0_i32_0 : i32, i32
  }
  func.func @transform_5(%arg0: i32) -> (i32, i32) {
    %c0_i32 = arith.constant 0 : i32
    %c0_i32_0 = arith.constant 0 : i32
    %c0_i32_1 = arith.constant 0 : i32
    return %c0_i32, %c0_i32_0 : i32, i32
  }
  func.func @transform_6(%arg0: i32) -> (i32, i32) {
    %c0_i32 = arith.constant 0 : i32
    %c0_i32_0 = arith.constant 0 : i32
    %c0_i32_1 = arith.constant 0 : i32
    return %c0_i32, %c0_i32_0 : i32, i32
  }
  func.func @transform_7(%arg0: i32) -> (i32, i32) {
    %c0_i32 = arith.constant 0 : i32
    %c0_i32_0 = arith.constant 0 : i32
    %c0_i32_1 = arith.constant 0 : i32
    return %c0_i32, %c0_i32_0 : i32, i32
  }
  func.func @transform_8(%arg0: i32) -> (i32, i32) {
    %c0_i32 = arith.constant 0 : i32
    %c0_i32_0 = arith.constant 0 : i32
    %c0_i32_1 = arith.constant 0 : i32
    return %c0_i32, %c0_i32_0 : i32, i32
  }
  func.func @transform_9(%arg0: i32) -> (i32, i32) {
    %c0_i32 = arith.constant 0 : i32
    %c0_i32_0 = arith.constant 0 : i32
    %c0_i32_1 = arith.constant 0 : i32
    return %c0_i32, %c0_i32_0 : i32, i32
  }
  func.func @transform_10(%arg0: i32) -> (i32, i32) {
    %c0_i32 = arith.constant 0 : i32
    %c0_i32_0 = arith.constant 0 : i32
    %c0_i32_1 = arith.constant 0 : i32
    return %c0_i32, %c0_i32_0 : i32, i32
  }
  func.func @transform_11(%arg0: i32) -> (i32, i32) {
    %c0_i32 = arith.constant 0 : i32
    %c0_i32_0 = arith.constant 0 : i32
    %c0_i32_1 = arith.constant 0 : i32
    return %c0_i32, %c0_i32_0 : i32, i32
  }
  func.func @transform_12(%arg0: i32) -> (i32, i32) {
    %c0_i32 = arith.constant 0 : i32
    %c0_i32_0 = arith.constant 0 : i32
    %c0_i32_1 = arith.constant 0 : i32
    return %c0_i32, %c0_i32_0 : i32, i32
  }
  func.func @transform_13(%arg0: i32) -> (i32, i32) {
    %c0_i32 = arith.constant 0 : i32
    %c0_i32_0 = arith.constant 0 : i32
    return %arg0, %c0_i32 : i32, i32
  }
  func.func @transform_14(%arg0: i32) -> (i32, i32) {
    %c0_i32 = arith.constant 0 : i32
    %c0_i32_0 = arith.constant 0 : i32
    return %arg0, %c0_i32 : i32, i32
  }
}

</mosaic_0001>

<bundles_post_ra>
// kernel: tpu_custom_call.1
= control target key start
LH: loop header
LB: loop body
LE: loop exit
PB: predicated region body
PF: predicated region fallthrough
CT: control target
= control target key end

     0   :  { %s6025_s0 = inlined_call_operand.hbm [shape: bf16[512,128], index: 0, kind: input, shape index: {}]   ;;  %s6026_s1 = inlined_call_operand.hbm [shape: bf16[512,256], index: 1, kind: input, shape index: {}]   ;;  %s6027_s2 = inlined_call_operand.hbm [shape: bf16[32,256], index: 2, kind: input, shape index: {}]   ;;  %s6028_s3 = inlined_call_operand.hbm [shape: bf16[128,128], index: 3, kind: input, shape index: {}]   ;;  %s6029_s4 = inlined_call_operand.vmem [shape: f32[1,128], index: 4, kind: input, shape index: {}]   ;;  %s6030_s5 = inlined_call_operand.hbm [shape: bf16[128,128], index: 5, kind: input, shape index: {}]   ;;  %s6031_s6 = inlined_call_operand.vmem [shape: f32[1,128], index: 6, kind: input, shape index: {}]   ;;  %s6032_s7 = inlined_call_operand.hbm [shape: bf16[128,128], index: 7, kind: input, shape index: {}]   ;;  %s6033_s8 = inlined_call_operand.vmem [shape: f32[1,128], index: 8, kind: input, shape index: {}]   ;;  %s6034_s9 = inlined_call_operand.hbm [shape: bf16[128,128], index: 9, kind: input, shape index: {}]   ;;  %s6035_s10 = inlined_call_operand.vmem [shape: f32[1,128], index: 10, kind: input, shape index: {}]   ;;  %s6036_s11 = inlined_call_operand.hbm [shape: bf16[128,128], index: 11, kind: input, shape index: {}]   ;;  %s6037_s12 = inlined_call_operand.vmem [shape: f32[1,128], index: 12, kind: input, shape index: {}]   ;;  %s6038_s13 = inlined_call_operand.hbm [shape: f32[32,128], index: 13, kind: output, shape index: {0}]   ;;  %s6039_s14 = inlined_call_operand.hbm [shape: f32[32,128], index: 14, kind: output, shape index: {1}]  }
   0x1   :  { %6107 = sst [smem:[#allocation64_spill]] %s6026_s1 }
   0x2   :  { %6108 = sst [smem:[#allocation65_spill]] %s6028_s3 }
   0x3   :  { %6109 = sst [smem:[#allocation66_spill]] %s6031_s6 }
   0x4   :  { %6110 = sst [smem:[#allocation67_spill]] %s6032_s7 }
   0x5   :  { %6111 = sst [smem:[#allocation68_spill]] %s6033_s8 }
   0x6   :  { %6112 = sst [smem:[#allocation69_spill]] %s6035_s10 }
   0x7   :  { %6113 = sst [smem:[#allocation70_spill]] %s6037_s12 }
   0x8   :  { %6114 = sst [smem:[#allocation71_spill]] %s6038_s13 }
   0x9   :  { %6115 = sst [smem:[#allocation72_spill]] %s6039_s14 }
   0xa   :  { %20 = vsyncpa [#allocation3], 0 }
   0xb   :  { %22 = vsyncpa [#allocation3 + $0x1], 0 }
   0xc   :  { %23 = vsyncpa [#allocation6], 0 }
   0xd   :  { %25 = vsyncpa [#allocation6 + $0x1], 0 }
   0xe   :  { %26 = vsyncpa [#allocation9], 0 }
   0xf   :  { %27 = vsyncpa [#allocation12], 0 }
  0x10   :  { %28 = vsyncpa [#allocation15], 0 }
  0x11   :  { %29 = vsyncpa [#allocation4], 0 }
  0x12   :  { %31 = vsyncpa [#allocation4 + $0x1], 0 }
  0x13   :  { %32 = vsyncpa [#allocation18], 0 }
  0x14   :  { %34 = vsyncpa [#allocation18 + $0x1], 0  ;;  %s4818_s29 = smov 0   ;;  %s4820_s30 = smov 0  }
  0x15   :  { %s4822_s15 = smov 0   ;;  %s4824_s16 = smov 0  }
  0x16 LB: > { %6116 = sst [smem:[#allocation26_spill]] %s4711_s29  ;;  %s4839_s17 = sadd.s32 4294967295, %s4723_s16   ;;  %s4723_s16 = sphi %s4824_s16, %s6226_s16   ;;  %s4719_s15 = sphi %s4822_s15, %s6228_s15   ;;  %s4715_s30 = sphi %s4820_s30, %s6230_s30   ;;  %s4711_s29 = sphi %s4818_s29, %s6229_s29  }
  0x17   : > { %6117 = sst [smem:[#allocation27_spill]] %s4719_s15  ;;  %s3238_s18 = sadd.s32 4294967294, %s4723_s16  }
  0x18   : > { %p60_p0 = scmp.ne.s32.totalorder %s4715_s30, %s4711_s29  ;;  %p6043_p1 = scmp.eq.s32.totalorder %s4839_s17, 0 }
  0x19   : > { %p352_p3 = scmp.eq.s32.totalorder %s3238_s18, 1  ;;  %p3239_p5 = scmp.ge.s32.totalorder %s4723_s16, 1 }
  0x1a   : > { %p4848_p4 = por %p6043_p1, %p60_p0  ;;  %p385_p7 = scmp.lt.s32.totalorder %s4723_s16, 3 }
  0x1b   : > { %p4853_p6 = por %p352_p3, %p60_p0  ;;  %s4725_s22 = smov [#allocation8]  }
  0x1c   : > { %s6118_s19 = scalar_select %p4848_p4, 1, 0 }
  0x1d   : > { %s6119_s20 = scalar_select %p4853_p6, 1, 0 }
  0x1e   : > { %p4858_p8 = pnand %p3239_p5, %p385_p7  ;;  %s397_s23 = sshll.u32 %s4725_s22, 4  ;;  %s4862_s23 = int_to_ptr.vmem [resolvable:$true] %s397_s23 }
  0x1f   : > { %6120 = sst [smem:[#allocation28_spill]] %s6119_s20  ;;  %s4726_s25 = smov [#allocation11]  }
  0x20   : > { %s6121_s21 = scalar_select %p4858_p8, 1, 0 }
  0x21   : > { %p4141_p9 = pneg %p4858_p8  ;;  %s429_s26 = sshll.u32 %s4726_s25, 4  ;;  %s4873_s26 = int_to_ptr.vmem [resolvable:$true] %s429_s26 }
  0x22   : > { %s6123_s3 = sld [smem:[#allocation65_spill]] }
  0x23   : > { %p4869_p11 = pnand %p4141_p9, %p6043_p1 }
  0x25   : > { %s6122_s24 = scalar_select %p4869_p11, 1, 0 }
  0x26   : > { %p4883_p13 = pneg %p4869_p11 }
  0x28   : > { %s4379_s18 = scalar_lea.hbm %s6123_s3, 1024 }
  0x29   : > { %p4380_p12 = scmp.ne.s32.totalorder %s6123_s3, %s4379_s18  ;;  %p4386_p5 = scmp.lt.u32.totalorder %s4379_s18, %s6123_s3 }
  0x2a   : > { %s6124_s29 = scalar_select %p4883_p13, 1, 0 }
  0x2b   : > { %p4382_p0 = pnand %p4883_p13, %p4380_p12 }
  0x2d   : > { %p4383_p3 = pneg %p4382_p0 }
  0x2f   : > { %p4388_p7 = pnand %p4386_p5, %p4383_p3 }
  0x31   : > { %4391 = shalt.err (!%p4388_p7)
}
  0x32   : > { %s4392_s20 = scalar_lea.vmem %s4862_s23, 1024  ;;  %p4400_p2 = scmp.lt.s32.totalorder %s4862_s23, %s4862_s23 }
  0x33   : > { %p4393_p9 = scmp.ne.s32.totalorder %s4862_s23, %s4392_s20  ;;  %p4401_p6 = scmp.lt.s32.totalorder %s4392_s20, %s4392_s20 }
  0x35   : > { %p4395_p10 = pnand %p4393_p9, %p4883_p13  ;;  %p4402_p12 = por %p4401_p6, %p4400_p2 }
  0x37   : > { %p4396_p1 = pneg %p4395_p10 }
  0x39   : > { %p4403_p0 = pnand %p4402_p12, %p4396_p1 }
  0x3b   : > { %4406 = shalt.err (!%p4403_p0)
}
  0x3c   : > { %s6045_s27 = smov 64   ;;  %s6047_s13 = smov 4  }
  0x3d   : > { %4144 = dma.hbm_to_vmem [thread:$0]  (!%p4869_p11), %s6123_s3, 1024, %s4862_s23, [#allocation9], %s6045_s27, %s6045_s27, %s6047_s13  }
  0x3e   : > { %s6125_s7 = sld [smem:[#allocation67_spill]] }
  0x44   : > { %s4407_s20 = scalar_lea.hbm %s6125_s7, 1024 }
  0x45   : > { %p4408_p1 = scmp.ne.s32.totalorder %s6125_s7, %s4407_s20  ;;  %p4414_p10 = scmp.lt.u32.totalorder %s4407_s20, %s6125_s7 }
  0x47   : > { %p4410_p2 = pnand %p4408_p1, %p4883_p13 }
  0x49   : > { %p4411_p6 = pneg %p4410_p2 }
  0x4b   : > { %p4416_p3 = pnand %p4414_p10, %p4411_p6 }
  0x4d   : > { %4419 = shalt.err (!%p4416_p3)
}
  0x4e   : > { %s4420_s23 = scalar_lea.vmem %s4873_s26, 1024  ;;  %p4428_p12 = scmp.lt.s32.totalorder %s4873_s26, %s4873_s26 }
  0x4f   : > { %p4421_p5 = scmp.ne.s32.totalorder %s4873_s26, %s4420_s23  ;;  %p4429_p0 = scmp.lt.s32.totalorder %s4420_s23, %s4420_s23 }
  0x51   : > { %p4423_p7 = pnand %p4421_p5, %p4883_p13  ;;  %p4430_p1 = por %p4429_p0, %p4428_p12 }
  0x53   : > { %p4424_p9 = pneg %p4423_p7 }
  0x55   : > { %p4431_p2 = pnand %p4430_p1, %p4424_p9 }
  0x57   : > { %4434 = shalt.err (!%p4431_p2)
}
  0x58   : > { %4150 = dma.hbm_to_vmem [thread:$0]  (!%p4869_p11), %s6125_s7, 1024, %s4873_s26, [#allocation12], %s6045_s27, %s6045_s27, %s6047_s13  }
  0x59   : > { %s4934_s12 = sadd.s32 1, %s4723_s16   ;;  %s47_s14 = sadd.s32 1, %s4719_s15 }
  0x5a   : > { %6126 = sst [smem:[#allocation29_spill]] %s4934_s12  ;;  %s44_s28 = ssub.s32 %s4723_s16, %s4934_s12 }
  0x5b   : > { %p54_p6 = scmp.ne.s32.totalorder %s4719_s15, %s4715_s30  ;;  %p45_p10 = scmp.eq.s32.totalorder %s44_s28, 0 }
  0x5c   : > { %p55_p3 = scmp.eq.s32.totalorder %s4723_s16, 0  ;;  %p6127_p5 = scmp.eq.s32.totalorder %s4839_s17, 1 }
  0x5d   : > { %p4179_p9 = scmp.lt.s32.totalorder %s4723_s16, 2  ;;  %s4953_s25 = sand.u32 1, %s4719_s15  }
  0x5e   : > { %p4944_p7 = por %p6127_p5, %p54_p6  ;;  %p56_p12 = por %p55_p3, %p54_p6 }
  0x5f   : > { %s4950_s22 = scalar_select %p45_p10, %s4719_s15, %s47_s14  }
  0x60   : > { %s6128_s18 = scalar_select %p4944_p7, 1, 0 }
  0x61   : > { %6130 = sst [smem:[#allocation31_spill]] %s4950_s22  ;;  %s499_s26 = sand.u32 1, %s4723_s16  }
  0x62   : > { %6129 = sst [smem:[#allocation30_spill]] %s6128_s18  ;;  %s3249_s20 = sshll.u32 %s4953_s25, 8 }
  0x63   : > { %p4957_p0 = pnand %p4179_p9, %p56_p12  ;;  %s3373_s8 = sshll.u32 %s4723_s16, 12 }
  0x64   : > { %s6132_s1 = sld [smem:[#allocation64_spill]]  ;;  %s503_s14 = scalar_lea.vmem [#allocation5], %s3249_s20 }
  0x65   : > { %s6131_s23 = scalar_select %p4957_p0, 1, 0 }
  0x66   : > { %s511_s13 = sshll.u32 %s503_s14, 4  ;;  %s4969_s3 = scalar_lea.sflag [#allocation6], %s499_s26  ;;  %s4967_s13 = int_to_ptr.vmem [resolvable:$true] %s511_s13 }
  0x67   : > { %p4975_p2 = pneg %p4957_p0 }
  0x69   : > { %s6133_s22 = scalar_select %p4975_p2, 1, 0 }
  0x6a   : > { %s4965_s27 = scalar_lea.hbm %s6132_s1, %s3373_s8  ;;  %s4440_s20 = scalar_lea.hbm %s6132_s1, 8192 }
  0x6b   : > { %s4435_s7 = scalar_lea.hbm %s4965_s27, 4096  ;;  %p4441_p3 = scmp.lt.u32.totalorder %s4965_s27, %s6132_s1 }
  0x6c   : > { %p4436_p1 = scmp.ne.s32.totalorder %s4965_s27, %s4435_s7  ;;  %p4442_p5 = scmp.lt.u32.totalorder %s4440_s20, %s4435_s7 }
  0x6d   : > { %p4444_p12 = scmp.lt.u32.totalorder %s4435_s7, %s4965_s27 }
  0x6e   : > { %p4438_p6 = pnand %p4975_p2, %p4436_p1  ;;  %p4443_p9 = por %p4442_p5, %p4441_p3 }
  0x70   : > { %p4439_p10 = pneg %p4438_p6  ;;  %p4445_p7 = por %p4444_p12, %p4443_p9 }
  0x72   : > { %p4446_p4 = pnand %p4445_p7, %p4439_p10 }
  0x74   : > { %4449 = shalt.err (!%p4446_p4)
}
  0x75   : > { %s4450_s26 = scalar_lea.vmem %s4967_s13, 4096  ;;  %s4729_s8 = smov [#allocation5]  }
  0x76   : > { %p4451_p1 = scmp.ne.s32.totalorder %s4967_s13, %s4450_s26  ;;  %s4455_s10 = sshll.u32 %s4729_s8, 4  ;;  %s4456_s10 = int_to_ptr.vmem [resolvable:$false] %s4455_s10 }
  0x77   : > { %s4457_s28 = scalar_lea.vmem %s4456_s10, 8192  ;;  %p4458_p11 = scmp.lt.s32.totalorder %s4967_s13, %s4456_s10 }
  0x78   : > { %p4453_p6 = pnand %p4451_p1, %p4975_p2  ;;  %p4459_p13 = scmp.lt.s32.totalorder %s4457_s28, %s4450_s26 }
  0x7a   : > { %p4454_p8 = pneg %p4453_p6  ;;  %p4460_p3 = por %p4459_p13, %p4458_p11 }
  0x7c   : > { %p4461_p5 = pnand %p4460_p3, %p4454_p8 }
  0x7e   : > { %4464 = shalt.err (!%p4461_p5)
}
  0x7f   : > { %s6064_s7 = smov 128   ;;  %s6065_s20 = smov 8  }
  0x80   : > { %4163 = dma.hbm_to_vmem [thread:$0]  (!%p4957_p0), %s4965_s27, 4096, %s4967_s13, %s4969_s3, %s6064_s7, %s6064_s7, %s6065_s20  }
  0x81   : > { %s4732_s14 = smov [#allocation10]   ;;  %s4733_s1 = smov [#allocation13]  }
  0x82   : > { %s413_s8 = sshll.u32 %s4732_s14, 4  ;;  %s445_s10 = sshll.u32 %s4733_s1, 4  ;;  %s414_s8 = int_to_ptr.vmem [resolvable:$true] %s413_s8  ;;  %s5002_s10 = int_to_ptr.vmem [resolvable:$true] %s445_s10 }
  0x83   : > { %s4465_s15 = scalar_lea.hbm %s6030_s5, 1024  ;;  %p6134_p8 = scmp.ne.s32.totalorder %s6124_s29, 0 }
  0x84   : > { %p4466_p4 = scmp.ne.s32.totalorder %s6030_s5, %s4465_s15  ;;  %p4472_p7 = scmp.lt.u32.totalorder %s4465_s15, %s6030_s5 }
  0x86   : > { %p4468_p11 = pnand %p4466_p4, %p6134_p8 }
  0x88   : > { %p4469_p13 = pneg %p4468_p11 }
  0x8a   : > { %p4474_p10 = pnand %p4472_p7, %p4469_p13 }
  0x8c   : > { %4477 = shalt.err (!%p4474_p10)
}
  0x8d   : > { %s4478_s1 = scalar_lea.vmem %s414_s8, 1024  ;;  %p4486_p6 = scmp.lt.s32.totalorder %s414_s8, %s414_s8 }
  0x8e   : > { %p4479_p9 = scmp.ne.s32.totalorder %s414_s8, %s4478_s1  ;;  %p4487_p3 = scmp.lt.s32.totalorder %s4478_s1, %s4478_s1 }
  0x90   : > { %p4481_p12 = pnand %p4479_p9, %p6134_p8  ;;  %p4488_p5 = por %p4487_p3, %p4486_p6 }
  0x92   : > { %p4482_p1 = pneg %p4481_p12 }
  0x94   : > { %p4489_p0 = pnand %p4488_p5, %p4482_p1 }
  0x96   : > { %4492 = shalt.err (!%p4489_p0)
}
  0x97   : > { %p6135_p4 = scmp.ne.s32.totalorder %s6122_s24, 0  ;;  %s6136_s13 = smov 4  }
  0x98   : > { %s6137_s12 = smov 64   ;;  %s4493_s26 = scalar_lea.hbm %s6034_s9, 1024 }
  0x99   : > { %4147 = dma.hbm_to_vmem [thread:$0]  (!%p6135_p4), %s6030_s5, 1024, %s414_s8, [#allocation9], %s6137_s12, %s6137_s12, %s6136_s13  }
  0x9a   : > { %p4494_p11 = scmp.ne.s32.totalorder %s6034_s9, %s4493_s26  ;;  %p4500_p7 = scmp.lt.u32.totalorder %s4493_s26, %s6034_s9 }
  0x9c   : > { %p4496_p0 = pnand %p4494_p11, %p6134_p8 }
  0x9e   : > { %p4497_p13 = pneg %p4496_p0 }
  0xa0   : > { %p4502_p10 = pnand %p4500_p7, %p4497_p13 }
  0xa2   : > { %4505 = shalt.err (!%p4502_p10)
}
  0xa3   : > { %s4506_s8 = scalar_lea.vmem %s5002_s10, 1024  ;;  %p4514_p6 = scmp.lt.s32.totalorder %s5002_s10, %s5002_s10 }
  0xa4   : > { %p4507_p9 = scmp.ne.s32.totalorder %s5002_s10, %s4506_s8  ;;  %p4515_p3 = scmp.lt.s32.totalorder %s4506_s8, %s4506_s8 }
  0xa6   : > { %p4509_p12 = pnand %p4507_p9, %p6134_p8  ;;  %p4516_p5 = por %p4515_p3, %p4514_p6 }
  0xa8   : > { %p4510_p1 = pneg %p4509_p12 }
  0xaa   : > { %p4517_p11 = pnand %p4516_p5, %p4510_p1 }
  0xac   : > { %4520 = shalt.err (!%p4517_p11)
}
  0xad   : > { %4153 = dma.hbm_to_vmem [thread:$0]  (!%p6135_p4), %s6034_s9, 1024, %s5002_s10, [#allocation12], %s6137_s12, %s6137_s12, %s6136_s13  }
  0xae   : > { %s4734_s15 = smov [#allocation14]   ;;  %s3246_s14 = sshll.u32 %s4953_s25, 7 }
  0xaf   : > { %s461_s18 = sshll.u32 %s4734_s15, 4  ;;  %s4521_s27 = scalar_lea.hbm %s6036_s11, 1024  ;;  %s462_s18 = int_to_ptr.vmem [resolvable:$true] %s461_s18 }
  0xb0   : > { %p4522_p0 = scmp.ne.s32.totalorder %s6036_s11, %s4521_s27  ;;  %p4528_p10 = scmp.lt.u32.totalorder %s4521_s27, %s6036_s11 }
  0xb2   : > { %p4524_p13 = pnand %p4522_p0, %p6134_p8 }
  0xb4   : > { %p4525_p7 = pneg %p4524_p13 }
  0xb6   : > { %p4530_p9 = pnand %p4528_p10, %p4525_p7 }
  0xb8   : > { %4533 = shalt.err (!%p4530_p9)
}
  0xb9   : > { %s4534_s10 = scalar_lea.vmem %s462_s18, 1024  ;;  %p4542_p3 = scmp.lt.s32.totalorder %s462_s18, %s462_s18 }
  0xba   : > { %p4535_p12 = scmp.ne.s32.totalorder %s462_s18, %s4534_s10  ;;  %p4543_p5 = scmp.lt.s32.totalorder %s4534_s10, %s4534_s10 }
  0xbc   : > { %p4537_p1 = pnand %p4535_p12, %p6134_p8  ;;  %p4544_p11 = por %p4543_p5, %p4542_p3 }
  0xbe   : > { %p4538_p6 = pneg %p4537_p1 }
  0xc0   : > { %p4545_p2 = pnand %p4544_p11, %p4538_p6 }
  0xc2   : > { %4548 = shalt.err (!%p4545_p2)
}
  0xc3   : > { %4156 = dma.hbm_to_vmem [thread:$0]  (!%p6135_p4), %s6036_s11, 1024, %s462_s18, [#allocation15], %s6137_s12, %s6137_s12, %s6136_s13  }
  0xc4   : > { %s3371_s29 = sshll.u32 %s4723_s16, 11  ;;  %s482_s15 = scalar_lea.vmem [#allocation2], %s3246_s14 }
  0xc5   : > { %s489_s26 = sshll.u32 %s482_s15, 4  ;;  %s5077_s1 = scalar_lea.hbm %s6025_s0, %s3371_s29  ;;  %s5079_s26 = int_to_ptr.vmem [resolvable:$true] %s489_s26 }
  0xc6   : > { %s479_s24 = scalar_lea.sflag [#allocation3], %s4953_s25  ;;  %s4549_s8 = scalar_lea.hbm %s5077_s1, 2048 }
  0xc7   : > { %p4550_p2 = scmp.ne.s32.totalorder %s5077_s1, %s4549_s8  ;;  %p6138_p8 = scmp.ne.s32.totalorder %s6133_s22, 0 }
  0xc8   : > { %s4554_s7 = scalar_lea.hbm %s6025_s0, 4096  ;;  %p4555_p13 = scmp.lt.u32.totalorder %s5077_s1, %s6025_s0 }
  0xc9   : > { %p4552_p0 = pnand %p4550_p2, %p6138_p8  ;;  %p4556_p7 = scmp.lt.u32.totalorder %s4554_s7, %s4549_s8 }
  0xca   : > { %p4558_p9 = scmp.lt.u32.totalorder %s4549_s8, %s5077_s1 }
  0xcb   : > { %p4553_p4 = pneg %p4552_p0  ;;  %p4557_p10 = por %p4556_p7, %p4555_p13 }
  0xcd   : > { %p4559_p12 = por %p4558_p9, %p4557_p10 }
  0xcf   : > { %p4560_p1 = pnand %p4559_p12, %p4553_p4 }
  0xd1   : > { %4563 = shalt.err (!%p4560_p1)
}
  0xd2   : > { %s4564_s6 = scalar_lea.vmem %s5079_s26, 2048  ;;  %s4735_s29 = smov [#allocation2]  }
  0xd3   : > { %p4565_p6 = scmp.ne.s32.totalorder %s5079_s26, %s4564_s6  ;;  %s4569_s15 = sshll.u32 %s4735_s29, 4  ;;  %s4570_s15 = int_to_ptr.vmem [resolvable:$false] %s4569_s15 }
  0xd4   : > { %s4571_s28 = scalar_lea.vmem %s4570_s15, 4096  ;;  %p4572_p11 = scmp.lt.s32.totalorder %s5079_s26, %s4570_s15 }
  0xd5   : > { %p4567_p3 = pnand %p4565_p6, %p6138_p8  ;;  %p4573_p2 = scmp.lt.s32.totalorder %s4571_s28, %s4564_s6 }
  0xd7   : > { %p4568_p5 = pneg %p4567_p3  ;;  %p4574_p0 = por %p4573_p2, %p4572_p11 }
  0xd9   : > { %p4575_p13 = pnand %p4574_p0, %p4568_p5 }
  0xdb   : > { %4578 = shalt.err (!%p4575_p13)
}
  0xdc   : > { %p6139_p4 = scmp.ne.s32.totalorder %s6131_s23, 0  ;;  %s3253_s27 = sshll.u32 %s4953_s25, 4 }
  0xdd   : > { %s3375_s8 = sshll.u32 %s4723_s16, 8  ;;  %s525_s10 = scalar_lea.vmem [#allocation7], %s3253_s27 }
  0xde   : > { %4160 = dma.hbm_to_vmem [thread:$0]  (!%p6139_p4), %s5077_s1, 2048, %s5079_s26, %s479_s24, %s6137_s12, %s6137_s12, %s6136_s13  }
  0xdf   : > { %s5113_s7 = scalar_lea.hbm %s6027_s2, %s3375_s8  ;;  %s533_s20 = sshll.u32 %s525_s10, 4  ;;  %s5115_s20 = int_to_ptr.vmem [resolvable:$true] %s533_s20 }
  0xe0   : > { %s4579_s6 = scalar_lea.hbm %s5113_s7, 256  ;;  %s4584_s12 = scalar_lea.hbm %s6027_s2, 512 }
  0xe1   : > { %p4580_p7 = scmp.ne.s32.totalorder %s5113_s7, %s4579_s6  ;;  %p4585_p12 = scmp.lt.u32.totalorder %s5113_s7, %s6027_s2 }
  0xe2   : > { %p4586_p1 = scmp.lt.u32.totalorder %s4584_s12, %s4579_s6  ;;  %p4588_p3 = scmp.lt.u32.totalorder %s4579_s6, %s5113_s7 }
  0xe3   : > { %p4582_p10 = pnand %p4580_p7, %p6138_p8 }
  0xe4   : > { %p4587_p6 = por %p4586_p1, %p4585_p12 }
  0xe5   : > { %p4583_p9 = pneg %p4582_p10 }
  0xe6   : > { %p4589_p5 = por %p4588_p3, %p4587_p6 }
  0xe8   : > { %p4590_p11 = pnand %p4589_p5, %p4583_p9 }
  0xea   : > { %4593 = shalt.err (!%p4590_p11)
}
  0xeb   : > { %s4594_s24 = scalar_lea.vmem %s5115_s20, 256  ;;  %s4736_s29 = smov [#allocation7]  }
  0xec   : > { %p4595_p2 = scmp.ne.s32.totalorder %s5115_s20, %s4594_s24  ;;  %s4599_s15 = sshll.u32 %s4736_s29, 4  ;;  %s4600_s15 = int_to_ptr.vmem [resolvable:$false] %s4599_s15 }
  0xed   : > { %s4601_s28 = scalar_lea.vmem %s4600_s15, 512  ;;  %p4602_p7 = scmp.lt.s32.totalorder %s5115_s20, %s4600_s15 }
  0xee   : > { %p4597_p0 = pnand %p4595_p2, %p6138_p8  ;;  %p4603_p10 = scmp.lt.s32.totalorder %s4601_s28, %s4594_s24 }
  0xf0   : > { %p4598_p13 = pneg %p4597_p0  ;;  %p4604_p12 = por %p4603_p10, %p4602_p7 }
  0xf2   : > { %p4605_p1 = pnand %p4604_p12, %p4598_p13 }
  0xf4   : > { %4608 = shalt.err (!%p4605_p1)
}
  0xf5   : > { %s6140_s27 = smov 8   ;;  %s6141_s8 = smov 128  }
  0xf6   : > { %4166 = dma.hbm_to_vmem [thread:$0]  (!%p6139_p4), %s5113_s7, 256, %s5115_s20, %s4969_s3, %s6141_s8, %s6141_s8, %s6140_s27  }
  0xf7   : > { %p6142_p8 = scmp.ne.s32.totalorder %s6121_s21, 0 }
  0xf9   : > { %545 = sbr.rel (%p6142_p8) target bundleno = 3508 (0xdb4), region = 72 }
 0x100   : > { %s5145_s22 = sand.u32 1, %s4715_s30   ;;  %p6143_p9 = scmp.ne.s32.totalorder %s6118_s19, 0 }
 0x101   : > { %s3258_s18 = sshll.u32 %s5145_s22, 7  ;;  %s548_s14 = scalar_lea.sflag [#allocation3], %s5145_s22 }
 0x102   : > { %s5149_s10 = scalar_lea.vmem [#allocation2], %s3258_s18 }
 0x103   : > { %4682 = dma.done.wait (%p6143_p9), %s548_s14, 2048  }
 0x104   : > { %4684 = vsyncadd (%p6143_p9), %s548_s14, 4294965248  ;;  %s556_s3 = sand.u32 1, %s4839_s17   ;;  %s3259_s21 = sshll.u32 %s5145_s22, 8 }
 0x105   : > { %s557_s23 = scalar_lea.sflag [#allocation6], %s556_s3  ;;  %s5157_s7 = scalar_lea.vmem [#allocation5], %s3259_s21 }
 0x106   : > { %4686 = dma.done.wait (%p6143_p9), %s557_s23, 4352  }
 0x107   : > { %4688 = vsyncadd (%p6143_p9), %s557_s23, 4294962944  ;;  %s5164_s20 = sshll.u32 %s5145_s22, 4  ;;  %p6144_p4 = scmp.eq.s32.totalorder %s4839_s17, 0 }
 0x108   : > { %s569_s6 = scalar_lea.vmem [#allocation7], %s5164_s20 }
 0x109   : > { %4690 = dma.done.wait (%p6144_p4), [#allocation9], 2048   ;;  %p6145_p6 = pmov %p6144_p4 }
 0x10a   : > { %p6146_p3 = pmov %p6144_p4 }
 0x10b   : > { %4692 = vsyncadd (%p6145_p6), [#allocation9], 4294965248 }
 0x10c   : > { %4694 = dma.done.wait (%p6146_p3), [#allocation12], 2048   ;;  %p6147_p5 = pmov %p6146_p3 }
 0x10d   : > { %p6148_p11 = pmov %p6146_p3 }
 0x10e   : > { %4696 = vsyncadd (%p6147_p5), [#allocation12], 4294965248 }
 0x10f   : > { %4698 = dma.done.wait (%p6148_p11), [#allocation15], 1024   ;;  %p6149_p2 = pmov %p6146_p3 }
 0x110   : > { %v4231_v0 = vld [vmem:[#allocation8] sm:$0xff]   ;;  %v4232_v1 = vld [vmem:[#allocation8 + $0x8] sm:$0xff]   ;;  %v4233_v2 = vld [vmem:[#allocation8 + $0x10] sm:$0xff]   ;;  %s6182_s26 = sld [smem:[#allocation66_spill]]  ;;  %vm4738_vm0 = vmmov 0   ;;  %s6215_s28 = sld [smem:[#allocation68_spill]] }
 0x111   : > { %4700 = vsyncadd (%p6149_p2), [#allocation15], 4294966272  ;;  %3859 = vmatprep.subr.bf16.mxu0 %v4231_v0  ;;  %v4234_v3 = vld [vmem:[#allocation8 + $0x18] sm:$0xff]   ;;  %v4239_v4 = vld [vmem:[%s5149_s10] sm:$0xff]   ;;  %s5916_s27 = scalar_lea.vmem [#allocation17], %s5164_s20  ;;  %s6216_s14 = sld [smem:[#allocation69_spill]] }
 0x112   : > { %3860 = vmatpush3.bf16.msra.mxu0 %v4231_v0  ;;  %3875 = vmatprep.mubr.bf16.mxu0 %v4239_v4  ;;  %v4235_v5 = vld [vmem:[#allocation8 + $0x20] sm:$0xff]   ;;  %v4236_v6 = vld [vmem:[#allocation8 + $0x28] sm:$0xff]   ;;  %v4237_v7 = vld [vmem:[#allocation8 + $0x30] sm:$0xff]   ;;  %s6217_s21 = sld [smem:[#allocation70_spill]]  ;;  %s6219_s13 = sld [smem:[#allocation72_spill]] }
 0x113   : > { %3861 = vmatprep.subr.bf16.mxu0 %v4232_v1  ;;  %v4238_v8 = vld [vmem:[#allocation8 + $0x38] sm:$0xff]   ;;  %v4240_v9 = vld [vmem:[%s5149_s10 + $0x8] sm:$0xff]   ;;  %v4241_v10 = vld [vmem:[%s5149_s10 + $0x10] sm:$0xff]   ;;  %s6218_s23 = sld [smem:[#allocation30_spill]]  ;;  %s3013_s1 = scalar_lea.sflag [#allocation18], %s5145_s22 }
 0x114   : > { %v4242_v11 = vld [vmem:[%s5149_s10 + $0x18] sm:$0xff]   ;;  %v4243_v12 = vld [vmem:[%s5149_s10 + $0x20] sm:$0xff]   ;;  %v4244_v13 = vld [vmem:[%s5149_s10 + $0x28] sm:$0xff]   ;;  %s4739_s29 = smov [#allocation17]  }
 0x115   : > { %v4245_v14 = vld [vmem:[%s5149_s10 + $0x30] sm:$0xff]   ;;  %v4246_v15 = vld [vmem:[%s5149_s10 + $0x38] sm:$0xff]   ;;  %v4247_v16 = vld [vmem:[%s5149_s10 + $0x40] sm:$0xff]   ;;  %s4613_s15 = sshll.u32 %s4739_s29, 4  ;;  %s4614_s15 = int_to_ptr.vmem [resolvable:$false] %s4613_s15 }
 0x116   : > { %3862 = vmatpush3.bf16.msra.mxu0 %v4232_v1  ;;  %v4248_v17 = vld [vmem:[%s5149_s10 + $0x48] sm:$0xff]   ;;  %v4249_v18 = vld [vmem:[%s5149_s10 + $0x50] sm:$0xff]   ;;  %v4250_v19 = vld [vmem:[%s5149_s10 + $0x58] sm:$0xff]  }
 0x117   : > { %3863 = vmatprep.subr.bf16.mxu0 %v4233_v2  ;;  %v4251_v20 = vld [vmem:[%s5149_s10 + $0x60] sm:$0xff]   ;;  %v4252_v21 = vld [vmem:[%s5149_s10 + $0x68] sm:$0xff]   ;;  %v4253_v22 = vld [vmem:[%s5149_s10 + $0x70] sm:$0xff]  }
 0x118   : > { %v4254_v23 = vld [vmem:[%s5149_s10 + $0x78] sm:$0xff]   ;;  %v5196_v24 = vld [vmem:[%s5157_s7 + $0x4] ss:$8 sps:$4 sm:$0xff]   ;;  %v5216_v41 = vld [vmem:[%s6029_s4] ss:$0 sm:$0xff] }
 0x119   : > { %1306 = vmatprep.mubr.bf16.mxu1 %v5196_v24  ;;  %p6220_p13 = scmp.ne.s32.totalorder %s6218_s23, 0 }
 0x11a   : > { %3864 = vmatpush3.bf16.msra.mxu0 %v4233_v2 }
 0x11b   : > { %3865 = vmatprep.subr.bf16.mxu0 %v4234_v3 }
 0x11e   : > { %3866 = vmatpush3.bf16.msra.mxu0 %v4234_v3 }
 0x11f   : > { %3867 = vmatprep.subr.bf16.mxu0 %v4235_v5 }
 0x122   : > { %3868 = vmatpush3.bf16.msra.mxu0 %v4235_v5 }
 0x123   : > { %3869 = vmatprep.subr.bf16.mxu0 %v4236_v6 }
 0x126   : > { %3870 = vmatpush3.bf16.msra.mxu0 %v4236_v6 }
 0x127   : > { %3871 = vmatprep.subr.bf16.mxu0 %v4237_v7 }
 0x12a   : > { %3872 = vmatpush3.bf16.msra.mxu0 %v4237_v7 }
 0x12b   : > { %3873 = vmatprep.subr.bf16.mxu0 %v4238_v8 }
 0x12e   : > { %3874 = vmatpush3.bf16.msra.mxu0 %v4238_v8 }
 0x131   : > { %3876 = vmatmul.mubr.bf16.vlgmr.msra.gmra.mrb[0].mxu0 %v4240_v9 }
 0x132   : > { %3879 = vmatprep.mubr.bf16.mxu0 %v4241_v10 }
 0x139   : > { %3880 = vmatmul.mubr.bf16.gmra.mrb[4].mxu0 %v4242_v11 }
 0x13a   : > { %3883 = vmatprep.mubr.bf16.mxu0 %v4243_v12 }
 0x141   : > { %3884 = vmatmul.mubr.bf16.gmra.mrb[8].mxu0 %v4244_v13 }
 0x142   : > { %3887 = vmatprep.mubr.bf16.mxu0 %v4245_v14 }
 0x149   : > { %3888 = vmatmul.mubr.bf16.gmra.mrb[12].mxu0 %v4246_v15 }
 0x14a   : > { %3891 = vmatprep.mubr.bf16.mxu0 %v4247_v16 }
 0x151   : > { %3892 = vmatmul.mubr.bf16.gmra.mrb[16].mxu0 %v4248_v17 }
 0x152   : > { %3895 = vmatprep.mubr.bf16.mxu0 %v4249_v18 }
 0x159   : > { %3896 = vmatmul.mubr.bf16.gmra.mrb[20].mxu0 %v4250_v19 }
 0x15a   : > { %3899 = vmatprep.mubr.bf16.mxu0 %v4251_v20 }
 0x161   : > { %3900 = vmatmul.mubr.bf16.gmra.mrb[24].mxu0 %v4252_v21 }
 0x162   : > { %3903 = vmatprep.mubr.bf16.mxu0 %v4253_v22 }
 0x169   : > { %3904 = vmatmul.mubr.bf16.gmra.mrb[28].mxu0 %v4254_v23 }
 0x204   : > { %v3877_v25 = vpop.f32.mrb[0].mxu0 }
 0x205   : > { %v939_v26 = vpop.f32.mrb[1].mxu0  ;;  %v5244_v57 = vadd.f32 %v3877_v25, %v5216_v41 }
 0x206   : > { %v3878_v27 = vpop.f32.mrb[2].mxu0  ;;  %v5225_v47 = vadd.f32 %v5216_v41, %v939_v26 }
 0x207   : > { %v942_v28 = vpop.f32.mrb[3].mxu0  ;;  %v5237_v52 = vadd.f32 %v3878_v27, %v5216_v41  ;;  %v1068_v8 = vmax.f32 %v5244_v57, 0.0 }
 0x208   : > { %v5219_v43 = vadd.f32 %v5216_v41, %v942_v28  ;;  %v1066_v58 = vmax.f32 %v5225_v47, 0.0 }
 0x209   : > { %v1069_v1 = vmax.f32 %v5237_v52, 0.0 }
 0x20a   : > { %v1067_v53 = vmax.f32 %v5219_v43, 0.0 }
 0x20b   : > { %v1099_v12 = vpack.c.bf16 %v1069_v1, %v1068_v8 }
 0x20c   : > { %v3881_v29 = vpop.f32.mrb[4].mxu0  ;;  %v1098_v0 = vpack.c.bf16 %v1067_v53, %v1066_v58 }
 0x20d   : > { %v955_v30 = vpop.f32.mrb[5].mxu0  ;;  %v5276_v17 = vadd.f32 %v3881_v29, %v5216_v41 }
 0x20e   : > { %v3882_v31 = vpop.f32.mrb[6].mxu0  ;;  %v5256_v5 = vadd.f32 %v5216_v41, %v955_v30 }
 0x20f   : > { %v958_v32 = vpop.f32.mrb[7].mxu0  ;;  %v5269_v11 = vadd.f32 %v3882_v31, %v5216_v41 }
 0x210   : > { %v5249_v62 = vadd.f32 %v5216_v41, %v958_v32  ;;  %v1070_v18 = vmax.f32 %v5256_v5, 0.0 }
 0x211   : > { %v1073_v26 = vmax.f32 %v5269_v11, 0.0 }
 0x212   : > { %v1071_v13 = vmax.f32 %v5249_v62, 0.0 }
 0x214   : > { %v5199_v33 = vpop.f32.mrb[8].mxu0  ;;  %v1100_v25 = vpack.c.bf16 %v1071_v13, %v1070_v18 }
 0x215   : > { %v5201_v34 = vpop.f32.mrb[9].mxu0 }
 0x216   : > { %v5203_v35 = vpop.f32.mrb[10].mxu0  ;;  %v5289_v30 = vadd.f32 %v5216_v41, %v5201_v34 }
 0x217   : > { %v974_v36 = vpop.f32.mrb[11].mxu0 }
 0x218   : > { %v5281_v22 = vadd.f32 %v5216_v41, %v974_v36  ;;  %6150 = vst [vmem:[#allocation32_spill] sm:$0xff] %v5289_v30  ;;  %v1072_v36 = vmax.f32 %v5276_v17, 0.0  ;;  %v1074_v58 = vmax.f32 %v5289_v30, 0.0 }
 0x21a   : > { %v1101_v34 = vpack.c.bf16 %v1073_v26, %v1072_v36  ;;  %v5354_v36 = vld [vmem:[#allocation10 + $0x8] sm:$0xff]  }
 0x21c   : > { %v5205_v37 = vpop.f32.mrb[12].mxu0 }
 0x21d   : > { %v5207_v38 = vpop.f32.mrb[13].mxu0 }
 0x21e   : > { %v5209_v39 = vpop.f32.mrb[14].mxu0 }
 0x21f   : > { %v5211_v40 = vpop.f32.mrb[15].mxu0 }
 0x224   : > { %v3893_v42 = vpop.f32.mrb[16].mxu0 }
 0x225   : > { %v1003_v44 = vpop.f32.mrb[17].mxu0  ;;  %v5231_v50 = vadd.f32 %v3893_v42, %v5216_v41 }
 0x226   : > { %v5222_v45 = vadd.f32 %v5216_v41, %v1003_v44  ;;  %v3894_v46 = vpop.f32.mrb[18].mxu0 }
 0x227   : > { %v5228_v48 = vadd.f32 %v3894_v46, %v5216_v41  ;;  %v1006_v49 = vpop.f32.mrb[19].mxu0  ;;  %v1084_v61 = vmax.f32 %v5231_v50, 0.0  ;;  %v5303_v46 = vadd.f32 %v5203_v35, %v5216_v41 }
 0x228   : > { %v5234_v51 = vadd.f32 %v5216_v41, %v1006_v49  ;;  %v1082_v54 = vmax.f32 %v5222_v45, 0.0  ;;  %v1075_v49 = vmax.f32 %v5281_v22, 0.0 }
 0x229   : > { %v1085_v56 = vmax.f32 %v5228_v48, 0.0  ;;  %v1077_v1 = vmax.f32 %v5303_v46, 0.0 }
 0x22a   : > { %v1083_v55 = vmax.f32 %v5234_v51, 0.0 }
 0x22b   : > { %v1107_v4 = vpack.c.bf16 %v1085_v56, %v1084_v61  ;;  %v5311_v56 = vadd.f32 %v5199_v33, %v5216_v41  ;;  %v5317_v61 = vadd.f32 %v5216_v41, %v5211_v40 }
 0x22c   : > { %v3897_v59 = vpop.f32.mrb[20].mxu0  ;;  %v1106_v60 = vpack.c.bf16 %v1083_v55, %v1082_v54 }
 0x22d   : > { %v1019_v63 = vpop.f32.mrb[21].mxu0  ;;  %v5263_v9 = vadd.f32 %v3897_v59, %v5216_v41  ;;  %6151 = vst [vmem:[#allocation33_spill] sm:$0xff] %v5311_v56  ;;  %v1076_v40 = vmax.f32 %v5311_v56, 0.0 }
 0x22e   : > { %v5253_v2 = vadd.f32 %v5216_v41, %v1019_v63  ;;  %v3898_v3 = vpop.f32.mrb[22].mxu0  ;;  %3402 = vmatprep.subr.bf16.mxu1 %v1106_v60 }
 0x22f   : > { %v5259_v6 = vadd.f32 %v3898_v3, %v5216_v41  ;;  %v1022_v7 = vpop.f32.mrb[23].mxu0  ;;  %3403 = vmatpush3.bf16.msra.mxu1 %v1098_v0  ;;  %v1088_v21 = vmax.f32 %v5263_v9, 0.0  ;;  %v1102_v0 = vpack.c.bf16 %v1075_v49, %v1074_v58  ;;  %v5363_v49 = vld [vmem:[#allocation10 + $0x10] sm:$0xff]   ;;  %v5383_v58 = vld [vmem:[%s5157_s7 + $0x24] ss:$8 sps:$4 sm:$0xff]  }
 0x230   : > { %v5266_v10 = vadd.f32 %v5216_v41, %v1022_v7  ;;  %3404 = vmatprep.subr.bf16.mxu1 %v1107_v4  ;;  %v1086_v14 = vmax.f32 %v5253_v2, 0.0  ;;  %v5325_v7 = vadd.f32 %v5216_v41, %v5207_v38  ;;  %v1103_v38 = vpack.c.bf16 %v1077_v1, %v1076_v40  ;;  %v5413_v1 = vld [vmem:[%s5157_s7 + $0x54] ss:$8 sps:$4 sm:$0xff]  }
 0x231   : > { %v1089_v16 = vmax.f32 %v5259_v6, 0.0  ;;  %6157 = vst [vmem:[#allocation39_spill] sm:$0xff] %v5413_v1  ;;  %v5429_v40 = vld [vmem:[%s5157_s7 + $0x74] ss:$8 sps:$4 sm:$0xff]  }
 0x232   : > { %v1087_v15 = vmax.f32 %v5266_v10, 0.0  ;;  %6152 = vst [vmem:[#allocation34_spill] sm:$0xff] %v5325_v7  ;;  %6161 = vst [vmem:[#allocation43_spill] sm:$0xff] %v5429_v40 }
 0x233   : > { %3405 = vmatpush3.bf16.msra.mxu1 %v1099_v12  ;;  %v1109_v29 = vpack.c.bf16 %v1089_v16, %v1088_v21  ;;  %v1079_v16 = vmax.f32 %v5317_v61, 0.0  ;;  %v5347_v21 = vadd.f32 %v5205_v37, %v5216_v41 }
 0x234   : > { %v3901_v19 = vpop.f32.mrb[24].mxu0  ;;  %v1108_v20 = vpack.c.bf16 %v1087_v15, %v1086_v14  ;;  %v5339_v15 = vadd.f32 %v5209_v39, %v5216_v41 }
 0x235   : > { %v1035_v23 = vpop.f32.mrb[25].mxu0  ;;  %v5296_v42 = vadd.f32 %v3901_v19, %v5216_v41  ;;  %6153 = vst [vmem:[#allocation35_spill] sm:$0xff] %v5347_v21  ;;  %v1080_v37 = vmax.f32 %v5347_v21, 0.0 }
 0x236   : > { %v5285_v27 = vadd.f32 %v5216_v41, %v1035_v23  ;;  %v3902_v28 = vpop.f32.mrb[26].mxu0  ;;  %3406 = vmatprep.subr.bf16.mxu1 %v1108_v20  ;;  %v1078_v23 = vmax.f32 %v5325_v7, 0.0 }
 0x237   : > { %v5292_v31 = vadd.f32 %v3902_v28, %v5216_v41  ;;  %v1038_v32 = vpop.f32.mrb[27].mxu0  ;;  %3407 = vmatpush3.bf16.msra.mxu1 %v1100_v25  ;;  %v1092_v35 = vmax.f32 %v5296_v42, 0.0  ;;  %v1081_v28 = vmax.f32 %v5339_v15, 0.0 }
 0x238   : > { %v5299_v44 = vadd.f32 %v5216_v41, %v1038_v32  ;;  %3408 = vmatprep.subr.bf16.mxu1 %v1109_v29  ;;  %v1090_v53 = vmax.f32 %v5285_v27, 0.0  ;;  %v1104_v26 = vpack.c.bf16 %v1079_v16, %v1078_v23  ;;  %v5352_v32 = vld [vmem:[#allocation10] sm:$0xff]  }
 0x239   : > { %v1093_v55 = vmax.f32 %v5292_v31, 0.0  ;;  %3907 = vmatprep.subr.bf16.mxu0 %v5352_v32  ;;  %v5437_v16 = vld [vmem:[%s5157_s7 + $0x84] ss:$8 sps:$4 sm:$0xff]  }
 0x23a   : > { %v1091_v54 = vmax.f32 %v5299_v44, 0.0  ;;  %3908 = vmatpush3.bf16.msra.mxu0 %v5352_v32  ;;  %6163 = vst [vmem:[#allocation45_spill] sm:$0xff] %v5437_v16  ;;  %v5453_v23 = vld [vmem:[%s5157_s7 + $0xa4] ss:$8 sps:$4 sm:$0xff]  }
 0x23b   : > { %3409 = vmatpush3.bf16.msra.mxu1 %v1101_v34  ;;  %v1111_v4 = vpack.c.bf16 %v1093_v55, %v1092_v35  ;;  %v5360_v34 = vld [vmem:[%s5157_s7] ss:$8 sps:$4 sm:$0xff]   ;;  %3909 = vmatprep.subr.bf16.mxu0 %v5354_v36  ;;  %v5379_v55 = vld [vmem:[%s5157_s7 + $0x10] ss:$8 sps:$4 sm:$0xff]   ;;  %6167 = vst [vmem:[#allocation49_spill] sm:$0xff] %v5453_v23 }
 0x23c   : > { %v3905_v59 = vpop.f32.mrb[28].mxu0  ;;  %v1110_v60 = vpack.c.bf16 %v1091_v54, %v1090_v53  ;;  %v5366_v53 = vld [vmem:[%s5157_s7 + $0x14] ss:$8 sps:$4 sm:$0xff]   ;;  %v5402_v35 = vld [vmem:[%s5157_s7 + $0x30] ss:$8 sps:$4 sm:$0xff]  }
 0x23d   : > { %v1051_v63 = vpop.f32.mrb[29].mxu0  ;;  %v5332_v13 = vadd.f32 %v3905_v59, %v5216_v41  ;;  %v5372_v54 = vld [vmem:[#allocation10 + $0x18] sm:$0xff]   ;;  %v5393_v59 = vld [vmem:[%s5157_s7 + $0x20] ss:$8 sps:$4 sm:$0xff]   ;;  %6154 = vst [vmem:[#allocation36_spill] sm:$0xff] %v5402_v35 }
 0x23e   : > { %v5321_v3 = vadd.f32 %v5216_v41, %v1051_v63  ;;  %v3906_v33 = vpop.f32.mrb[30].mxu0  ;;  %3410 = vmatprep.subr.bf16.mxu1 %v1110_v60  ;;  %3910 = vmatpush3.bf16.msra.mxu0 %v5354_v36  ;;  %v5396_v60 = vld [vmem:[%s5157_s7 + $0x34] ss:$8 sps:$4 sm:$0xff]   ;;  %v5405_v63 = vld [vmem:[%s5157_s7 + $0x44] ss:$8 sps:$4 sm:$0xff]  }
 0x23f   : > { %v5328_v8 = vadd.f32 %v3906_v33, %v5216_v41  ;;  %v1054_v12 = vpop.f32.mrb[31].mxu0  ;;  %3411 = vmatpush3.bf16.msra.mxu1 %v1102_v0  ;;  %v1096_v39 = vmax.f32 %v5332_v13, 0.0  ;;  %3911 = vmatprep.subr.bf16.mxu0 %v5363_v49  ;;  %6155 = vst [vmem:[#allocation37_spill] sm:$0xff] %v5405_v63  ;;  %v5410_v0 = vld [vmem:[%s5157_s7 + $0x40] ss:$8 sps:$4 sm:$0xff]  }
 0x240   : > { %v5335_v14 = vadd.f32 %v5216_v41, %v1054_v12  ;;  %3412 = vmatprep.subr.bf16.mxu1 %v1111_v4  ;;  %v1094_v18 = vmax.f32 %v5321_v3, 0.0  ;;  %v1105_v41 = vpack.c.bf16 %v1081_v28, %v1080_v37  ;;  %6156 = vst [vmem:[#allocation38_spill] sm:$0xff] %v5410_v0  ;;  %v5418_v33 = vld [vmem:[%s5157_s7 + $0x50] ss:$8 sps:$4 sm:$0xff]   ;;  %v5421_v4 = vld [vmem:[%s5157_s7 + $0x64] ss:$8 sps:$4 sm:$0xff]  }
 0x241   : > { %v1097_v20 = vmax.f32 %v5328_v8, 0.0  ;;  %6158 = vst [vmem:[#allocation40_spill] sm:$0xff] %v5418_v33  ;;  %6159 = vst [vmem:[#allocation41_spill] sm:$0xff] %v5421_v4  ;;  %v5426_v12 = vld [vmem:[%s5157_s7 + $0x60] ss:$8 sps:$4 sm:$0xff]  }
 0x242   : > { %v1095_v19 = vmax.f32 %v5335_v14, 0.0  ;;  %3912 = vmatpush3.bf16.msra.mxu0 %v5363_v49  ;;  %6160 = vst [vmem:[#allocation42_spill] sm:$0xff] %v5426_v12  ;;  %v5470_v28 = vld [vmem:[%s5157_s7 + $0xb0] ss:$8 sps:$4 sm:$0xff]   ;;  %v5477_v37 = vld [vmem:[#allocation10 + $0x28] sm:$0xff]  }
 0x243   : > { %3413 = vmatpush3.bf16.msra.mxu1 %v1103_v38  ;;  %v1113_v29 = vpack.c.bf16 %v1097_v20, %v1096_v39  ;;  %3913 = vmatprep.subr.bf16.mxu0 %v5372_v54  ;;  %v5434_v38 = vld [vmem:[%s5157_s7 + $0x70] ss:$8 sps:$4 sm:$0xff]   ;;  %v5461_v39 = vld [vmem:[%s5157_s7 + $0xb4] ss:$8 sps:$4 sm:$0xff]   ;;  %6170 = vst [vmem:[#allocation52_spill] sm:$0xff] %v5470_v28  ;;  %6172 = vst [vmem:[#allocation54_spill] sm:$0xff] %v5477_v37 }
 0x244   : > { %v1112_v25 = vpack.c.bf16 %v1095_v19, %v1094_v18  ;;  %6162 = vst [vmem:[#allocation44_spill] sm:$0xff] %v5434_v38  ;;  %v5442_v18 = vld [vmem:[%s5157_s7 + $0x80] ss:$8 sps:$4 sm:$0xff]   ;;  %v5445_v19 = vld [vmem:[%s5157_s7 + $0x94] ss:$8 sps:$4 sm:$0xff]   ;;  %6169 = vst [vmem:[#allocation51_spill] sm:$0xff] %v5461_v39 }
 0x245   : > { %6164 = vst [vmem:[#allocation46_spill] sm:$0xff] %v5442_v18  ;;  %6165 = vst [vmem:[#allocation47_spill] sm:$0xff] %v5445_v19  ;;  %v5450_v20 = vld [vmem:[%s5157_s7 + $0x90] ss:$8 sps:$4 sm:$0xff]  }
 0x246   : > { %3414 = vmatprep.subr.bf16.mxu1 %v1112_v25  ;;  %3914 = vmatpush3.bf16.msra.mxu0 %v5372_v54  ;;  %6166 = vst [vmem:[#allocation48_spill] sm:$0xff] %v5450_v20  ;;  %v5458_v25 = vld [vmem:[%s5157_s7 + $0xa0] ss:$8 sps:$4 sm:$0xff]  }
 0x247   : > { %3415 = vmatpush3.bf16.msra.mxu1 %v1104_v26  ;;  %6168 = vst [vmem:[#allocation50_spill] sm:$0xff] %v5458_v25  ;;  %v5465_v26 = vld [vmem:[#allocation10 + $0x20] sm:$0xff]  }
 0x248   : > { %3416 = vmatprep.subr.bf16.mxu1 %v1113_v29  ;;  %3915 = vmatprep.subr.bf16.mxu0 %v5465_v26  ;;  %v5475_v29 = vld [vmem:[%s5157_s7 + $0xc4] ss:$8 sps:$4 sm:$0xff]  }
 0x249   : > { %6171 = vst [vmem:[#allocation53_spill] sm:$0xff] %v5475_v29 }
 0x24a   : > { %3916 = vmatpush3.bf16.msra.mxu0 %v5465_v26 }
 0x24b   : > { %3417 = vmatpush3.bf16.msra.mxu1 %v1105_v41  ;;  %3917 = vmatprep.subr.bf16.mxu0 %v5477_v37  ;;  %v5484_v41 = vld [vmem:[#allocation10 + $0x30] sm:$0xff]  }
 0x24c   : > { %3955 = vmatprep.subr.bf16.mxu1 %v5352_v32  ;;  %6173 = vst [vmem:[#allocation55_spill] sm:$0xff] %v5484_v41 }
 0x24e   : > { %1307 = vmatmul.mubr.bf16.vlgmr.msra.gmra.mrb[0].mxu1 %v5360_v34  ;;  %3918 = vmatpush3.bf16.msra.mxu0 %v5477_v37 }
 0x24f   : > { %1314 = vmatprep.mubr.bf16.mxu1 %v5366_v53  ;;  %3956 = vmatpush3.bf16.msra.mxu1 %v5352_v32 }
 0x250   : > { %3957 = vmatprep.subr.bf16.mxu1 %v5354_v36  ;;  %3919 = vmatprep.subr.bf16.mxu0 %v5484_v41 }
 0x252   : > { %3920 = vmatpush3.bf16.msra.mxu0 %v5484_v41 }
 0x253   : > { %3958 = vmatpush3.bf16.msra.mxu1 %v5354_v36 }
 0x254   : > { %3959 = vmatprep.subr.bf16.mxu1 %v5363_v49 }
 0x256   : > { %1315 = vmatmul.mubr.bf16.gmra.mrb[4].mxu1 %v5379_v55 }
 0x257   : > { %1322 = vmatprep.mubr.bf16.mxu1 %v5383_v58  ;;  %3960 = vmatpush3.bf16.msra.mxu1 %v5363_v49 }
 0x258   : > { %3961 = vmatprep.subr.bf16.mxu1 %v5372_v54 }
 0x25b   : > { %3962 = vmatpush3.bf16.msra.mxu1 %v5372_v54 }
 0x25c   : > { %3963 = vmatprep.subr.bf16.mxu1 %v5465_v26 }
 0x25e   : > { %1323 = vmatmul.mubr.bf16.gmra.mrb[8].mxu1 %v5393_v59 }
 0x25f   : > { %1330 = vmatprep.mubr.bf16.mxu1 %v5396_v60  ;;  %3964 = vmatpush3.bf16.msra.mxu1 %v5465_v26 }
 0x260   : > { %3965 = vmatprep.subr.bf16.mxu1 %v5477_v37 }
 0x263   : > { %3966 = vmatpush3.bf16.msra.mxu1 %v5477_v37 }
 0x264   : > { %3967 = vmatprep.subr.bf16.mxu1 %v5484_v41 }
 0x266   : > { %1331 = vmatmul.mubr.bf16.gmra.mrb[12].mxu1 %v5402_v35 }
 0x267   : > { %1338 = vmatprep.mubr.bf16.mxu1 %v5405_v63  ;;  %3968 = vmatpush3.bf16.msra.mxu1 %v5484_v41 }
 0x26e   : > { %1339 = vmatmul.mubr.bf16.gmra.mrb[16].mxu1 %v5410_v0 }
 0x26f   : > { %1346 = vmatprep.mubr.bf16.mxu1 %v5413_v1 }
 0x276   : > { %1347 = vmatmul.mubr.bf16.gmra.mrb[20].mxu1 %v5418_v33 }
 0x277   : > { %1354 = vmatprep.mubr.bf16.mxu1 %v5421_v4 }
 0x27e   : > { %1355 = vmatmul.mubr.bf16.gmra.mrb[24].mxu1 %v5426_v12 }
 0x27f   : > { %1362 = vmatprep.mubr.bf16.mxu1 %v5429_v40 }
 0x286   : > { %1363 = vmatmul.mubr.bf16.gmra.mrb[28].mxu1 %v5434_v38 }
 0x287   : > { %1370 = vmatprep.mubr.bf16.mxu1 %v5437_v16 }
 0x28e   : > { %1371 = vmatmul.mubr.bf16.gmra.mrb[32].mxu1 %v5442_v18 }
 0x28f   : > { %1378 = vmatprep.mubr.bf16.mxu1 %v5445_v19  ;;  %v5517_v19 = vld [vmem:[%s5157_s7 + $0xf4] ss:$8 sps:$4 sm:$0xff]  }
 0x290   : > { %6180 = vst [vmem:[#allocation62_spill] sm:$0xff] %v5517_v19 }
 0x296   : > { %1379 = vmatmul.mubr.bf16.gmra.mrb[36].mxu1 %v5450_v20  ;;  %v5514_v20 = vld [vmem:[%s5157_s7 + $0xe0] ss:$8 sps:$4 sm:$0xff]  }
 0x297   : > { %1386 = vmatprep.mubr.bf16.mxu1 %v5453_v23  ;;  %v5509_v23 = vld [vmem:[%s5157_s7 + $0xe4] ss:$8 sps:$4 sm:$0xff]   ;;  %6179 = vst [vmem:[#allocation61_spill] sm:$0xff] %v5514_v20 }
 0x298   : > { %6178 = vst [vmem:[#allocation60_spill] sm:$0xff] %v5509_v23 }
 0x29e   : > { %1387 = vmatmul.mubr.bf16.gmra.mrb[40].mxu1 %v5458_v25  ;;  %v5496_v25 = vld [vmem:[#allocation10 + $0x38] sm:$0xff]  }
 0x29f   : > { %1394 = vmatprep.mubr.bf16.mxu1 %v5461_v39  ;;  %v5490_v39 = vld [vmem:[%s5157_s7 + $0xc0] ss:$8 sps:$4 sm:$0xff]   ;;  %6176 = vst [vmem:[#allocation58_spill] sm:$0xff] %v5496_v25  ;;  %3921 = vmatprep.subr.bf16.mxu0 %v5496_v25 }
 0x2a0   : > { %6174 = vst [vmem:[#allocation56_spill] sm:$0xff] %v5490_v39  ;;  %3969 = vmatprep.subr.bf16.mxu1 %v5496_v25  ;;  %3922 = vmatpush3.bf16.msra.mxu0 %v5496_v25 }
 0x2a1   : > { %3970 = vmatpush3.bf16.msra.mxu1 %v5496_v25 }
 0x2a6   : > { %1395 = vmatmul.mubr.bf16.gmra.mrb[44].mxu1 %v5470_v28  ;;  %v5494_v28 = vld [vmem:[%s5157_s7 + $0xd4] ss:$8 sps:$4 sm:$0xff]  }
 0x2a7   : > { %1402 = vmatprep.mubr.bf16.mxu1 %v5475_v29  ;;  %6175 = vst [vmem:[#allocation57_spill] sm:$0xff] %v5494_v28  ;;  %v5506_v29 = vld [vmem:[%s5157_s7 + $0xd0] ss:$8 sps:$4 sm:$0xff]  }
 0x2a8   : > { %6177 = vst [vmem:[#allocation59_spill] sm:$0xff] %v5506_v29 }
 0x2ae   : > { %1403 = vmatmul.mubr.bf16.gmra.mrb[48].mxu1 %v5490_v39  ;;  %v5522_v39 = vld [vmem:[%s5157_s7 + $0xf0] ss:$8 sps:$4 sm:$0xff]  }
 0x2af   : > { %1410 = vmatprep.mubr.bf16.mxu1 %v5494_v28  ;;  %6181 = vst [vmem:[#allocation63_spill] sm:$0xff] %v5522_v39 }
 0x2b6   : > { %1411 = vmatmul.mubr.bf16.gmra.mrb[52].mxu1 %v5506_v29 }
 0x2b7   : > { %1418 = vmatprep.mubr.bf16.mxu1 %v5509_v23 }
 0x2be   : > { %1419 = vmatmul.mubr.bf16.gmra.mrb[56].mxu1 %v5514_v20 }
 0x2bf   : > { %1426 = vmatprep.mubr.bf16.mxu1 %v5517_v19 }
 0x2c6   : > { %1427 = vmatmul.mubr.bf16.gmra.mrb[60].mxu1 %v5522_v39 }
 0x321   : > { %v3418_v28 = vpop.f32.mrb[0].mxu1 }
 0x322   : > { %v3419_v18 = vpop.f32.mrb[1].mxu1 }
 0x323   : > { %v3420_v16 = vadd.f32 %v3419_v18, %v3418_v28  ;;  %v3421_v38 = vpop.f32.mrb[2].mxu1 }
 0x324   : > { %v3422_v40 = vpop.f32.mrb[3].mxu1 }
 0x325   : > { %v3423_v29 = vadd.f32 %v3422_v40, %v3421_v38 }
 0x327   : > { %v1435_v12 = vpack.c.bf16 %v3423_v29, %v3420_v16 }
 0x329   : > { %v3424_v23 = vpop.f32.mrb[4].mxu1  ;;  %3923 = vmatprep.mubr.bf16.mxu0 %v1435_v12 }
 0x32a   : > { %v3425_v4 = vpop.f32.mrb[5].mxu1 }
 0x32b   : > { %v3426_v33 = vadd.f32 %v3425_v4, %v3424_v23  ;;  %v3427_v1 = vpop.f32.mrb[6].mxu1 }
 0x32c   : > { %v3428_v0 = vpop.f32.mrb[7].mxu1 }
 0x32d   : > { %v3429_v20 = vadd.f32 %v3428_v0, %v3427_v1 }
 0x32f   : > { %v1436_v25 = vpack.c.bf16 %v3429_v20, %v3426_v33 }
 0x331   : > { %v3430_v19 = vpop.f32.mrb[8].mxu1  ;;  %3924 = vmatmul.mubr.bf16.vlgmr.msra.gmra.mrb[32].mxu0 %v1436_v25 }
 0x332   : > { %v3431_v63 = vpop.f32.mrb[9].mxu1 }
 0x333   : > { %v3432_v35 = vadd.f32 %v3431_v63, %v3430_v19  ;;  %v3433_v39 = vpop.f32.mrb[10].mxu1 }
 0x334   : > { %v3434_v41 = vpop.f32.mrb[11].mxu1 }
 0x335   : > { %v3435_v37 = vadd.f32 %v3434_v41, %v3433_v39 }
 0x337   : > { %v1437_v18 = vpack.c.bf16 %v3435_v37, %v3432_v35 }
 0x339   : > { %v3436_v28 = vpop.f32.mrb[12].mxu1  ;;  %3927 = vmatprep.mubr.bf16.mxu0 %v1437_v18 }
 0x33a   : > { %v3437_v40 = vpop.f32.mrb[13].mxu1 }
 0x33b   : > { %v3438_v38 = vadd.f32 %v3437_v40, %v3436_v28  ;;  %v3439_v16 = vpop.f32.mrb[14].mxu1 }
 0x33c   : > { %v3440_v12 = vpop.f32.mrb[15].mxu1 }
 0x33d   : > { %v3441_v29 = vadd.f32 %v3440_v12, %v3439_v16 }
 0x33f   : > { %v1438_v4 = vpack.c.bf16 %v3441_v29, %v3438_v38 }
 0x341   : > { %v3442_v23 = vpop.f32.mrb[16].mxu1  ;;  %3928 = vmatmul.mubr.bf16.gmra.mrb[36].mxu0 %v1438_v4 }
 0x342   : > { %v3443_v0 = vpop.f32.mrb[17].mxu1 }
 0x343   : > { %v3444_v1 = vadd.f32 %v3443_v0, %v3442_v23  ;;  %v3445_v33 = vpop.f32.mrb[18].mxu1 }
 0x344   : > { %v3446_v20 = vpop.f32.mrb[19].mxu1 }
 0x345   : > { %v3447_v25 = vadd.f32 %v3446_v20, %v3445_v33 }
 0x347   : > { %v1439_v63 = vpack.c.bf16 %v3447_v25, %v3444_v1 }
 0x349   : > { %v3448_v19 = vpop.f32.mrb[20].mxu1  ;;  %3931 = vmatprep.mubr.bf16.mxu0 %v1439_v63 }
 0x34a   : > { %v3449_v39 = vpop.f32.mrb[21].mxu1 }
 0x34b   : > { %v3450_v35 = vadd.f32 %v3449_v39, %v3448_v19  ;;  %v3451_v37 = vpop.f32.mrb[22].mxu1 }
 0x34c   : > { %v3452_v41 = vpop.f32.mrb[23].mxu1 }
 0x34d   : > { %v3453_v18 = vadd.f32 %v3452_v41, %v3451_v37 }
 0x34f   : > { %v1440_v28 = vpack.c.bf16 %v3453_v18, %v3450_v35 }
 0x351   : > { %v3454_v40 = vpop.f32.mrb[24].mxu1  ;;  %3932 = vmatmul.mubr.bf16.gmra.mrb[40].mxu0 %v1440_v28 }
 0x352   : > { %v3455_v16 = vpop.f32.mrb[25].mxu1 }
 0x353   : > { %v3456_v38 = vadd.f32 %v3455_v16, %v3454_v40  ;;  %v3457_v12 = vpop.f32.mrb[26].mxu1 }
 0x354   : > { %v3458_v29 = vpop.f32.mrb[27].mxu1 }
 0x355   : > { %v3459_v4 = vadd.f32 %v3458_v29, %v3457_v12 }
 0x357   : > { %v1441_v23 = vpack.c.bf16 %v3459_v4, %v3456_v38 }
 0x359   : > { %v3460_v0 = vpop.f32.mrb[28].mxu1  ;;  %3935 = vmatprep.mubr.bf16.mxu0 %v1441_v23 }
 0x35a   : > { %v3461_v33 = vpop.f32.mrb[29].mxu1 }
 0x35b   : > { %v3462_v1 = vadd.f32 %v3461_v33, %v3460_v0  ;;  %v3463_v20 = vpop.f32.mrb[30].mxu1 }
 0x35c   : > { %v3464_v25 = vpop.f32.mrb[31].mxu1 }
 0x35d   : > { %v3465_v63 = vadd.f32 %v3464_v25, %v3463_v20 }
 0x35f   : > { %v1442_v19 = vpack.c.bf16 %v3465_v63, %v3462_v1 }
 0x361   : > { %v3466_v39 = vpop.f32.mrb[32].mxu1  ;;  %3936 = vmatmul.mubr.bf16.gmra.mrb[44].mxu0 %v1442_v19 }
 0x362   : > { %v3467_v37 = vpop.f32.mrb[33].mxu1 }
 0x363   : > { %v3468_v35 = vadd.f32 %v3467_v37, %v3466_v39  ;;  %v3469_v41 = vpop.f32.mrb[34].mxu1 }
 0x364   : > { %v3470_v18 = vpop.f32.mrb[35].mxu1 }
 0x365   : > { %v3471_v28 = vadd.f32 %v3470_v18, %v3469_v41 }
 0x367   : > { %v1443_v40 = vpack.c.bf16 %v3471_v28, %v3468_v35 }
 0x369   : > { %v3472_v16 = vpop.f32.mrb[36].mxu1  ;;  %3939 = vmatprep.mubr.bf16.mxu0 %v1443_v40 }
 0x36a   : > { %v3473_v12 = vpop.f32.mrb[37].mxu1 }
 0x36b   : > { %v3474_v38 = vadd.f32 %v3473_v12, %v3472_v16  ;;  %v3475_v29 = vpop.f32.mrb[38].mxu1 }
 0x36c   : > { %v3476_v4 = vpop.f32.mrb[39].mxu1 }
 0x36d   : > { %v3477_v23 = vadd.f32 %v3476_v4, %v3475_v29 }
 0x36f   : > { %v1444_v0 = vpack.c.bf16 %v3477_v23, %v3474_v38 }
 0x371   : > { %v3478_v33 = vpop.f32.mrb[40].mxu1  ;;  %3940 = vmatmul.mubr.bf16.gmra.mrb[48].mxu0 %v1444_v0 }
 0x372   : > { %v3479_v20 = vpop.f32.mrb[41].mxu1 }
 0x373   : > { %v3480_v1 = vadd.f32 %v3479_v20, %v3478_v33  ;;  %v3481_v25 = vpop.f32.mrb[42].mxu1 }
 0x374   : > { %v3482_v63 = vpop.f32.mrb[43].mxu1 }
 0x375   : > { %v3483_v19 = vadd.f32 %v3482_v63, %v3481_v25 }
 0x377   : > { %v1445_v39 = vpack.c.bf16 %v3483_v19, %v3480_v1 }
 0x379   : > { %v3484_v37 = vpop.f32.mrb[44].mxu1  ;;  %3943 = vmatprep.mubr.bf16.mxu0 %v1445_v39 }
 0x37a   : > { %v3485_v41 = vpop.f32.mrb[45].mxu1 }
 0x37b   : > { %v3486_v35 = vadd.f32 %v3485_v41, %v3484_v37  ;;  %v3487_v18 = vpop.f32.mrb[46].mxu1 }
 0x37c   : > { %v3488_v28 = vpop.f32.mrb[47].mxu1 }
 0x37d   : > { %v3489_v40 = vadd.f32 %v3488_v28, %v3487_v18 }
 0x37f   : > { %v1446_v16 = vpack.c.bf16 %v3489_v40, %v3486_v35 }
 0x381   : > { %v3490_v12 = vpop.f32.mrb[48].mxu1  ;;  %3944 = vmatmul.mubr.bf16.gmra.mrb[52].mxu0 %v1446_v16 }
 0x382   : > { %v3491_v29 = vpop.f32.mrb[49].mxu1 }
 0x383   : > { %v3492_v38 = vadd.f32 %v3491_v29, %v3490_v12  ;;  %v3493_v4 = vpop.f32.mrb[50].mxu1 }
 0x384   : > { %v3494_v23 = vpop.f32.mrb[51].mxu1 }
 0x385   : > { %v3495_v0 = vadd.f32 %v3494_v23, %v3493_v4 }
 0x387   : > { %v1447_v33 = vpack.c.bf16 %v3495_v0, %v3492_v38 }
 0x389   : > { %v3496_v20 = vpop.f32.mrb[52].mxu1  ;;  %3947 = vmatprep.mubr.bf16.mxu0 %v1447_v33 }
 0x38a   : > { %v3497_v25 = vpop.f32.mrb[53].mxu1 }
 0x38b   : > { %v3498_v1 = vadd.f32 %v3497_v25, %v3496_v20  ;;  %v3499_v63 = vpop.f32.mrb[54].mxu1  ;;  %v5529_v25 = vld [vmem:[%s6182_s26] ss:$0 sm:$0xff] }
 0x38c   : > { %v3500_v19 = vpop.f32.mrb[55].mxu1 }
 0x38d   : > { %v3501_v39 = vadd.f32 %v3500_v19, %v3499_v63 }
 0x38f   : > { %v1448_v37 = vpack.c.bf16 %v3501_v39, %v3498_v1 }
 0x391   : > { %v3502_v41 = vpop.f32.mrb[56].mxu1  ;;  %3948 = vmatmul.mubr.bf16.gmra.mrb[56].mxu0 %v1448_v37 }
 0x392   : > { %v3503_v18 = vpop.f32.mrb[57].mxu1 }
 0x393   : > { %v3504_v35 = vadd.f32 %v3503_v18, %v3502_v41  ;;  %v3505_v28 = vpop.f32.mrb[58].mxu1 }
 0x394   : > { %v3506_v40 = vpop.f32.mrb[59].mxu1 }
 0x395   : > { %v3507_v16 = vadd.f32 %v3506_v40, %v3505_v28 }
 0x397   : > { %v1449_v12 = vpack.c.bf16 %v3507_v16, %v3504_v35 }
 0x399   : > { %v3508_v29 = vpop.f32.mrb[60].mxu1  ;;  %3951 = vmatprep.mubr.bf16.mxu0 %v1449_v12 }
 0x39a   : > { %v3509_v4 = vpop.f32.mrb[61].mxu1 }
 0x39b   : > { %v3510_v38 = vadd.f32 %v3509_v4, %v3508_v29  ;;  %v3511_v23 = vpop.f32.mrb[62].mxu1 }
 0x39c   : > { %v3512_v0 = vpop.f32.mrb[63].mxu1 }
 0x39d   : > { %v3513_v33 = vadd.f32 %v3512_v0, %v3511_v23 }
 0x39f   : > { %v1450_v20 = vpack.c.bf16 %v3513_v33, %v3510_v38 }
 0x3a1   : > { %3952 = vmatmul.mubr.bf16.gmra.mrb[60].mxu0 %v1450_v20 }
 0x3a2   : > { %1778 = vmatprep.mubr.bf16.mxu0 %v5196_v24 }
 0x404   : > { %v3925_v1 = vpop.f32.mrb[32].mxu0 }
 0x405   : > { %v1548_v63 = vadd.f32 %v3925_v1, %v5529_v25  ;;  %v1539_v19 = vpop.f32.mrb[33].mxu0 }
 0x406   : > { %v1540_v39 = vadd.f32 %v5529_v25, %v1539_v19  ;;  %v3926_v37 = vpop.f32.mrb[34].mxu0 }
 0x407   : > { %v1668_v41 = vadd.f32 %v1548_v63, %v5244_v57  ;;  %v1551_v18 = vadd.f32 %v3926_v37, %v5529_v25  ;;  %v1542_v35 = vpop.f32.mrb[35].mxu0 }
 0x408   : > { %v1666_v28 = vadd.f32 %v1540_v39, %v5225_v47  ;;  %v1543_v24 = vadd.f32 %v5529_v25, %v1542_v35 }
 0x409   : > { %v1669_v40 = vadd.f32 %v1551_v18, %v5237_v52  ;;  %v1700_v12 = vmax.f32 %v1668_v41, 0.0 }
 0x40a   : > { %v1667_v16 = vadd.f32 %v1543_v24, %v5219_v43  ;;  %v1698_v4 = vmax.f32 %v1666_v28, 0.0 }
 0x40b   : > { %v1701_v29 = vmax.f32 %v1669_v40, 0.0 }
 0x40c   : > { %v1699_v38 = vmax.f32 %v1667_v16, 0.0 }
 0x40d   : > { %v5539_v23 = vpack.c.bf16 %v1701_v29, %v1700_v12 }
 0x40e   : > { %v5541_v0 = vpack.c.bf16 %v1699_v38, %v1698_v4 }
 0x414   : > { %v3929_v33 = vpop.f32.mrb[36].mxu0 }
 0x415   : > { %v1564_v20 = vadd.f32 %v3929_v33, %v5529_v25  ;;  %v1555_v1 = vpop.f32.mrb[37].mxu0 }
 0x416   : > { %v1556_v63 = vadd.f32 %v5529_v25, %v1555_v1  ;;  %v3930_v19 = vpop.f32.mrb[38].mxu0 }
 0x417   : > { %v1672_v39 = vadd.f32 %v1564_v20, %v5276_v17  ;;  %v1567_v37 = vadd.f32 %v3930_v19, %v5529_v25  ;;  %v1558_v18 = vpop.f32.mrb[39].mxu0 }
 0x418   : > { %v1670_v41 = vadd.f32 %v1556_v63, %v5256_v5  ;;  %v1559_v35 = vadd.f32 %v5529_v25, %v1558_v18 }
 0x419   : > { %v1673_v28 = vadd.f32 %v1567_v37, %v5269_v11  ;;  %v1704_v40 = vmax.f32 %v1672_v39, 0.0 }
 0x41a   : > { %v1671_v24 = vadd.f32 %v1559_v35, %v5249_v62  ;;  %v1702_v12 = vmax.f32 %v1670_v41, 0.0 }
 0x41b   : > { %v1705_v16 = vmax.f32 %v1673_v28, 0.0 }
 0x41c   : > { %v1703_v29 = vmax.f32 %v1671_v24, 0.0 }
 0x41d   : > { %v5551_v4 = vpack.c.bf16 %v1705_v16, %v1704_v40 }
 0x41e   : > { %v5553_v38 = vpack.c.bf16 %v1703_v29, %v1702_v12 }
 0x424   : > { %v3933_v33 = vpop.f32.mrb[40].mxu0 }
 0x425   : > { %v1580_v20 = vadd.f32 %v3933_v33, %v5529_v25  ;;  %v1571_v1 = vpop.f32.mrb[41].mxu0 }
 0x426   : > { %v1572_v63 = vadd.f32 %v5529_v25, %v1571_v1  ;;  %v3934_v19 = vpop.f32.mrb[42].mxu0 }
 0x427   : > { %v1676_v18 = vadd.f32 %v1580_v20, %v5311_v56  ;;  %v1583_v37 = vadd.f32 %v3934_v19, %v5529_v25  ;;  %v1574_v35 = vpop.f32.mrb[43].mxu0 }
 0x428   : > { %v1674_v39 = vadd.f32 %v1572_v63, %v5289_v30  ;;  %v1575_v41 = vadd.f32 %v5529_v25, %v1574_v35 }
 0x429   : > { %v1677_v28 = vadd.f32 %v1583_v37, %v5303_v46  ;;  %v1708_v40 = vmax.f32 %v1676_v18, 0.0 }
 0x42a   : > { %v1675_v24 = vadd.f32 %v1575_v41, %v5281_v22  ;;  %v1706_v12 = vmax.f32 %v1674_v39, 0.0 }
 0x42b   : > { %v1709_v16 = vmax.f32 %v1677_v28, 0.0 }
 0x42c   : > { %v1707_v29 = vmax.f32 %v1675_v24, 0.0 }
 0x42d   : > { %v5563_v33 = vpack.c.bf16 %v1709_v16, %v1708_v40 }
 0x42e   : > { %v5565_v1 = vpack.c.bf16 %v1707_v29, %v1706_v12 }
 0x434   : > { %v3937_v20 = vpop.f32.mrb[44].mxu0 }
 0x435   : > { %v1596_v19 = vadd.f32 %v3937_v20, %v5529_v25  ;;  %v1587_v56 = vpop.f32.mrb[45].mxu0 }
 0x436   : > { %v1588_v63 = vadd.f32 %v5529_v25, %v1587_v56  ;;  %v3938_v30 = vpop.f32.mrb[46].mxu0 }
 0x437   : > { %v1680_v35 = vadd.f32 %v1596_v19, %v5347_v21  ;;  %v1599_v37 = vadd.f32 %v3938_v30, %v5529_v25  ;;  %v1590_v41 = vpop.f32.mrb[47].mxu0 }
 0x438   : > { %v1678_v18 = vadd.f32 %v1588_v63, %v5325_v7  ;;  %v1591_v39 = vadd.f32 %v5529_v25, %v1590_v41 }
 0x439   : > { %v1681_v28 = vadd.f32 %v1599_v37, %v5339_v15  ;;  %v1712_v40 = vmax.f32 %v1680_v35, 0.0 }
 0x43a   : > { %v1679_v24 = vadd.f32 %v1591_v39, %v5317_v61  ;;  %v1710_v12 = vmax.f32 %v1678_v18, 0.0 }
 0x43b   : > { %v1713_v16 = vmax.f32 %v1681_v28, 0.0 }
 0x43c   : > { %v1711_v29 = vmax.f32 %v1679_v24, 0.0 }
 0x43d   : > { %v5575_v20 = vpack.c.bf16 %v1713_v16, %v1712_v40 }
 0x43e   : > { %v5577_v56 = vpack.c.bf16 %v1711_v29, %v1710_v12 }
 0x444   : > { %v3941_v19 = vpop.f32.mrb[48].mxu0 }
 0x445   : > { %v1612_v30 = vadd.f32 %v3941_v19, %v5529_v25  ;;  %v1603_v21 = vpop.f32.mrb[49].mxu0 }
 0x446   : > { %v1604_v63 = vadd.f32 %v5529_v25, %v1603_v21  ;;  %v3942_v7 = vpop.f32.mrb[50].mxu0 }
 0x447   : > { %v1684_v41 = vadd.f32 %v1612_v30, %v5231_v50  ;;  %v1615_v37 = vadd.f32 %v3942_v7, %v5529_v25  ;;  %v1606_v39 = vpop.f32.mrb[51].mxu0 }
 0x448   : > { %v1682_v35 = vadd.f32 %v1604_v63, %v5222_v45  ;;  %v1607_v18 = vadd.f32 %v5529_v25, %v1606_v39 }
 0x449   : > { %v1685_v28 = vadd.f32 %v1615_v37, %v5228_v48  ;;  %v1716_v40 = vmax.f32 %v1684_v41, 0.0 }
 0x44a   : > { %v1683_v24 = vadd.f32 %v1607_v18, %v5234_v51  ;;  %v1714_v12 = vmax.f32 %v1682_v35, 0.0 }
 0x44b   : > { %v1717_v16 = vmax.f32 %v1685_v28, 0.0 }
 0x44c   : > { %v1715_v29 = vmax.f32 %v1683_v24, 0.0 }
 0x44d   : > { %v1739_v19 = vpack.c.bf16 %v1717_v16, %v1716_v40 }
 0x44e   : > { %v1738_v21 = vpack.c.bf16 %v1715_v29, %v1714_v12 }
 0x450   : > { %3538 = vmatprep.subr.bf16.mxu0 %v1738_v21 }
 0x451   : > { %3539 = vmatpush3.bf16.msra.mxu0 %v5541_v0 }
 0x452   : > { %3540 = vmatprep.subr.bf16.mxu0 %v1739_v19 }
 0x454   : > { %v3945_v7 = vpop.f32.mrb[52].mxu0 }
 0x455   : > { %v1628_v30 = vadd.f32 %v3945_v7, %v5529_v25  ;;  %v1619_v63 = vpop.f32.mrb[53].mxu0  ;;  %3541 = vmatpush3.bf16.msra.mxu0 %v5539_v23 }
 0x456   : > { %v1620_v37 = vadd.f32 %v5529_v25, %v1619_v63  ;;  %v3946_v39 = vpop.f32.mrb[54].mxu0 }
 0x457   : > { %v1688_v41 = vadd.f32 %v1628_v30, %v5263_v9  ;;  %v1631_v35 = vadd.f32 %v3946_v39, %v5529_v25  ;;  %v1622_v18 = vpop.f32.mrb[55].mxu0 }
 0x458   : > { %v1686_v28 = vadd.f32 %v1620_v37, %v5253_v2  ;;  %v1623_v24 = vadd.f32 %v5529_v25, %v1622_v18 }
 0x459   : > { %v1689_v0 = vadd.f32 %v1631_v35, %v5259_v6  ;;  %v1720_v16 = vmax.f32 %v1688_v41, 0.0 }
 0x45a   : > { %v1687_v40 = vadd.f32 %v1623_v24, %v5266_v10  ;;  %v1718_v29 = vmax.f32 %v1686_v28, 0.0 }
 0x45b   : > { %v1721_v12 = vmax.f32 %v1689_v0, 0.0 }
 0x45c   : > { %v1719_v23 = vmax.f32 %v1687_v40, 0.0 }
 0x45d   : > { %v1741_v19 = vpack.c.bf16 %v1721_v12, %v1720_v16 }
 0x45e   : > { %v1740_v21 = vpack.c.bf16 %v1719_v23, %v1718_v29 }
 0x460   : > { %3542 = vmatprep.subr.bf16.mxu0 %v1740_v21 }
 0x461   : > { %3543 = vmatpush3.bf16.msra.mxu0 %v5553_v38 }
 0x462   : > { %3544 = vmatprep.subr.bf16.mxu0 %v1741_v19 }
 0x464   : > { %v3949_v7 = vpop.f32.mrb[56].mxu0 }
 0x465   : > { %v1644_v30 = vadd.f32 %v3949_v7, %v5529_v25  ;;  %v1635_v63 = vpop.f32.mrb[57].mxu0  ;;  %3545 = vmatpush3.bf16.msra.mxu0 %v5551_v4 }
 0x466   : > { %v1636_v37 = vadd.f32 %v5529_v25, %v1635_v63  ;;  %v3950_v39 = vpop.f32.mrb[58].mxu0 }
 0x467   : > { %v1692_v41 = vadd.f32 %v1644_v30, %v5296_v42  ;;  %v1647_v35 = vadd.f32 %v3950_v39, %v5529_v25  ;;  %v1638_v18 = vpop.f32.mrb[59].mxu0 }
 0x468   : > { %v1690_v28 = vadd.f32 %v1636_v37, %v5285_v27  ;;  %v1639_v24 = vadd.f32 %v5529_v25, %v1638_v18 }
 0x469   : > { %v1693_v38 = vadd.f32 %v1647_v35, %v5292_v31  ;;  %v1724_v40 = vmax.f32 %v1692_v41, 0.0 }
 0x46a   : > { %v1691_v0 = vadd.f32 %v1639_v24, %v5299_v44  ;;  %v1722_v12 = vmax.f32 %v1690_v28, 0.0 }
 0x46b   : > { %v1725_v16 = vmax.f32 %v1693_v38, 0.0 }
 0x46c   : > { %v1723_v4 = vmax.f32 %v1691_v0, 0.0 }
 0x46d   : > { %v1743_v29 = vpack.c.bf16 %v1725_v16, %v1724_v40 }
 0x46e   : > { %v1742_v23 = vpack.c.bf16 %v1723_v4, %v1722_v12  ;;  %v6196_v12 = vld [vmem:[#allocation46_spill] sm:$0xff]  ;;  %v6197_v4 = vld [vmem:[#allocation47_spill] sm:$0xff] }
 0x470   : > { %3546 = vmatprep.subr.bf16.mxu0 %v1742_v23  ;;  %v6199_v23 = vld [vmem:[#allocation49_spill] sm:$0xff] }
 0x471   : > { %3547 = vmatpush3.bf16.msra.mxu0 %v5565_v1 }
 0x472   : > { %3548 = vmatprep.subr.bf16.mxu0 %v1743_v29  ;;  %v6198_v29 = vld [vmem:[#allocation48_spill] sm:$0xff] }
 0x474   : > { %v3953_v19 = vpop.f32.mrb[60].mxu0 }
 0x475   : > { %v1660_v21 = vadd.f32 %v3953_v19, %v5529_v25  ;;  %v1651_v7 = vpop.f32.mrb[61].mxu0  ;;  %3549 = vmatpush3.bf16.msra.mxu0 %v5563_v33  ;;  %v6200_v19 = vld [vmem:[#allocation50_spill] sm:$0xff] }
 0x476   : > { %v1652_v30 = vadd.f32 %v5529_v25, %v1651_v7  ;;  %v3954_v63 = vpop.f32.mrb[62].mxu0  ;;  %v6202_v7 = vld [vmem:[#allocation52_spill] sm:$0xff] }
 0x477   : > { %v1696_v37 = vadd.f32 %v1660_v21, %v5332_v13  ;;  %v1663_v39 = vadd.f32 %v3954_v63, %v5529_v25  ;;  %v1654_v41 = vpop.f32.mrb[63].mxu0  ;;  %v6201_v21 = vld [vmem:[#allocation51_spill] sm:$0xff]  ;;  %v6204_v63 = vld [vmem:[#allocation56_spill] sm:$0xff] }
 0x478   : > { %v1694_v35 = vadd.f32 %v1652_v30, %v5321_v3  ;;  %v1655_v18 = vadd.f32 %v5529_v25, %v1654_v41  ;;  %v6203_v30 = vld [vmem:[#allocation53_spill] sm:$0xff]  ;;  %v6207_v41 = vld [vmem:[#allocation60_spill] sm:$0xff] }
 0x479   : > { %v1697_v1 = vadd.f32 %v1663_v39, %v5328_v8  ;;  %v1728_v24 = vmax.f32 %v1696_v37, 0.0  ;;  %v6205_v37 = vld [vmem:[#allocation57_spill] sm:$0xff]  ;;  %v6206_v39 = vld [vmem:[#allocation59_spill] sm:$0xff] }
 0x47a   : > { %v1695_v28 = vadd.f32 %v1655_v18, %v5335_v14  ;;  %v1726_v0 = vmax.f32 %v1694_v35, 0.0  ;;  %v6208_v35 = vld [vmem:[#allocation61_spill] sm:$0xff]  ;;  %v6209_v18 = vld [vmem:[#allocation62_spill] sm:$0xff] }
 0x47b   : > { %v1729_v38 = vmax.f32 %v1697_v1, 0.0  ;;  %v6210_v1 = vld [vmem:[#allocation63_spill] sm:$0xff] }
 0x47c   : > { %v1727_v33 = vmax.f32 %v1695_v28, 0.0 }
 0x47d   : > { %v1745_v40 = vpack.c.bf16 %v1729_v38, %v1728_v24 }
 0x47e   : > { %v1744_v16 = vpack.c.bf16 %v1727_v33, %v1726_v0 }
 0x480   : > { %3550 = vmatprep.subr.bf16.mxu0 %v1744_v16 }
 0x481   : > { %3551 = vmatpush3.bf16.msra.mxu0 %v5577_v56  ;;  %v6195_v56 = vld [vmem:[#allocation45_spill] sm:$0xff] }
 0x482   : > { %3552 = vmatprep.subr.bf16.mxu0 %v1745_v40 }
 0x485   : > { %3553 = vmatpush3.bf16.msra.mxu0 %v5575_v20  ;;  %v6194_v20 = vld [vmem:[#allocation44_spill] sm:$0xff] }
 0x486   : > { %4003 = vmatprep.subr.bf16.mxu0 %v5352_v32 }
 0x488   : > { %1779 = vmatmul.mubr.bf16.vlgmr.msra.gmra.mrb[64].mxu0 %v5360_v34  ;;  %v6185_v34 = vld [vmem:[#allocation36_spill] sm:$0xff] }
 0x489   : > { %1786 = vmatprep.mubr.bf16.mxu0 %v5366_v53  ;;  %4004 = vmatpush3.bf16.msra.mxu0 %v5352_v32  ;;  %v6183_v32 = vld [vmem:[#allocation54_spill] sm:$0xff] }
 0x48a   : > { %4005 = vmatprep.subr.bf16.mxu0 %v5354_v36  ;;  %v6187_v53 = vld [vmem:[#allocation58_spill] sm:$0xff] }
 0x48d   : > { %4006 = vmatpush3.bf16.msra.mxu0 %v5354_v36  ;;  %v6184_v36 = vld [vmem:[#allocation55_spill] sm:$0xff] }
 0x48e   : > { %4007 = vmatprep.subr.bf16.mxu0 %v5363_v49 }
 0x490   : > { %1787 = vmatmul.mubr.bf16.gmra.mrb[68].mxu0 %v5379_v55  ;;  %v6189_v55 = vld [vmem:[#allocation39_spill] sm:$0xff] }
 0x491   : > { %1794 = vmatprep.mubr.bf16.mxu0 %v5383_v58  ;;  %4008 = vmatpush3.bf16.msra.mxu0 %v5363_v49  ;;  %v6186_v49 = vld [vmem:[#allocation37_spill] sm:$0xff]  ;;  %v6190_v58 = vld [vmem:[#allocation40_spill] sm:$0xff] }
 0x492   : > { %4009 = vmatprep.subr.bf16.mxu0 %v5372_v54 }
 0x495   : > { %4010 = vmatpush3.bf16.msra.mxu0 %v5372_v54  ;;  %v6188_v54 = vld [vmem:[#allocation38_spill] sm:$0xff] }
 0x496   : > { %4011 = vmatprep.subr.bf16.mxu0 %v5465_v26 }
 0x498   : > { %1795 = vmatmul.mubr.bf16.gmra.mrb[72].mxu0 %v5393_v59  ;;  %v6191_v59 = vld [vmem:[#allocation41_spill] sm:$0xff] }
 0x499   : > { %1802 = vmatprep.mubr.bf16.mxu0 %v5396_v60  ;;  %4012 = vmatpush3.bf16.msra.mxu0 %v5465_v26  ;;  %v6192_v60 = vld [vmem:[#allocation42_spill] sm:$0xff]  ;;  %v6193_v26 = vld [vmem:[#allocation43_spill] sm:$0xff] }
 0x49a   : > { %4013 = vmatprep.subr.bf16.mxu0 %v6183_v32 }
 0x49d   : > { %4014 = vmatpush3.bf16.msra.mxu0 %v6183_v32 }
 0x49e   : > { %4015 = vmatprep.subr.bf16.mxu0 %v6184_v36 }
 0x4a0   : > { %1803 = vmatmul.mubr.bf16.gmra.mrb[76].mxu0 %v6185_v34 }
 0x4a1   : > { %1810 = vmatprep.mubr.bf16.mxu0 %v6186_v49  ;;  %4016 = vmatpush3.bf16.msra.mxu0 %v6184_v36 }
 0x4a2   : > { %4017 = vmatprep.subr.bf16.mxu0 %v6187_v53 }
 0x4a5   : > { %4018 = vmatpush3.bf16.msra.mxu0 %v6187_v53 }
 0x4a8   : > { %1811 = vmatmul.mubr.bf16.gmra.mrb[80].mxu0 %v6188_v54 }
 0x4a9   : > { %1818 = vmatprep.mubr.bf16.mxu0 %v6189_v55 }
 0x4b0   : > { %1819 = vmatmul.mubr.bf16.gmra.mrb[84].mxu0 %v6190_v58 }
 0x4b1   : > { %1826 = vmatprep.mubr.bf16.mxu0 %v6191_v59 }
 0x4b8   : > { %1827 = vmatmul.mubr.bf16.gmra.mrb[88].mxu0 %v6192_v60 }
 0x4b9   : > { %1834 = vmatprep.mubr.bf16.mxu0 %v6193_v26 }
 0x4c0   : > { %1835 = vmatmul.mubr.bf16.gmra.mrb[92].mxu0 %v6194_v20 }
 0x4c1   : > { %1842 = vmatprep.mubr.bf16.mxu0 %v6195_v56 }
 0x4c8   : > { %1843 = vmatmul.mubr.bf16.gmra.mrb[96].mxu0 %v6196_v12 }
 0x4c9   : > { %1850 = vmatprep.mubr.bf16.mxu0 %v6197_v4 }
 0x4d0   : > { %1851 = vmatmul.mubr.bf16.gmra.mrb[100].mxu0 %v6198_v29 }
 0x4d1   : > { %1858 = vmatprep.mubr.bf16.mxu0 %v6199_v23 }
 0x4d8   : > { %1859 = vmatmul.mubr.bf16.gmra.mrb[104].mxu0 %v6200_v19 }
 0x4d9   : > { %1866 = vmatprep.mubr.bf16.mxu0 %v6201_v21 }
 0x4e0   : > { %1867 = vmatmul.mubr.bf16.gmra.mrb[108].mxu0 %v6202_v7 }
 0x4e1   : > { %1874 = vmatprep.mubr.bf16.mxu0 %v6203_v30 }
 0x4e8   : > { %1875 = vmatmul.mubr.bf16.gmra.mrb[112].mxu0 %v6204_v63 }
 0x4e9   : > { %1882 = vmatprep.mubr.bf16.mxu0 %v6205_v37 }
 0x4f0   : > { %1883 = vmatmul.mubr.bf16.gmra.mrb[116].mxu0 %v6206_v39 }
 0x4f1   : > { %1890 = vmatprep.mubr.bf16.mxu0 %v6207_v41 }
 0x4f8   : > { %1891 = vmatmul.mubr.bf16.gmra.mrb[120].mxu0 %v6208_v35 }
 0x4f9   : > { %1898 = vmatprep.mubr.bf16.mxu0 %v6209_v18 }
 0x500   : > { %1899 = vmatmul.mubr.bf16.gmra.mrb[124].mxu0 %v6210_v1 }
 0x55b   : > { %v3554_v28 = vpop.f32.mrb[64].mxu0 }
 0x55c   : > { %v3555_v24 = vpop.f32.mrb[65].mxu0 }
 0x55d   : > { %v3556_v38 = vadd.f32 %v3555_v24, %v3554_v28  ;;  %v3557_v0 = vpop.f32.mrb[66].mxu0 }
 0x55e   : > { %v3558_v33 = vpop.f32.mrb[67].mxu0 }
 0x55f   : > { %v3559_v40 = vadd.f32 %v3558_v33, %v3557_v0 }
 0x561   : > { %v1907_v16 = vpack.c.bf16 %v3559_v40, %v3556_v38 }
 0x563   : > { %v3560_v32 = vpop.f32.mrb[68].mxu0  ;;  %3971 = vmatprep.mubr.bf16.mxu1 %v1907_v16 }
 0x564   : > { %v3561_v36 = vpop.f32.mrb[69].mxu0 }
 0x565   : > { %v3562_v34 = vadd.f32 %v3561_v36, %v3560_v32  ;;  %v3563_v49 = vpop.f32.mrb[70].mxu0 }
 0x566   : > { %v3564_v53 = vpop.f32.mrb[71].mxu0 }
 0x567   : > { %v3565_v54 = vadd.f32 %v3564_v53, %v3563_v49 }
 0x569   : > { %v1908_v55 = vpack.c.bf16 %v3565_v54, %v3562_v34 }
 0x56b   : > { %v3566_v58 = vpop.f32.mrb[72].mxu0  ;;  %3972 = vmatmul.mubr.bf16.vlgmr.msra.gmra.mrb[64].mxu1 %v1908_v55 }
 0x56c   : > { %v3567_v59 = vpop.f32.mrb[73].mxu0 }
 0x56d   : > { %v3568_v60 = vadd.f32 %v3567_v59, %v3566_v58  ;;  %v3569_v26 = vpop.f32.mrb[74].mxu0 }
 0x56e   : > { %v3570_v20 = vpop.f32.mrb[75].mxu0 }
 0x56f   : > { %v3571_v56 = vadd.f32 %v3570_v20, %v3569_v26 }
 0x571   : > { %v1909_v12 = vpack.c.bf16 %v3571_v56, %v3568_v60 }
 0x573   : > { %v3572_v4 = vpop.f32.mrb[76].mxu0  ;;  %3975 = vmatprep.mubr.bf16.mxu1 %v1909_v12 }
 0x574   : > { %v3573_v29 = vpop.f32.mrb[77].mxu0 }
 0x575   : > { %v3574_v23 = vadd.f32 %v3573_v29, %v3572_v4  ;;  %v3575_v19 = vpop.f32.mrb[78].mxu0 }
 0x576   : > { %v3576_v21 = vpop.f32.mrb[79].mxu0 }
 0x577   : > { %v3577_v7 = vadd.f32 %v3576_v21, %v3575_v19 }
 0x579   : > { %v1910_v30 = vpack.c.bf16 %v3577_v7, %v3574_v23 }
 0x57b   : > { %v3578_v63 = vpop.f32.mrb[80].mxu0  ;;  %3976 = vmatmul.mubr.bf16.gmra.mrb[68].mxu1 %v1910_v30 }
 0x57c   : > { %v3579_v37 = vpop.f32.mrb[81].mxu0 }
 0x57d   : > { %v3580_v39 = vadd.f32 %v3579_v37, %v3578_v63  ;;  %v3581_v41 = vpop.f32.mrb[82].mxu0 }
 0x57e   : > { %v3582_v35 = vpop.f32.mrb[83].mxu0 }
 0x57f   : > { %v3583_v18 = vadd.f32 %v3582_v35, %v3581_v41 }
 0x581   : > { %v1911_v1 = vpack.c.bf16 %v3583_v18, %v3580_v39 }
 0x583   : > { %v3584_v28 = vpop.f32.mrb[84].mxu0  ;;  %3979 = vmatprep.mubr.bf16.mxu1 %v1911_v1 }
 0x584   : > { %v3585_v24 = vpop.f32.mrb[85].mxu0 }
 0x585   : > { %v3586_v38 = vadd.f32 %v3585_v24, %v3584_v28  ;;  %v3587_v0 = vpop.f32.mrb[86].mxu0 }
 0x586   : > { %v3588_v33 = vpop.f32.mrb[87].mxu0 }
 0x587   : > { %v3589_v40 = vadd.f32 %v3588_v33, %v3587_v0 }
 0x589   : > { %v1912_v16 = vpack.c.bf16 %v3589_v40, %v3586_v38 }
 0x58b   : > { %v3590_v32 = vpop.f32.mrb[88].mxu0  ;;  %3980 = vmatmul.mubr.bf16.gmra.mrb[72].mxu1 %v1912_v16 }
 0x58c   : > { %v3591_v36 = vpop.f32.mrb[89].mxu0 }
 0x58d   : > { %v3592_v34 = vadd.f32 %v3591_v36, %v3590_v32  ;;  %v3593_v49 = vpop.f32.mrb[90].mxu0 }
 0x58e   : > { %v3594_v53 = vpop.f32.mrb[91].mxu0 }
 0x58f   : > { %v3595_v54 = vadd.f32 %v3594_v53, %v3593_v49 }
 0x591   : > { %v1913_v55 = vpack.c.bf16 %v3595_v54, %v3592_v34 }
 0x593   : > { %v3596_v58 = vpop.f32.mrb[92].mxu0  ;;  %3983 = vmatprep.mubr.bf16.mxu1 %v1913_v55 }
 0x594   : > { %v3597_v59 = vpop.f32.mrb[93].mxu0 }
 0x595   : > { %v3598_v60 = vadd.f32 %v3597_v59, %v3596_v58  ;;  %v3599_v26 = vpop.f32.mrb[94].mxu0 }
 0x596   : > { %v3600_v20 = vpop.f32.mrb[95].mxu0 }
 0x597   : > { %v3601_v56 = vadd.f32 %v3600_v20, %v3599_v26 }
 0x599   : > { %v1914_v12 = vpack.c.bf16 %v3601_v56, %v3598_v60 }
 0x59b   : > { %v3602_v4 = vpop.f32.mrb[96].mxu0  ;;  %3984 = vmatmul.mubr.bf16.gmra.mrb[76].mxu1 %v1914_v12 }
 0x59c   : > { %v3603_v29 = vpop.f32.mrb[97].mxu0 }
 0x59d   : > { %v3604_v23 = vadd.f32 %v3603_v29, %v3602_v4  ;;  %v3605_v19 = vpop.f32.mrb[98].mxu0 }
 0x59e   : > { %v3606_v21 = vpop.f32.mrb[99].mxu0 }
 0x59f   : > { %v3607_v7 = vadd.f32 %v3606_v21, %v3605_v19 }
 0x5a1   : > { %v1915_v30 = vpack.c.bf16 %v3607_v7, %v3604_v23 }
 0x5a3   : > { %v3608_v63 = vpop.f32.mrb[100].mxu0  ;;  %3987 = vmatprep.mubr.bf16.mxu1 %v1915_v30 }
 0x5a4   : > { %v3609_v37 = vpop.f32.mrb[101].mxu0 }
 0x5a5   : > { %v3610_v39 = vadd.f32 %v3609_v37, %v3608_v63  ;;  %v3611_v41 = vpop.f32.mrb[102].mxu0 }
 0x5a6   : > { %v3612_v35 = vpop.f32.mrb[103].mxu0 }
 0x5a7   : > { %v3613_v18 = vadd.f32 %v3612_v35, %v3611_v41 }
 0x5a9   : > { %v1916_v1 = vpack.c.bf16 %v3613_v18, %v3610_v39 }
 0x5ab   : > { %v3614_v28 = vpop.f32.mrb[104].mxu0  ;;  %3988 = vmatmul.mubr.bf16.gmra.mrb[80].mxu1 %v1916_v1 }
 0x5ac   : > { %v3615_v24 = vpop.f32.mrb[105].mxu0 }
 0x5ad   : > { %v3616_v38 = vadd.f32 %v3615_v24, %v3614_v28  ;;  %v3617_v0 = vpop.f32.mrb[106].mxu0 }
 0x5ae   : > { %v3618_v33 = vpop.f32.mrb[107].mxu0 }
 0x5af   : > { %v3619_v40 = vadd.f32 %v3618_v33, %v3617_v0 }
 0x5b1   : > { %v1917_v16 = vpack.c.bf16 %v3619_v40, %v3616_v38 }
 0x5b3   : > { %v3620_v32 = vpop.f32.mrb[108].mxu0  ;;  %3991 = vmatprep.mubr.bf16.mxu1 %v1917_v16 }
 0x5b4   : > { %v3621_v36 = vpop.f32.mrb[109].mxu0 }
 0x5b5   : > { %v3622_v34 = vadd.f32 %v3621_v36, %v3620_v32  ;;  %v3623_v49 = vpop.f32.mrb[110].mxu0  ;;  %v4346_v32 = vld [vmem:[%s5157_s7 + $0x4] ss:$8 sps:$4 sm:$0xff]  }
 0x5b6   : > { %v3624_v53 = vpop.f32.mrb[111].mxu0 }
 0x5b7   : > { %v3625_v54 = vadd.f32 %v3624_v53, %v3623_v49 }
 0x5b9   : > { %v1918_v55 = vpack.c.bf16 %v3625_v54, %v3622_v34 }
 0x5bb   : > { %v3626_v58 = vpop.f32.mrb[112].mxu0  ;;  %3992 = vmatmul.mubr.bf16.gmra.mrb[84].mxu1 %v1918_v55 }
 0x5bc   : > { %v3627_v59 = vpop.f32.mrb[113].mxu0 }
 0x5bd   : > { %v3628_v60 = vadd.f32 %v3627_v59, %v3626_v58  ;;  %v3629_v26 = vpop.f32.mrb[114].mxu0 }
 0x5be   : > { %v3630_v20 = vpop.f32.mrb[115].mxu0 }
 0x5bf   : > { %v3631_v56 = vadd.f32 %v3630_v20, %v3629_v26 }
 0x5c1   : > { %v1919_v12 = vpack.c.bf16 %v3631_v56, %v3628_v60 }
 0x5c3   : > { %v3632_v4 = vpop.f32.mrb[116].mxu0  ;;  %3995 = vmatprep.mubr.bf16.mxu1 %v1919_v12 }
 0x5c4   : > { %v3633_v29 = vpop.f32.mrb[117].mxu0 }
 0x5c5   : > { %v3634_v23 = vadd.f32 %v3633_v29, %v3632_v4  ;;  %v3635_v19 = vpop.f32.mrb[118].mxu0 }
 0x5c6   : > { %v3636_v21 = vpop.f32.mrb[119].mxu0 }
 0x5c7   : > { %v3637_v7 = vadd.f32 %v3636_v21, %v3635_v19 }
 0x5c9   : > { %v1920_v30 = vpack.c.bf16 %v3637_v7, %v3634_v23 }
 0x5cb   : > { %v3638_v63 = vpop.f32.mrb[120].mxu0  ;;  %3996 = vmatmul.mubr.bf16.gmra.mrb[88].mxu1 %v1920_v30 }
 0x5cc   : > { %v3639_v37 = vpop.f32.mrb[121].mxu0 }
 0x5cd   : > { %v3640_v39 = vadd.f32 %v3639_v37, %v3638_v63  ;;  %v3641_v41 = vpop.f32.mrb[122].mxu0 }
 0x5ce   : > { %v3642_v35 = vpop.f32.mrb[123].mxu0 }
 0x5cf   : > { %v3643_v18 = vadd.f32 %v3642_v35, %v3641_v41 }
 0x5d1   : > { %v1921_v1 = vpack.c.bf16 %v3643_v18, %v3640_v39 }
 0x5d3   : > { %v3644_v28 = vpop.f32.mrb[124].mxu0  ;;  %3999 = vmatprep.mubr.bf16.mxu1 %v1921_v1 }
 0x5d4   : > { %v3645_v24 = vpop.f32.mrb[125].mxu0 }
 0x5d5   : > { %v3646_v38 = vadd.f32 %v3645_v24, %v3644_v28  ;;  %v3647_v0 = vpop.f32.mrb[126].mxu0 }
 0x5d6   : > { %v3648_v33 = vpop.f32.mrb[127].mxu0 }
 0x5d7   : > { %v3649_v40 = vadd.f32 %v3648_v33, %v3647_v0 }
 0x5d9   : > { %v1922_v16 = vpack.c.bf16 %v3649_v40, %v3646_v38 }
 0x5db   : > { %4000 = vmatmul.mubr.bf16.gmra.mrb[92].mxu1 %v1922_v16 }
 0x5dc   : > { %2196 = vmatprep.mubr.bf16.mxu1 %v4346_v32 }
 0x63e   : > { %v3973_v36 = vpop.f32.mrb[64].mxu1 }
 0x63f   : > { %v1966_v34 = vadd.f32 %v3973_v36, %v5529_v25  ;;  %v1957_v49 = vpop.f32.mrb[65].mxu1 }
 0x640   : > { %v1958_v53 = vadd.f32 %v5529_v25, %v1957_v49  ;;  %v3974_v54 = vpop.f32.mrb[66].mxu1 }
 0x641   : > { %v2086_v55 = vadd.f32 %v1966_v34, %v5244_v57  ;;  %v1969_v58 = vadd.f32 %v3974_v54, %v5529_v25  ;;  %v1960_v59 = vpop.f32.mrb[67].mxu1 }
 0x642   : > { %v2084_v60 = vadd.f32 %v1958_v53, %v5225_v47  ;;  %v1961_v26 = vadd.f32 %v5529_v25, %v1960_v59 }
 0x643   : > { %v2087_v20 = vadd.f32 %v1969_v58, %v5237_v52  ;;  %v2118_v12 = vmax.f32 %v2086_v55, 0.0  ;;  %v6211_v58 = vld [vmem:[#allocation33_spill] sm:$0xff] }
 0x644   : > { %v2085_v56 = vadd.f32 %v1961_v26, %v5219_v43  ;;  %v2116_v29 = vmax.f32 %v2084_v60, 0.0 }
 0x645   : > { %v2119_v4 = vmax.f32 %v2087_v20, 0.0  ;;  %v6212_v20 = vld [vmem:[#allocation32_spill] sm:$0xff] }
 0x646   : > { %v2117_v23 = vmax.f32 %v2085_v56, 0.0 }
 0x647   : > { %v5675_v19 = vpack.c.bf16 %v2119_v4, %v2118_v12 }
 0x648   : > { %v5677_v21 = vpack.c.bf16 %v2117_v23, %v2116_v29 }
 0x64e   : > { %v3977_v7 = vpop.f32.mrb[68].mxu1 }
 0x64f   : > { %v1982_v30 = vadd.f32 %v3977_v7, %v5529_v25  ;;  %v1973_v63 = vpop.f32.mrb[69].mxu1 }
 0x650   : > { %v1974_v37 = vadd.f32 %v5529_v25, %v1973_v63  ;;  %v3978_v39 = vpop.f32.mrb[70].mxu1 }
 0x651   : > { %v2090_v41 = vadd.f32 %v1982_v30, %v5276_v17  ;;  %v1985_v35 = vadd.f32 %v3978_v39, %v5529_v25  ;;  %v1976_v18 = vpop.f32.mrb[71].mxu1 }
 0x652   : > { %v2088_v1 = vadd.f32 %v1974_v37, %v5256_v5  ;;  %v1977_v28 = vadd.f32 %v5529_v25, %v1976_v18 }
 0x653   : > { %v2091_v24 = vadd.f32 %v1985_v35, %v5269_v11  ;;  %v2122_v0 = vmax.f32 %v2090_v41, 0.0 }
 0x654   : > { %v2089_v38 = vadd.f32 %v1977_v28, %v5249_v62  ;;  %v2120_v40 = vmax.f32 %v2088_v1, 0.0 }
 0x655   : > { %v2123_v33 = vmax.f32 %v2091_v24, 0.0  ;;  %v6213_v24 = vld [vmem:[#allocation35_spill] sm:$0xff] }
 0x656   : > { %v2121_v16 = vmax.f32 %v2089_v38, 0.0 }
 0x657   : > { %v5687_v32 = vpack.c.bf16 %v2123_v33, %v2122_v0 }
 0x658   : > { %v5689_v36 = vpack.c.bf16 %v2121_v16, %v2120_v40  ;;  %v6214_v40 = vld [vmem:[#allocation34_spill] sm:$0xff] }
 0x65e   : > { %v3981_v34 = vpop.f32.mrb[72].mxu1 }
 0x65f   : > { %v1998_v49 = vadd.f32 %v3981_v34, %v5529_v25  ;;  %v1989_v53 = vpop.f32.mrb[73].mxu1 }
 0x660   : > { %v1990_v54 = vadd.f32 %v5529_v25, %v1989_v53  ;;  %v3982_v55 = vpop.f32.mrb[74].mxu1 }
 0x661   : > { %v2094_v59 = vadd.f32 %v1998_v49, %v6211_v58  ;;  %v2001_v60 = vadd.f32 %v3982_v55, %v5529_v25  ;;  %v1992_v26 = vpop.f32.mrb[75].mxu1 }
 0x662   : > { %v2092_v56 = vadd.f32 %v1990_v54, %v6212_v20  ;;  %v1993_v12 = vadd.f32 %v5529_v25, %v1992_v26 }
 0x663   : > { %v2095_v4 = vadd.f32 %v2001_v60, %v5303_v46  ;;  %v2126_v23 = vmax.f32 %v2094_v59, 0.0 }
 0x664   : > { %v2093_v29 = vadd.f32 %v1993_v12, %v5281_v22  ;;  %v2124_v30 = vmax.f32 %v2092_v56, 0.0 }
 0x665   : > { %v2127_v7 = vmax.f32 %v2095_v4, 0.0 }
 0x666   : > { %v2125_v63 = vmax.f32 %v2093_v29, 0.0 }
 0x667   : > { %v5699_v37 = vpack.c.bf16 %v2127_v7, %v2126_v23 }
 0x668   : > { %v5701_v39 = vpack.c.bf16 %v2125_v63, %v2124_v30 }
 0x66e   : > { %v3985_v41 = vpop.f32.mrb[76].mxu1 }
 0x66f   : > { %v2014_v35 = vadd.f32 %v3985_v41, %v5529_v25  ;;  %v2005_v18 = vpop.f32.mrb[77].mxu1 }
 0x670   : > { %v2006_v1 = vadd.f32 %v5529_v25, %v2005_v18  ;;  %v3986_v28 = vpop.f32.mrb[78].mxu1 }
 0x671   : > { %v2098_v38 = vadd.f32 %v2014_v35, %v6213_v24  ;;  %v2017_v0 = vadd.f32 %v3986_v28, %v5529_v25  ;;  %v2008_v33 = vpop.f32.mrb[79].mxu1 }
 0x672   : > { %v2096_v16 = vadd.f32 %v2006_v1, %v6214_v40  ;;  %v2009_v34 = vadd.f32 %v5529_v25, %v2008_v33 }
 0x673   : > { %v2099_v49 = vadd.f32 %v2017_v0, %v5339_v15  ;;  %v2130_v54 = vmax.f32 %v2098_v38, 0.0 }
 0x674   : > { %v2097_v53 = vadd.f32 %v2009_v34, %v5317_v61  ;;  %v2128_v59 = vmax.f32 %v2096_v16, 0.0 }
 0x675   : > { %v2131_v55 = vmax.f32 %v2099_v49, 0.0 }
 0x676   : > { %v2129_v60 = vmax.f32 %v2097_v53, 0.0 }
 0x677   : > { %v5711_v26 = vpack.c.bf16 %v2131_v55, %v2130_v54 }
 0x678   : > { %v5713_v56 = vpack.c.bf16 %v2129_v60, %v2128_v59 }
 0x67e   : > { %v3989_v12 = vpop.f32.mrb[80].mxu1 }
 0x67f   : > { %v2030_v4 = vadd.f32 %v3989_v12, %v5529_v25  ;;  %v2021_v29 = vpop.f32.mrb[81].mxu1 }
 0x680   : > { %v2022_v23 = vadd.f32 %v5529_v25, %v2021_v29  ;;  %v3990_v7 = vpop.f32.mrb[82].mxu1 }
 0x681   : > { %v2102_v30 = vadd.f32 %v2030_v4, %v5231_v50  ;;  %v2033_v63 = vadd.f32 %v3990_v7, %v5529_v25  ;;  %v2024_v41 = vpop.f32.mrb[83].mxu1 }
 0x682   : > { %v2100_v35 = vadd.f32 %v2022_v23, %v5222_v45  ;;  %v2025_v18 = vadd.f32 %v5529_v25, %v2024_v41 }
 0x683   : > { %v2103_v1 = vadd.f32 %v2033_v63, %v5228_v48  ;;  %v2134_v38 = vmax.f32 %v2102_v30, 0.0 }
 0x684   : > { %v2101_v28 = vadd.f32 %v2025_v18, %v5234_v51  ;;  %v2132_v33 = vmax.f32 %v2100_v35, 0.0 }
 0x685   : > { %v2135_v0 = vmax.f32 %v2103_v1, 0.0 }
 0x686   : > { %v2133_v16 = vmax.f32 %v2101_v28, 0.0 }
 0x687   : > { %v2157_v34 = vpack.c.bf16 %v2135_v0, %v2134_v38 }
 0x688   : > { %v2156_v49 = vpack.c.bf16 %v2133_v16, %v2132_v33 }
 0x68a   : > { %3674 = vmatprep.subr.bf16.mxu1 %v2156_v49 }
 0x68b   : > { %3675 = vmatpush3.bf16.msra.mxu1 %v5677_v21 }
 0x68c   : > { %3676 = vmatprep.subr.bf16.mxu1 %v2157_v34 }
 0x68e   : > { %v3993_v53 = vpop.f32.mrb[84].mxu1 }
 0x68f   : > { %v2046_v54 = vadd.f32 %v3993_v53, %v5529_v25  ;;  %v2037_v55 = vpop.f32.mrb[85].mxu1  ;;  %3677 = vmatpush3.bf16.msra.mxu1 %v5675_v19 }
 0x690   : > { %v2038_v59 = vadd.f32 %v5529_v25, %v2037_v55  ;;  %v3994_v60 = vpop.f32.mrb[86].mxu1 }
 0x691   : > { %v2106_v12 = vadd.f32 %v2046_v54, %v5263_v9  ;;  %v2049_v4 = vadd.f32 %v3994_v60, %v5529_v25  ;;  %v2040_v29 = vpop.f32.mrb[87].mxu1 }
 0x692   : > { %v2104_v23 = vadd.f32 %v2038_v59, %v5253_v2  ;;  %v2041_v7 = vadd.f32 %v5529_v25, %v2040_v29 }
 0x693   : > { %v2107_v21 = vadd.f32 %v2049_v4, %v5259_v6  ;;  %v2138_v63 = vmax.f32 %v2106_v12, 0.0 }
 0x694   : > { %v2105_v30 = vadd.f32 %v2041_v7, %v5266_v10  ;;  %v2136_v35 = vmax.f32 %v2104_v23, 0.0 }
 0x695   : > { %v2139_v41 = vmax.f32 %v2107_v21, 0.0 }
 0x696   : > { %v2137_v19 = vmax.f32 %v2105_v30, 0.0 }
 0x697   : > { %v2159_v18 = vpack.c.bf16 %v2139_v41, %v2138_v63 }
 0x698   : > { %v2158_v1 = vpack.c.bf16 %v2137_v19, %v2136_v35 }
 0x69a   : > { %3678 = vmatprep.subr.bf16.mxu1 %v2158_v1 }
 0x69b   : > { %3679 = vmatpush3.bf16.msra.mxu1 %v5689_v36 }
 0x69c   : > { %3680 = vmatprep.subr.bf16.mxu1 %v2159_v18 }
 0x69e   : > { %v3997_v28 = vpop.f32.mrb[88].mxu1 }
 0x69f   : > { %v2062_v38 = vadd.f32 %v3997_v28, %v5529_v25  ;;  %v2053_v0 = vpop.f32.mrb[89].mxu1  ;;  %3681 = vmatpush3.bf16.msra.mxu1 %v5687_v32 }
 0x6a0   : > { %v2054_v33 = vadd.f32 %v5529_v25, %v2053_v0  ;;  %v3998_v16 = vpop.f32.mrb[90].mxu1 }
 0x6a1   : > { %v2110_v34 = vadd.f32 %v2062_v38, %v5296_v42  ;;  %v2065_v49 = vadd.f32 %v3998_v16, %v5529_v25  ;;  %v2056_v53 = vpop.f32.mrb[91].mxu1 }
 0x6a2   : > { %v2108_v54 = vadd.f32 %v2054_v33, %v5285_v27  ;;  %v2057_v55 = vadd.f32 %v5529_v25, %v2056_v53  ;;  %v4348_v53 = vld [vmem:[%s5157_s7 + $0x14] ss:$8 sps:$4 sm:$0xff]  }
 0x6a3   : > { %v2111_v36 = vadd.f32 %v2065_v49, %v5292_v31  ;;  %v2142_v60 = vmax.f32 %v2110_v34, 0.0 }
 0x6a4   : > { %v2109_v59 = vadd.f32 %v2057_v55, %v5299_v44  ;;  %v2140_v4 = vmax.f32 %v2108_v54, 0.0  ;;  %v4349_v54 = vld [vmem:[%s5157_s7 + $0x10] ss:$8 sps:$4 sm:$0xff]   ;;  %v4350_v55 = vld [vmem:[%s5157_s7 + $0x24] ss:$8 sps:$4 sm:$0xff]  }
 0x6a5   : > { %v2143_v12 = vmax.f32 %v2111_v36, 0.0  ;;  %v4351_v36 = vld [vmem:[%s5157_s7 + $0x20] ss:$8 sps:$4 sm:$0xff]  }
 0x6a6   : > { %v2141_v32 = vmax.f32 %v2109_v59, 0.0  ;;  %v4353_v59 = vld [vmem:[%s5157_s7 + $0x30] ss:$8 sps:$4 sm:$0xff]  }
 0x6a7   : > { %v2161_v29 = vpack.c.bf16 %v2143_v12, %v2142_v60  ;;  %v4355_v60 = vld [vmem:[%s5157_s7 + $0x40] ss:$8 sps:$4 sm:$0xff]   ;;  %v4356_v12 = vld [vmem:[%s5157_s7 + $0x54] ss:$8 sps:$4 sm:$0xff]  }
 0x6a8   : > { %v2160_v23 = vpack.c.bf16 %v2141_v32, %v2140_v4  ;;  %v4357_v4 = vld [vmem:[%s5157_s7 + $0x50] ss:$8 sps:$4 sm:$0xff]   ;;  %v4358_v32 = vld [vmem:[%s5157_s7 + $0x64] ss:$8 sps:$4 sm:$0xff]  }
 0x6aa   : > { %3682 = vmatprep.subr.bf16.mxu1 %v2160_v23  ;;  %v4360_v23 = vld [vmem:[%s5157_s7 + $0x74] ss:$8 sps:$4 sm:$0xff]  }
 0x6ab   : > { %3683 = vmatpush3.bf16.msra.mxu1 %v5701_v39 }
 0x6ac   : > { %3684 = vmatprep.subr.bf16.mxu1 %v2161_v29  ;;  %v4359_v29 = vld [vmem:[%s5157_s7 + $0x60] ss:$8 sps:$4 sm:$0xff]  }
 0x6ae   : > { %v4001_v7 = vpop.f32.mrb[92].mxu1 }
 0x6af   : > { %v2078_v21 = vadd.f32 %v4001_v7, %v5529_v25  ;;  %v2069_v30 = vpop.f32.mrb[93].mxu1  ;;  %3685 = vmatpush3.bf16.msra.mxu1 %v5699_v37  ;;  %v4361_v7 = vld [vmem:[%s5157_s7 + $0x70] ss:$8 sps:$4 sm:$0xff]  }
 0x6b0   : > { %v2070_v63 = vadd.f32 %v5529_v25, %v2069_v30  ;;  %v4002_v41 = vpop.f32.mrb[94].mxu1  ;;  %v4363_v30 = vld [vmem:[%s5157_s7 + $0x80] ss:$8 sps:$4 sm:$0xff]  }
 0x6b1   : > { %v2114_v35 = vadd.f32 %v2078_v21, %v5332_v13  ;;  %v2081_v19 = vadd.f32 %v4002_v41, %v5529_v25  ;;  %v2072_v18 = vpop.f32.mrb[95].mxu1  ;;  %v4362_v21 = vld [vmem:[%s5157_s7 + $0x84] ss:$8 sps:$4 sm:$0xff]   ;;  %v4365_v41 = vld [vmem:[%s5157_s7 + $0x90] ss:$8 sps:$4 sm:$0xff]  }
 0x6b2   : > { %v2112_v1 = vadd.f32 %v2070_v63, %v5321_v3  ;;  %v2073_v39 = vadd.f32 %v5529_v25, %v2072_v18  ;;  %v4347_v25 = vld [vmem:[%s5157_s7] ss:$8 sps:$4 sm:$0xff]   ;;  %v4364_v63 = vld [vmem:[%s5157_s7 + $0x94] ss:$8 sps:$4 sm:$0xff]  }
 0x6b3   : > { %v2115_v28 = vadd.f32 %v2081_v19, %v5328_v8  ;;  %v2146_v37 = vmax.f32 %v2114_v35, 0.0  ;;  %v4366_v35 = vld [vmem:[%s5157_s7 + $0xa4] ss:$8 sps:$4 sm:$0xff]   ;;  %v4367_v19 = vld [vmem:[%s5157_s7 + $0xa0] ss:$8 sps:$4 sm:$0xff]  }
 0x6b4   : > { %v2113_v38 = vadd.f32 %v2073_v39, %v5335_v14  ;;  %v2144_v33 = vmax.f32 %v2112_v1, 0.0  ;;  %v4368_v18 = vld [vmem:[%s5157_s7 + $0xb4] ss:$8 sps:$4 sm:$0xff]   ;;  %v4369_v1 = vld [vmem:[%s5157_s7 + $0xb0] ss:$8 sps:$4 sm:$0xff]  }
 0x6b5   : > { %v2147_v0 = vmax.f32 %v2115_v28, 0.0  ;;  %v4370_v39 = vld [vmem:[%s5157_s7 + $0xc4] ss:$8 sps:$4 sm:$0xff]   ;;  %v4371_v28 = vld [vmem:[%s5157_s7 + $0xc0] ss:$8 sps:$4 sm:$0xff]  }
 0x6b6   : > { %v2145_v16 = vmax.f32 %v2113_v38, 0.0  ;;  %v4372_v38 = vld [vmem:[%s5157_s7 + $0xd4] ss:$8 sps:$4 sm:$0xff]  }
 0x6b7   : > { %v2163_v34 = vpack.c.bf16 %v2147_v0, %v2146_v37  ;;  %v4373_v37 = vld [vmem:[%s5157_s7 + $0xd0] ss:$8 sps:$4 sm:$0xff]   ;;  %v4374_v0 = vld [vmem:[%s5157_s7 + $0xe4] ss:$8 sps:$4 sm:$0xff]  }
 0x6b8   : > { %v2162_v49 = vpack.c.bf16 %v2145_v16, %v2144_v33  ;;  %v4375_v33 = vld [vmem:[%s5157_s7 + $0xe0] ss:$8 sps:$4 sm:$0xff]   ;;  %v4376_v16 = vld [vmem:[%s5157_s7 + $0xf4] ss:$8 sps:$4 sm:$0xff]  }
 0x6ba   : > { %3686 = vmatprep.subr.bf16.mxu1 %v2162_v49 }
 0x6bb   : > { %3687 = vmatpush3.bf16.msra.mxu1 %v5713_v56  ;;  %v4352_v56 = vld [vmem:[%s5157_s7 + $0x34] ss:$8 sps:$4 sm:$0xff]  }
 0x6bc   : > { %3688 = vmatprep.subr.bf16.mxu1 %v2163_v34  ;;  %v4377_v34 = vld [vmem:[%s5157_s7 + $0xf0] ss:$8 sps:$4 sm:$0xff]  }
 0x6bf   : > { %3689 = vmatpush3.bf16.msra.mxu1 %v5711_v26  ;;  %v4354_v26 = vld [vmem:[%s5157_s7 + $0x44] ss:$8 sps:$4 sm:$0xff]   ;;  %s3042_s7 = sshll.u32 %s5916_s27, 4  ;;  %s5933_s7 = int_to_ptr.vmem [resolvable:$true] %s3042_s7 }
 0x6c0   : > { %s4609_s24 = scalar_lea.vmem %s5933_s7, 256  ;;  %p4616_p12 = scmp.lt.s32.totalorder %s5933_s7, %s4614_s15 }
 0x6c1   : > { %p4610_p0 = scmp.ne.s32.totalorder %s5933_s7, %s4609_s24 }
 0x6c2   : > { %2197 = vmatmul.mubr.bf16.vlgmr.msra.gmra.mrb[96].mxu1 %v4347_v25 }
 0x6c3   : > { %2204 = vmatprep.mubr.bf16.mxu1 %v4348_v53  ;;  %p4611_p7 = pnand %p4610_p0, %p6220_p13 }
 0x6c5   : > { %p4612_p10 = pneg %p4611_p7 }
 0x6ca   : > { %2205 = vmatmul.mubr.bf16.gmra.mrb[100].mxu1 %v4349_v54 }
 0x6cb   : > { %2212 = vmatprep.mubr.bf16.mxu1 %v4350_v55 }
 0x6d2   : > { %2213 = vmatmul.mubr.bf16.gmra.mrb[104].mxu1 %v4351_v36 }
 0x6d3   : > { %2220 = vmatprep.mubr.bf16.mxu1 %v4352_v56 }
 0x6da   : > { %2221 = vmatmul.mubr.bf16.gmra.mrb[108].mxu1 %v4353_v59 }
 0x6db   : > { %2228 = vmatprep.mubr.bf16.mxu1 %v4354_v26 }
 0x6e2   : > { %2229 = vmatmul.mubr.bf16.gmra.mrb[112].mxu1 %v4355_v60 }
 0x6e3   : > { %2236 = vmatprep.mubr.bf16.mxu1 %v4356_v12 }
 0x6ea   : > { %2237 = vmatmul.mubr.bf16.gmra.mrb[116].mxu1 %v4357_v4 }
 0x6eb   : > { %2244 = vmatprep.mubr.bf16.mxu1 %v4358_v32 }
 0x6f2   : > { %2245 = vmatmul.mubr.bf16.gmra.mrb[120].mxu1 %v4359_v29 }
 0x6f3   : > { %2252 = vmatprep.mubr.bf16.mxu1 %v4360_v23 }
 0x6fa   : > { %2253 = vmatmul.mubr.bf16.gmra.mrb[124].mxu1 %v4361_v7 }
 0x6fb   : > { %2260 = vmatprep.mubr.bf16.mxu1 %v4362_v21 }
 0x702   : > { %2261 = vmatmul.mubr.bf16.gmra.mrb[128].mxu1 %v4363_v30 }
 0x703   : > { %2268 = vmatprep.mubr.bf16.mxu1 %v4364_v63 }
 0x70a   : > { %2269 = vmatmul.mubr.bf16.gmra.mrb[132].mxu1 %v4365_v41 }
 0x70b   : > { %2276 = vmatprep.mubr.bf16.mxu1 %v4366_v35 }
 0x712   : > { %2277 = vmatmul.mubr.bf16.gmra.mrb[136].mxu1 %v4367_v19 }
 0x713   : > { %2284 = vmatprep.mubr.bf16.mxu1 %v4368_v18 }
 0x71a   : > { %2285 = vmatmul.mubr.bf16.gmra.mrb[140].mxu1 %v4369_v1 }
 0x71b   : > { %2292 = vmatprep.mubr.bf16.mxu1 %v4370_v39 }
 0x722   : > { %2293 = vmatmul.mubr.bf16.gmra.mrb[144].mxu1 %v4371_v28 }
 0x723   : > { %2300 = vmatprep.mubr.bf16.mxu1 %v4372_v38 }
 0x72a   : > { %2301 = vmatmul.mubr.bf16.gmra.mrb[148].mxu1 %v4373_v37 }
 0x72b   : > { %2308 = vmatprep.mubr.bf16.mxu1 %v4374_v0 }
 0x732   : > { %2309 = vmatmul.mubr.bf16.gmra.mrb[152].mxu1 %v4375_v33 }
 0x733   : > { %2316 = vmatprep.mubr.bf16.mxu1 %v4376_v16 }
 0x73a   : > { %2317 = vmatmul.mubr.bf16.gmra.mrb[156].mxu1 %v4377_v34 }
 0x795   : > { %v3690_v49 = vpop.f32.mrb[96].mxu1 }
 0x796   : > { %v3691_v25 = vpop.f32.mrb[97].mxu1 }
 0x797   : > { %v3692_v53 = vadd.f32 %v3691_v25, %v3690_v49  ;;  %v3693_v54 = vpop.f32.mrb[98].mxu1 }
 0x798   : > { %v3694_v55 = vpop.f32.mrb[99].mxu1 }
 0x799   : > { %v3695_v36 = vadd.f32 %v3694_v55, %v3693_v54 }
 0x79b   : > { %v2325_v56 = vpack.c.bf16 %v3695_v36, %v3692_v53 }
 0x79d   : > { %v3696_v59 = vpop.f32.mrb[100].mxu1  ;;  %4019 = vmatprep.mubr.bf16.mxu0 %v2325_v56 }
 0x79e   : > { %v3697_v26 = vpop.f32.mrb[101].mxu1 }
 0x79f   : > { %v3698_v60 = vadd.f32 %v3697_v26, %v3696_v59  ;;  %v3699_v12 = vpop.f32.mrb[102].mxu1 }
 0x7a0   : > { %v3700_v4 = vpop.f32.mrb[103].mxu1 }
 0x7a1   : > { %v3701_v32 = vadd.f32 %v3700_v4, %v3699_v12 }
 0x7a3   : > { %v2326_v29 = vpack.c.bf16 %v3701_v32, %v3698_v60 }
 0x7a5   : > { %v3702_v23 = vpop.f32.mrb[104].mxu1  ;;  %4020 = vmatmul.mubr.bf16.vlgmr.msra.gmra.mrb[128].mxu0 %v2326_v29 }
 0x7a6   : > { %v3703_v7 = vpop.f32.mrb[105].mxu1 }
 0x7a7   : > { %v3704_v21 = vadd.f32 %v3703_v7, %v3702_v23  ;;  %v3705_v30 = vpop.f32.mrb[106].mxu1 }
 0x7a8   : > { %v3706_v63 = vpop.f32.mrb[107].mxu1 }
 0x7a9   : > { %v3707_v41 = vadd.f32 %v3706_v63, %v3705_v30 }
 0x7ab   : > { %v2327_v35 = vpack.c.bf16 %v3707_v41, %v3704_v21 }
 0x7ad   : > { %v3708_v19 = vpop.f32.mrb[108].mxu1  ;;  %4023 = vmatprep.mubr.bf16.mxu0 %v2327_v35 }
 0x7ae   : > { %v3709_v18 = vpop.f32.mrb[109].mxu1 }
 0x7af   : > { %v3710_v1 = vadd.f32 %v3709_v18, %v3708_v19  ;;  %v3711_v39 = vpop.f32.mrb[110].mxu1 }
 0x7b0   : > { %v3712_v28 = vpop.f32.mrb[111].mxu1 }
 0x7b1   : > { %v3713_v38 = vadd.f32 %v3712_v28, %v3711_v39 }
 0x7b3   : > { %v2328_v37 = vpack.c.bf16 %v3713_v38, %v3710_v1 }
 0x7b5   : > { %v3714_v0 = vpop.f32.mrb[112].mxu1  ;;  %4024 = vmatmul.mubr.bf16.gmra.mrb[132].mxu0 %v2328_v37 }
 0x7b6   : > { %v3715_v33 = vpop.f32.mrb[113].mxu1 }
 0x7b7   : > { %v3716_v16 = vadd.f32 %v3715_v33, %v3714_v0  ;;  %v3717_v34 = vpop.f32.mrb[114].mxu1 }
 0x7b8   : > { %v3718_v49 = vpop.f32.mrb[115].mxu1 }
 0x7b9   : > { %v3719_v25 = vadd.f32 %v3718_v49, %v3717_v34 }
 0x7bb   : > { %v2329_v53 = vpack.c.bf16 %v3719_v25, %v3716_v16 }
 0x7bd   : > { %v3720_v54 = vpop.f32.mrb[116].mxu1  ;;  %4027 = vmatprep.mubr.bf16.mxu0 %v2329_v53 }
 0x7be   : > { %v3721_v55 = vpop.f32.mrb[117].mxu1 }
 0x7bf   : > { %v3722_v36 = vadd.f32 %v3721_v55, %v3720_v54  ;;  %v3723_v56 = vpop.f32.mrb[118].mxu1 }
 0x7c0   : > { %v3724_v59 = vpop.f32.mrb[119].mxu1 }
 0x7c1   : > { %v3725_v26 = vadd.f32 %v3724_v59, %v3723_v56 }
 0x7c3   : > { %v2330_v60 = vpack.c.bf16 %v3725_v26, %v3722_v36 }
 0x7c5   : > { %v3726_v12 = vpop.f32.mrb[120].mxu1  ;;  %4028 = vmatmul.mubr.bf16.gmra.mrb[136].mxu0 %v2330_v60 }
 0x7c6   : > { %v3727_v4 = vpop.f32.mrb[121].mxu1 }
 0x7c7   : > { %v3728_v32 = vadd.f32 %v3727_v4, %v3726_v12  ;;  %v3729_v29 = vpop.f32.mrb[122].mxu1 }
 0x7c8   : > { %v3730_v23 = vpop.f32.mrb[123].mxu1 }
 0x7c9   : > { %v3731_v7 = vadd.f32 %v3730_v23, %v3729_v29 }
 0x7cb   : > { %v2331_v21 = vpack.c.bf16 %v3731_v7, %v3728_v32 }
 0x7cd   : > { %v3732_v30 = vpop.f32.mrb[124].mxu1  ;;  %4031 = vmatprep.mubr.bf16.mxu0 %v2331_v21 }
 0x7ce   : > { %v3733_v63 = vpop.f32.mrb[125].mxu1 }
 0x7cf   : > { %v3734_v41 = vadd.f32 %v3733_v63, %v3732_v30  ;;  %v3735_v35 = vpop.f32.mrb[126].mxu1 }
 0x7d0   : > { %v3736_v19 = vpop.f32.mrb[127].mxu1 }
 0x7d1   : > { %v3737_v18 = vadd.f32 %v3736_v19, %v3735_v35 }
 0x7d3   : > { %v2332_v1 = vpack.c.bf16 %v3737_v18, %v3734_v41 }
 0x7d5   : > { %v3738_v39 = vpop.f32.mrb[128].mxu1  ;;  %4032 = vmatmul.mubr.bf16.gmra.mrb[140].mxu0 %v2332_v1 }
 0x7d6   : > { %v3739_v28 = vpop.f32.mrb[129].mxu1 }
 0x7d7   : > { %v3740_v38 = vadd.f32 %v3739_v28, %v3738_v39  ;;  %v3741_v37 = vpop.f32.mrb[130].mxu1 }
 0x7d8   : > { %v3742_v0 = vpop.f32.mrb[131].mxu1 }
 0x7d9   : > { %v3743_v33 = vadd.f32 %v3742_v0, %v3741_v37 }
 0x7db   : > { %v2333_v16 = vpack.c.bf16 %v3743_v33, %v3740_v38 }
 0x7dd   : > { %v3744_v34 = vpop.f32.mrb[132].mxu1  ;;  %4035 = vmatprep.mubr.bf16.mxu0 %v2333_v16 }
 0x7de   : > { %v3745_v49 = vpop.f32.mrb[133].mxu1 }
 0x7df   : > { %v3746_v25 = vadd.f32 %v3745_v49, %v3744_v34  ;;  %v3747_v53 = vpop.f32.mrb[134].mxu1 }
 0x7e0   : > { %v3748_v54 = vpop.f32.mrb[135].mxu1 }
 0x7e1   : > { %v3749_v55 = vadd.f32 %v3748_v54, %v3747_v53 }
 0x7e3   : > { %v2334_v36 = vpack.c.bf16 %v3749_v55, %v3746_v25 }
 0x7e5   : > { %v3750_v56 = vpop.f32.mrb[136].mxu1  ;;  %4036 = vmatmul.mubr.bf16.gmra.mrb[144].mxu0 %v2334_v36 }
 0x7e6   : > { %v3751_v59 = vpop.f32.mrb[137].mxu1 }
 0x7e7   : > { %v3752_v26 = vadd.f32 %v3751_v59, %v3750_v56  ;;  %v3753_v60 = vpop.f32.mrb[138].mxu1 }
 0x7e8   : > { %v3754_v12 = vpop.f32.mrb[139].mxu1 }
 0x7e9   : > { %v3755_v4 = vadd.f32 %v3754_v12, %v3753_v60 }
 0x7eb   : > { %v2335_v32 = vpack.c.bf16 %v3755_v4, %v3752_v26 }
 0x7ed   : > { %v3756_v29 = vpop.f32.mrb[140].mxu1  ;;  %4039 = vmatprep.mubr.bf16.mxu0 %v2335_v32 }
 0x7ee   : > { %v3757_v23 = vpop.f32.mrb[141].mxu1 }
 0x7ef   : > { %v3758_v7 = vadd.f32 %v3757_v23, %v3756_v29  ;;  %v3759_v21 = vpop.f32.mrb[142].mxu1 }
 0x7f0   : > { %v3760_v30 = vpop.f32.mrb[143].mxu1 }
 0x7f1   : > { %v3761_v63 = vadd.f32 %v3760_v30, %v3759_v21  ;;  %v5789_v30 = vld [vmem:[%s6182_s26] ss:$0 sm:$0xff] }
 0x7f3   : > { %v2336_v41 = vpack.c.bf16 %v3761_v63, %v3758_v7 }
 0x7f5   : > { %v3762_v35 = vpop.f32.mrb[144].mxu1  ;;  %4040 = vmatmul.mubr.bf16.gmra.mrb[148].mxu0 %v2336_v41 }
 0x7f6   : > { %v3763_v19 = vpop.f32.mrb[145].mxu1 }
 0x7f7   : > { %v3764_v18 = vadd.f32 %v3763_v19, %v3762_v35  ;;  %v3765_v1 = vpop.f32.mrb[146].mxu1  ;;  %v4313_v35 = vld [vmem:[%s569_s6 + $0x4] ss:$8 sps:$4 sm:$0xff]  }
 0x7f8   : > { %v3766_v39 = vpop.f32.mrb[147].mxu1 }
 0x7f9   : > { %v3767_v28 = vadd.f32 %v3766_v39, %v3765_v1 }
 0x7fb   : > { %v2337_v38 = vpack.c.bf16 %v3767_v28, %v3764_v18 }
 0x7fd   : > { %v3768_v37 = vpop.f32.mrb[148].mxu1  ;;  %4043 = vmatprep.mubr.bf16.mxu0 %v2337_v38 }
 0x7fe   : > { %v3769_v0 = vpop.f32.mrb[149].mxu1 }
 0x7ff   : > { %v3770_v33 = vadd.f32 %v3769_v0, %v3768_v37  ;;  %v3771_v16 = vpop.f32.mrb[150].mxu1  ;;  %v4314_v0 = vld [vmem:[#allocation11] sm:$0xff]  }
 0x800   : > { %v3772_v34 = vpop.f32.mrb[151].mxu1 }
 0x801   : > { %v3773_v49 = vadd.f32 %v3772_v34, %v3771_v16  ;;  %v4737_v16 = vmov 0.0  }
 0x802   : > { %4051 = vmatprep.subr.bf16.mxu1 %v4737_v16  ;;  %4067 = vmatprep.mubr.msk.bf16.mxu1 %vm4738_vm0, %v4737_v16 }
 0x803   : > { %v2338_v25 = vpack.c.bf16 %v3773_v49, %v3770_v33  ;;  %4052 = vmatpush3.bf16.msra.mxu1 %v4314_v0  ;;  %v4315_v49 = vld [vmem:[#allocation11 + $0x8] sm:$0xff]  }
 0x804   : > { %4053 = vmatprep.subr.bf16.mxu1 %v4737_v16 }
 0x805   : > { %v3774_v53 = vpop.f32.mrb[152].mxu1  ;;  %4044 = vmatmul.mubr.bf16.gmra.mrb[152].mxu0 %v2338_v25 }
 0x806   : > { %v3775_v54 = vpop.f32.mrb[153].mxu1 }
 0x807   : > { %v3776_v55 = vadd.f32 %v3775_v54, %v3774_v53  ;;  %v3777_v36 = vpop.f32.mrb[154].mxu1  ;;  %4054 = vmatpush3.bf16.msra.mxu1 %v4315_v49 }
 0x808   : > { %v3778_v56 = vpop.f32.mrb[155].mxu1  ;;  %4055 = vmatprep.subr.bf16.mxu1 %v4737_v16 }
 0x809   : > { %v3779_v59 = vadd.f32 %v3778_v56, %v3777_v36  ;;  %v4316_v36 = vld [vmem:[#allocation11 + $0x10] sm:$0xff]  }
 0x80b   : > { %v2339_v26 = vpack.c.bf16 %v3779_v59, %v3776_v55  ;;  %4056 = vmatpush3.bf16.msra.mxu1 %v4316_v36 }
 0x80c   : > { %4057 = vmatprep.subr.bf16.mxu1 %v4737_v16 }
 0x80d   : > { %v3780_v60 = vpop.f32.mrb[156].mxu1  ;;  %4047 = vmatprep.mubr.bf16.mxu0 %v2339_v26 }
 0x80e   : > { %v3781_v12 = vpop.f32.mrb[157].mxu1 }
 0x80f   : > { %v3782_v4 = vadd.f32 %v3781_v12, %v3780_v60  ;;  %v3783_v32 = vpop.f32.mrb[158].mxu1  ;;  %v4318_v12 = vld [vmem:[#allocation11 + $0x20] sm:$0xff]  }
 0x810   : > { %v3784_v29 = vpop.f32.mrb[159].mxu1 }
 0x811   : > { %v3785_v23 = vadd.f32 %v3784_v29, %v3783_v32 }
 0x813   : > { %v2340_v7 = vpack.c.bf16 %v3785_v23, %v3782_v4 }
 0x815   : > { %4048 = vmatmul.mubr.bf16.gmra.mrb[156].mxu0 %v2340_v7 }
 0x816   : > { %2624 = vmatprep.mubr.bf16.mxu0 %v4313_v35 }
 0x878   : > { %v4021_v21 = vpop.f32.mrb[128].mxu0 }
 0x879   : > { %v2384_v63 = vadd.f32 %v5789_v30, %v4021_v21  ;;  %v2375_v41 = vpop.f32.mrb[129].mxu0 }
 0x87a   : > { %v2376_v19 = vadd.f32 %v5789_v30, %v2375_v41  ;;  %v4022_v18 = vpop.f32.mrb[130].mxu0  ;;  %v4319_v41 = vld [vmem:[#allocation11 + $0x28] sm:$0xff]  }
 0x87b   : > { %v2504_v1 = vadd.f32 %v2384_v63, %v5244_v57  ;;  %v2387_v39 = vadd.f32 %v5789_v30, %v4022_v18  ;;  %v2378_v28 = vpop.f32.mrb[131].mxu0 }
 0x87c   : > { %v2502_v38 = vadd.f32 %v2376_v19, %v5225_v47  ;;  %v2379_v37 = vadd.f32 %v5789_v30, %v2378_v28 }
 0x87d   : > { %v2505_v33 = vadd.f32 %v2387_v39, %v5237_v52  ;;  %v2536_v25 = vmax.f32 %v2504_v1, 0.0  ;;  %v4317_v52 = vld [vmem:[#allocation11 + $0x18] sm:$0xff]  }
 0x87e   : > { %v2503_v34 = vadd.f32 %v2379_v37, %v5219_v43  ;;  %v2534_v53 = vmax.f32 %v2502_v38, 0.0  ;;  %4058 = vmatpush3.bf16.msra.mxu1 %v4317_v52 }
 0x87f   : > { %v2537_v57 = vmax.f32 %v2505_v33, 0.0  ;;  %4059 = vmatprep.subr.bf16.mxu1 %v4737_v16 }
 0x880   : > { %v2535_v54 = vmax.f32 %v2503_v34, 0.0 }
 0x881   : > { %v5803_v55 = vpack.c.bf16 %v2537_v57, %v2536_v25 }
 0x882   : > { %v5805_v47 = vpack.c.bf16 %v2535_v54, %v2534_v53  ;;  %4060 = vmatpush3.bf16.msra.mxu1 %v4318_v12 }
 0x883   : > { %4061 = vmatprep.subr.bf16.mxu1 %v4737_v16 }
 0x886   : > { %4062 = vmatpush3.bf16.msra.mxu1 %v4319_v41 }
 0x887   : > { %4063 = vmatprep.subr.bf16.mxu1 %v4737_v16 }
 0x888   : > { %v4025_v43 = vpop.f32.mrb[132].mxu0 }
 0x889   : > { %v2400_v56 = vadd.f32 %v5789_v30, %v4025_v43  ;;  %v2391_v59 = vpop.f32.mrb[133].mxu0 }
 0x88a   : > { %v2392_v26 = vadd.f32 %v5789_v30, %v2391_v59  ;;  %v4026_v60 = vpop.f32.mrb[134].mxu0 }
 0x88b   : > { %v2508_v4 = vadd.f32 %v2400_v56, %v5276_v17  ;;  %v2403_v32 = vadd.f32 %v5789_v30, %v4026_v60  ;;  %v2394_v29 = vpop.f32.mrb[135].mxu0 }
 0x88c   : > { %v2506_v23 = vadd.f32 %v2392_v26, %v5256_v5  ;;  %v2395_v7 = vadd.f32 %v5789_v30, %v2394_v29  ;;  %v4320_v5 = vld [vmem:[#allocation11 + $0x30] sm:$0xff]  }
 0x88d   : > { %v2509_v21 = vadd.f32 %v2403_v32, %v5269_v11  ;;  %v2540_v35 = vmax.f32 %v2508_v4, 0.0  ;;  %4064 = vmatpush3.bf16.msra.mxu1 %v4320_v5 }
 0x88e   : > { %v2507_v63 = vadd.f32 %v2395_v7, %v5249_v62  ;;  %v2538_v17 = vmax.f32 %v2506_v23, 0.0  ;;  %4065 = vmatprep.subr.bf16.mxu1 %v4737_v16 }
 0x88f   : > { %v2541_v19 = vmax.f32 %v2509_v21, 0.0 }
 0x890   : > { %v2539_v18 = vmax.f32 %v2507_v63, 0.0 }
 0x891   : > { %v5819_v1 = vpack.c.bf16 %v2541_v19, %v2540_v35 }
 0x892   : > { %v5821_v39 = vpack.c.bf16 %v2539_v18, %v2538_v17 }
 0x898   : > { %v4029_v62 = vpop.f32.mrb[136].mxu0 }
 0x899   : > { %v2416_v11 = vadd.f32 %v5789_v30, %v4029_v62  ;;  %v2407_v28 = vpop.f32.mrb[137].mxu0 }
 0x89a   : > { %v2408_v38 = vadd.f32 %v5789_v30, %v2407_v28  ;;  %v4030_v37 = vpop.f32.mrb[138].mxu0 }
 0x89b   : > { %v2512_v0 = vadd.f32 %v2416_v11, %v6211_v58  ;;  %v2419_v33 = vadd.f32 %v5789_v30, %v4030_v37  ;;  %v2410_v34 = vpop.f32.mrb[139].mxu0 }
 0x89c   : > { %v2510_v49 = vadd.f32 %v2408_v38, %v6212_v20  ;;  %v2411_v25 = vadd.f32 %v5789_v30, %v2410_v34 }
 0x89d   : > { %v2513_v57 = vadd.f32 %v2419_v33, %v5303_v46  ;;  %v2544_v54 = vmax.f32 %v2512_v0, 0.0 }
 0x89e   : > { %v2511_v53 = vadd.f32 %v2411_v25, %v5281_v22  ;;  %v2542_v52 = vmax.f32 %v2510_v49, 0.0 }
 0x89f   : > { %v2545_v36 = vmax.f32 %v2513_v57, 0.0 }
 0x8a0   : > { %v2543_v43 = vmax.f32 %v2511_v53, 0.0 }
 0x8a1   : > { %v5833_v56 = vpack.c.bf16 %v2545_v36, %v2544_v54 }
 0x8a2   : > { %v5835_v59 = vpack.c.bf16 %v2543_v43, %v2542_v52 }
 0x8a8   : > { %v4033_v58 = vpop.f32.mrb[140].mxu0 }
 0x8a9   : > { %v2432_v26 = vadd.f32 %v5789_v30, %v4033_v58  ;;  %v2423_v60 = vpop.f32.mrb[141].mxu0 }
 0x8aa   : > { %v2424_v20 = vadd.f32 %v5789_v30, %v2423_v60  ;;  %v4034_v12 = vpop.f32.mrb[142].mxu0 }
 0x8ab   : > { %v2516_v4 = vadd.f32 %v2432_v26, %v6213_v24  ;;  %v2435_v46 = vadd.f32 %v5789_v30, %v4034_v12  ;;  %v2426_v22 = vpop.f32.mrb[143].mxu0 }
 0x8ac   : > { %v2514_v32 = vadd.f32 %v2424_v20, %v6214_v40  ;;  %v2427_v29 = vadd.f32 %v5789_v30, %v2426_v22 }
 0x8ad   : > { %v2517_v23 = vadd.f32 %v2435_v46, %v5339_v15  ;;  %v2548_v21 = vmax.f32 %v2516_v4, 0.0 }
 0x8ae   : > { %v2515_v7 = vadd.f32 %v2427_v29, %v5317_v61  ;;  %v2546_v41 = vmax.f32 %v2514_v32, 0.0 }
 0x8af   : > { %v2549_v63 = vmax.f32 %v2517_v23, 0.0 }
 0x8b0   : > { %v2547_v35 = vmax.f32 %v2515_v7, 0.0 }
 0x8b1   : > { %v5845_v19 = vpack.c.bf16 %v2549_v63, %v2548_v21 }
 0x8b2   : > { %v5847_v17 = vpack.c.bf16 %v2547_v35, %v2546_v41 }
 0x8b8   : > { %v4037_v24 = vpop.f32.mrb[144].mxu0 }
 0x8b9   : > { %v2448_v18 = vadd.f32 %v5789_v30, %v4037_v24  ;;  %v2439_v5 = vpop.f32.mrb[145].mxu0 }
 0x8ba   : > { %v2440_v40 = vadd.f32 %v5789_v30, %v2439_v5  ;;  %v4038_v62 = vpop.f32.mrb[146].mxu0 }
 0x8bb   : > { %v2520_v11 = vadd.f32 %v2448_v18, %v5231_v50  ;;  %v2451_v15 = vadd.f32 %v5789_v30, %v4038_v62  ;;  %v2442_v61 = vpop.f32.mrb[147].mxu0 }
 0x8bc   : > { %v2518_v28 = vadd.f32 %v2440_v40, %v5222_v45  ;;  %v2443_v38 = vadd.f32 %v5789_v30, %v2442_v61 }
 0x8bd   : > { %v2521_v37 = vadd.f32 %v2451_v15, %v5228_v48  ;;  %v2552_v33 = vmax.f32 %v2520_v11, 0.0 }
 0x8be   : > { %v2519_v0 = vadd.f32 %v2443_v38, %v5234_v51  ;;  %v2550_v49 = vmax.f32 %v2518_v28, 0.0 }
 0x8bf   : > { %v2553_v34 = vmax.f32 %v2521_v37, 0.0 }
 0x8c0   : > { %v2551_v25 = vmax.f32 %v2519_v0, 0.0 }
 0x8c1   : > { %v2575_v57 = vpack.c.bf16 %v2553_v34, %v2552_v33 }
 0x8c2   : > { %v2574_v53 = vpack.c.bf16 %v2551_v25, %v2550_v49 }
 0x8c4   : > { %3810 = vmatprep.subr.bf16.mxu0 %v2574_v53 }
 0x8c5   : > { %3811 = vmatpush3.bf16.msra.mxu0 %v5805_v47 }
 0x8c6   : > { %3812 = vmatprep.subr.bf16.mxu0 %v2575_v57  ;;  %v4327_v57 = vld [vmem:[#allocation13 + $0x28] sm:$0xff]  }
 0x8c8   : > { %v4041_v50 = vpop.f32.mrb[148].mxu0 }
 0x8c9   : > { %v2464_v54 = vadd.f32 %v5789_v30, %v4041_v50  ;;  %v2455_v45 = vpop.f32.mrb[149].mxu0  ;;  %3813 = vmatpush3.bf16.msra.mxu0 %v5803_v55 }
 0x8ca   : > { %v2456_v48 = vadd.f32 %v5789_v30, %v2455_v45  ;;  %v4042_v36 = vpop.f32.mrb[150].mxu0 }
 0x8cb   : > { %v2524_v51 = vadd.f32 %v2464_v54, %v5263_v9  ;;  %v2467_v52 = vadd.f32 %v5789_v30, %v4042_v36  ;;  %v2458_v43 = vpop.f32.mrb[151].mxu0 }
 0x8cc   : > { %v2522_v58 = vadd.f32 %v2456_v48, %v5253_v2  ;;  %v2459_v26 = vadd.f32 %v5789_v30, %v2458_v43  ;;  %v4329_v43 = vld [vmem:[#allocation13 + $0x38] sm:$0xff]  }
 0x8cd   : > { %v2525_v47 = vadd.f32 %v2467_v52, %v5259_v6  ;;  %v2556_v20 = vmax.f32 %v2524_v51, 0.0  ;;  %v4328_v52 = vld [vmem:[#allocation13 + $0x30] sm:$0xff]  }
 0x8ce   : > { %v2523_v60 = vadd.f32 %v2459_v26, %v5266_v10  ;;  %v2554_v4 = vmax.f32 %v2522_v58, 0.0  ;;  %v4330_v58 = vld [vmem:[#allocation14] sm:$0xff]   ;;  %v4331_v26 = vld [vmem:[#allocation14 + $0x8] sm:$0xff]  }
 0x8cf   : > { %v2557_v12 = vmax.f32 %v2525_v47, 0.0  ;;  %v4332_v47 = vld [vmem:[#allocation14 + $0x10] sm:$0xff]  }
 0x8d0   : > { %v2555_v55 = vmax.f32 %v2523_v60, 0.0  ;;  %v4333_v60 = vld [vmem:[#allocation14 + $0x18] sm:$0xff]  }
 0x8d1   : > { %v2577_v46 = vpack.c.bf16 %v2557_v12, %v2556_v20  ;;  %v4334_v20 = vld [vmem:[#allocation14 + $0x20] sm:$0xff]   ;;  %v4335_v12 = vld [vmem:[#allocation14 + $0x28] sm:$0xff]  }
 0x8d2   : > { %v2576_v22 = vpack.c.bf16 %v2555_v55, %v2554_v4  ;;  %v3336_v4 = vld [vmem:[%s6215_s28] ss:$0 sm:$0xff]  ;;  %s4615_s28 = scalar_lea.vmem %s4614_s15, 512 }
 0x8d3   : > { %p4617_p1 = scmp.lt.s32.totalorder %s4615_s28, %s4609_s24 }
 0x8d4   : > { %3814 = vmatprep.subr.bf16.mxu0 %v2576_v22 }
 0x8d5   : > { %3815 = vmatpush3.bf16.msra.mxu0 %v5821_v39  ;;  %p4618_p8 = por %p4617_p1, %p4616_p12 }
 0x8d6   : > { %3816 = vmatprep.subr.bf16.mxu0 %v2577_v46 }
 0x8d7   : > { %p4619_p9 = pnand %p4618_p8, %p4612_p10 }
 0x8d8   : > { %v4045_v9 = vpop.f32.mrb[152].mxu0 }
 0x8d9   : > { %v2480_v32 = vadd.f32 %v5789_v30, %v4045_v9  ;;  %v2471_v2 = vpop.f32.mrb[153].mxu0  ;;  %3817 = vmatpush3.bf16.msra.mxu0 %v5819_v1 }
 0x8da   : > { %v2472_v6 = vadd.f32 %v5789_v30, %v2471_v2  ;;  %v4046_v29 = vpop.f32.mrb[154].mxu0 }
 0x8db   : > { %v2528_v10 = vadd.f32 %v2480_v32, %v5296_v42  ;;  %v2483_v23 = vadd.f32 %v5789_v30, %v4046_v29  ;;  %v2474_v7 = vpop.f32.mrb[155].mxu0 }
 0x8dc   : > { %v2526_v21 = vadd.f32 %v2472_v6, %v5285_v27  ;;  %v2475_v63 = vadd.f32 %v5789_v30, %v2474_v7  ;;  %v4337_v7 = vld [vmem:[#allocation14 + $0x38] sm:$0xff]  }
 0x8dd   : > { %v2529_v39 = vadd.f32 %v2483_v23, %v5292_v31  ;;  %v2560_v35 = vmax.f32 %v2528_v10, 0.0  ;;  %v4336_v23 = vld [vmem:[#allocation14 + $0x30] sm:$0xff]  }
 0x8de   : > { %v2527_v41 = vadd.f32 %v2475_v63, %v5299_v44  ;;  %v2558_v18 = vmax.f32 %v2526_v21, 0.0  ;;  %v3345_v21 = vld [vmem:[%s6216_s14] ss:$0 sm:$0xff] }
 0x8df   : > { %v2561_v24 = vmax.f32 %v2529_v39, 0.0 }
 0x8e0   : > { %v2559_v1 = vmax.f32 %v2527_v41, 0.0 }
 0x8e1   : > { %v2579_v5 = vpack.c.bf16 %v2561_v24, %v2560_v35 }
 0x8e2   : > { %v2578_v40 = vpack.c.bf16 %v2559_v1, %v2558_v18 }
 0x8e4   : > { %3818 = vmatprep.subr.bf16.mxu0 %v2578_v40 }
 0x8e5   : > { %3819 = vmatpush3.bf16.msra.mxu0 %v5835_v59 }
 0x8e6   : > { %3820 = vmatprep.subr.bf16.mxu0 %v2579_v5 }
 0x8e8   : > { %v4049_v42 = vpop.f32.mrb[156].mxu0 }
 0x8e9   : > { %v2496_v62 = vadd.f32 %v5789_v30, %v4049_v42  ;;  %v2487_v27 = vpop.f32.mrb[157].mxu0  ;;  %3821 = vmatpush3.bf16.msra.mxu0 %v5833_v56  ;;  %v2978_v42 = vlaneseq }
 0x8ea   : > { %v2488_v31 = vadd.f32 %v5789_v30, %v2487_v27  ;;  %v4050_v11 = vpop.f32.mrb[158].mxu0 }
 0x8eb   : > { %v2532_v44 = vadd.f32 %v2496_v62, %v5332_v13  ;;  %v2499_v15 = vadd.f32 %v5789_v30, %v4050_v11  ;;  %v2490_v61 = vpop.f32.mrb[159].mxu0  ;;  %v4311_v13 = vld [vmem:[%s569_s6] ss:$8 sps:$4 sm:$0xff]   ;;  %v2979_v62 = vand.u32 127, %v2978_v42  ;;  %s3376_s6 = sshll.u32 %s4839_s17, 8 }
 0x8ec   : > { %v2530_v28 = vadd.f32 %v2488_v31, %v5321_v3  ;;  %v2491_v59 = vadd.f32 %v5789_v30, %v2490_v61  ;;  %v4321_v3 = vld [vmem:[#allocation11 + $0x38] sm:$0xff]   ;;  %v4324_v30 = vld [vmem:[#allocation13 + $0x10] sm:$0xff]   ;;  %s5940_s12 = scalar_lea.hbm %s6219_s13, %s3376_s6 }
 0x8ed   : > { %v2533_v38 = vadd.f32 %v2499_v15, %v5328_v8  ;;  %v2564_v0 = vmax.f32 %v2532_v44, 0.0  ;;  %4066 = vmatpush3.bf16.msra.mxu1 %v4321_v3  ;;  %v4322_v8 = vld [vmem:[#allocation13] sm:$0xff]   ;;  %vm2980_vm1 = vcmp.lt.s32.totalorder %v2979_v62, 2 }
 0x8ee   : > { %v2531_v37 = vadd.f32 %v2491_v59, %v5335_v14  ;;  %v2562_v56 = vmax.f32 %v2530_v28, 0.0  ;;  %4091 = vmatprep.subr.bf16.mxu1 %v4737_v16  ;;  %v4323_v14 = vld [vmem:[#allocation13 + $0x8] sm:$0xff]  }
 0x8ef   : > { %v2565_v33 = vmax.f32 %v2533_v38, 0.0 }
 0x8f0   : > { %v2563_v34 = vmax.f32 %v2531_v37, 0.0 }
 0x8f1   : > { %v2581_v49 = vpack.c.bf16 %v2565_v33, %v2564_v0 }
 0x8f2   : > { %v2580_v25 = vpack.c.bf16 %v2563_v34, %v2562_v56 }
 0x8f4   : > { %3822 = vmatprep.subr.bf16.mxu0 %v2580_v25 }
 0x8f5   : > { %3823 = vmatpush3.bf16.msra.mxu0 %v5847_v17  ;;  %v4326_v17 = vld [vmem:[#allocation13 + $0x20] sm:$0xff]  }
 0x8f6   : > { %3824 = vmatprep.subr.bf16.mxu0 %v2581_v49 }
 0x8f9   : > { %3825 = vmatpush3.bf16.msra.mxu0 %v5845_v19  ;;  %v4325_v19 = vld [vmem:[#allocation13 + $0x18] sm:$0xff]  }
 0x8fa   : > { %4071 = vmatprep.subr.bf16.mxu0 %v4737_v16 }
 0x8fc   : > { %2625 = vmatmul.mubr.bf16.vlgmr.msra.gmra.mrb[160].mxu0 %v4311_v13 }
 0x8fd   : > { %4087 = vmatprep.mubr.msk.bf16.mxu0 %vm4738_vm0, %v4737_v16  ;;  %4072 = vmatpush3.bf16.msra.mxu0 %v4322_v8 }
 0x8fe   : > { %4073 = vmatprep.subr.bf16.mxu0 %v4737_v16 }
 0x901   : > { %4074 = vmatpush3.bf16.msra.mxu0 %v4323_v14 }
 0x902   : > { %4075 = vmatprep.subr.bf16.mxu0 %v4737_v16 }
 0x905   : > { %4076 = vmatpush3.bf16.msra.mxu0 %v4324_v30 }
 0x906   : > { %4077 = vmatprep.subr.bf16.mxu0 %v4737_v16 }
 0x909   : > { %4078 = vmatpush3.bf16.msra.mxu0 %v4325_v19 }
 0x90a   : > { %4079 = vmatprep.subr.bf16.mxu0 %v4737_v16 }
 0x90d   : > { %4080 = vmatpush3.bf16.msra.mxu0 %v4326_v17 }
 0x90e   : > { %4081 = vmatprep.subr.bf16.mxu0 %v4737_v16 }
 0x911   : > { %4082 = vmatpush3.bf16.msra.mxu0 %v4327_v57 }
 0x912   : > { %4083 = vmatprep.subr.bf16.mxu0 %v4737_v16 }
 0x915   : > { %4084 = vmatpush3.bf16.msra.mxu0 %v4328_v52 }
 0x916   : > { %4085 = vmatprep.subr.bf16.mxu0 %v4737_v16 }
 0x919   : > { %4086 = vmatpush3.bf16.msra.mxu0 %v4329_v43 }
 0x9cf   : > { %v3826_v53 = vpop.f32.mrb[160].mxu0 }
 0x9d0   : > { %v3827_v50 = vpop.f32.mrb[161].mxu0 }
 0x9d1   : > { %v3828_v54 = vadd.f32 %v3827_v50, %v3826_v53  ;;  %v3829_v45 = vpop.f32.mrb[162].mxu0 }
 0x9d2   : > { %v3830_v48 = vpop.f32.mrb[163].mxu0 }
 0x9d3   : > { %v3831_v36 = vadd.f32 %v3830_v48, %v3829_v45 }
 0x9d5   : > { %v2633_v51 = vpack.c.bf16 %v3831_v36, %v3828_v54 }
 0x9d7   : > { %4068 = vmatmul.mubr.bf16.vlgmr.msra.gmra.mrb[160].mxu1 %v2633_v51 }
 0x9d8   : > { %4107 = vmatprep.mubr.msk.bf16.mxu1 %vm4738_vm0, %v4737_v16  ;;  %4092 = vmatpush3.bf16.msra.mxu1 %v4330_v58 }
 0x9d9   : > { %4093 = vmatprep.subr.bf16.mxu1 %v4737_v16 }
 0x9dc   : > { %4094 = vmatpush3.bf16.msra.mxu1 %v4331_v26 }
 0x9dd   : > { %4095 = vmatprep.subr.bf16.mxu1 %v4737_v16 }
 0x9e0   : > { %4096 = vmatpush3.bf16.msra.mxu1 %v4332_v47 }
 0x9e1   : > { %4097 = vmatprep.subr.bf16.mxu1 %v4737_v16 }
 0x9e4   : > { %4098 = vmatpush3.bf16.msra.mxu1 %v4333_v60 }
 0x9e5   : > { %4099 = vmatprep.subr.bf16.mxu1 %v4737_v16 }
 0x9e8   : > { %4100 = vmatpush3.bf16.msra.mxu1 %v4334_v20 }
 0x9e9   : > { %4101 = vmatprep.subr.bf16.mxu1 %v4737_v16 }
 0x9ec   : > { %4102 = vmatpush3.bf16.msra.mxu1 %v4335_v12 }
 0x9ed   : > { %4103 = vmatprep.subr.bf16.mxu1 %v4737_v16 }
 0x9f0   : > { %4104 = vmatpush3.bf16.msra.mxu1 %v4336_v23 }
 0x9f1   : > { %4105 = vmatprep.subr.bf16.mxu1 %v4737_v16  ;;  %v3354_v16 = vld [vmem:[%s6217_s21] ss:$0 sm:$0xff] }
 0x9f4   : > { %4106 = vmatpush3.bf16.msra.mxu1 %v4337_v7 }
 0xaaa   : > { %v2739_v55 = vpop.f32.mrb[160].mxu1 }
 0xaab   : > { %v2740_v46 = vadd.f32 %v3336_v4, %v2739_v55  ;;  %v4069_v22 = vpop.f32.mrb[161].mxu1 }
 0xaac   : > { %v2742_v9 = vpop.f32.mrb[162].mxu1 }
 0xaad   : > { %v2746_v32 = vmax.f32 %v2740_v46, 0.0  ;;  %v2743_v2 = vadd.f32 %v3336_v4, %v2742_v9  ;;  %v4070_v6 = vpop.f32.mrb[163].mxu1 }
 0xaaf   : > { %2748 = vst [vmem:[%s5916_s27] sm:$0xff] %v2746_v32  ;;  %v2747_v29 = vmax.f32 %v2743_v2, 0.0 }
 0xab1   : > { %2749 = vst [vmem:[%s5916_s27 + $0x8] sm:$0xff] %v2747_v29  ;;  %v2750_v10 = vpack.c.bf16 %v2747_v29, %v2746_v32 }
 0xab3   : > { %4088 = vmatmul.mubr.bf16.vlgmr.msra.gmra.mrb[164].mxu0 %v2750_v10 }
 0xb86   : > { %v2856_v63 = vpop.f32.mrb[164].mxu0 }
 0xb87   : > { %v2857_v39 = vadd.f32 %v3345_v21, %v2856_v63  ;;  %v4089_v41 = vpop.f32.mrb[165].mxu0 }
 0xb88   : > { %v2859_v35 = vpop.f32.mrb[166].mxu0 }
 0xb89   : > { %v2860_v24 = vadd.f32 %v3345_v21, %v2859_v35  ;;  %v4090_v18 = vpop.f32.mrb[167].mxu0  ;;  %v2863_v1 = vmax.f32 %v2857_v39, 0.0 }
 0xb8b   : > { %v2864_v5 = vmax.f32 %v2860_v24, 0.0 }
 0xb8d   : > { %v2865_v40 = vpack.c.bf16 %v2864_v5, %v2863_v1 }
 0xb8f   : > { %4108 = vmatmul.mubr.bf16.vlgmr.msra.gmra.mrb[164].mxu1 %v2865_v40 }
 0xc62   : > { %v2971_v27 = vpop.f32.mrb[164].mxu1 }
 0xc63   : > { %v2972_v31 = vadd.f32 %v3354_v16, %v2971_v27  ;;  %v4109_v11 = vpop.f32.mrb[165].mxu1 }
 0xc64   : > { %v2974_v44 = vpop.f32.mrb[166].mxu1 }
 0xc65   : > { %v2975_v15 = vadd.f32 %v3354_v16, %v2974_v44  ;;  %v4110_v61 = vpop.f32.mrb[167].mxu1  ;;  %v2981_v28 = vsel %vm2980_vm1, %v2972_v31, -1e+30 }
 0xc66   : > { %2983 = vmax.xlane.f32.xlu0 %v2981_v28 }
 0xc67   : > { %v5927_v59 = vsel %vm2980_vm1, %v2975_v15, -1e+30 }
 0xc6a   : > { %2985 = vmax.xlane.f32.xlu0 %v5927_v59 }
 0xcf3   : > { %v2984_v38 = vpop.xlane.xlu0 %2983 }
 0xcf4   : > { %v2987_v37 = vsub.f32 %v2981_v28, %v2984_v38 }
 0xcf6   : > { %v2989_v0 = vmul.f32 1.442695, %v2987_v37 }
 0xcf7   : > { %v2986_v33 = vpop.xlane.xlu0 %2985 }
 0xcf8   : > { %v2988_v56 = vsub.f32 %v5927_v59, %v2986_v33  ;;  %4338 = vpow2.f32 %v2989_v0 }
 0xcfa   : > { %v2991_v34 = vmul.f32 1.442695, %v2988_v56 }
 0xcfc   : > { %4340 = vpow2.f32 %v2991_v34 }
 0xd02   : > { %v4339_v49 = vpop.eup %4338 }
 0xd03   : > { %2993 = vadd.xlane.f32.xlu1 %v4339_v49 }
 0xd06   : > { %v4341_v25 = vpop.eup %4340 }
 0xd07   : > { %2995 = vadd.xlane.f32.xlu1 %v4341_v25 }
 0xd08   : > { %4622 = shalt.err (!%p4619_p9)
}
 0xd09   : > { %s4623_s27 = scalar_lea.hbm %s5940_s12, 256  ;;  %s4627_s14 = scalar_lea.hbm %s6219_s13, 512 }
 0xd0a   : > { %p4624_p4 = scmp.ne.s32.totalorder %s5940_s12, %s4623_s27  ;;  %p4628_p5 = scmp.lt.u32.totalorder %s5940_s12, %s6219_s13 }
 0xd0b   : > { %p4629_p11 = scmp.lt.u32.totalorder %s4627_s14, %s4623_s27  ;;  %p4631_p0 = scmp.lt.u32.totalorder %s4623_s27, %s5940_s12 }
 0xd0c   : > { %p4625_p6 = pnand %p4624_p4, %p6220_p13 }
 0xd0d   : > { %p4630_p2 = por %p4629_p11, %p4628_p5 }
 0xd0e   : > { %p4626_p3 = pneg %p4625_p6 }
 0xd0f   : > { %p4632_p7 = por %p4631_p0, %p4630_p2 }
 0xd11   : > { %p4633_p10 = pnand %p4632_p7, %p4626_p3 }
 0xd13   : > { %4636 = shalt.err (!%p4633_p10)
}
 0xd14   : > { %s4740_s21 = smov 128   ;;  %s4741_s19 = smov 8  }
 0xd15   : > { %4138 = dma.vmem_to_hbm [thread:$0]  (%p6220_p13), %s5933_s7, 256, %s5940_s12, %s3013_s1, %s4740_s21, %s4740_s21, %s4741_s19  }
 0xd16   : > { %s641_s25 = scalar_lea.vmem [#allocation16], %s5164_s20  ;;  %s6221_s1 = sld [smem:[#allocation71_spill]] }
 0xd17   : > { %s3026_s24 = sshll.u32 %s641_s25, 4  ;;  %s3008_s15 = scalar_lea.sflag [#allocation4], %s5145_s22  ;;  %s5978_s24 = int_to_ptr.vmem [resolvable:$true] %s3026_s24 }
 0xd18   : > { %s4637_s28 = scalar_lea.vmem %s5978_s24, 256  ;;  %s4742_s20 = smov [#allocation16]  }
 0xd19   : > { %p4638_p12 = scmp.ne.s32.totalorder %s5978_s24, %s4637_s28  ;;  %s4641_s27 = sshll.u32 %s4742_s20, 4  ;;  %s4642_s27 = int_to_ptr.vmem [resolvable:$false] %s4641_s27 }
 0xd1a   : > { %s4643_s17 = scalar_lea.vmem %s4642_s27, 512  ;;  %p4644_p9 = scmp.lt.s32.totalorder %s5978_s24, %s4642_s27 }
 0xd1b   : > { %p4639_p1 = pnand %p4638_p12, %p6220_p13  ;;  %p4645_p4 = scmp.lt.s32.totalorder %s4643_s17, %s4637_s28 }
 0xd1c   : > { %s5976_s29 = scalar_lea.hbm %s6221_s1, %s3376_s6 }
 0xd1d   : > { %p4640_p8 = pneg %p4639_p1  ;;  %p4646_p6 = por %p4645_p4, %p4644_p9 }
 0xd1f   : > { %p4647_p3 = pnand %p4646_p6, %p4640_p8 }
 0xd90   : > { %v2994_v13 = vpop.xlane.xlu1 %2993 }
 0xd91   : > { %4342 = vlog2.f32 %v2994_v13 }
 0xd94   : > { %v2996_v3 = vpop.xlane.xlu1 %2995 }
 0xd95   : > { %4344 = vlog2.f32 %v2996_v3 }
 0xd9b   : > { %v4343_v8 = vpop.eup %4342 }
 0xd9c   : > { %v2998_v14 = vmul.f32 0.6931472, %v4343_v8 }
 0xd9e   : > { %v3001_v30 = vadd.f32 %v2998_v14, %v2984_v38 }
 0xd9f   : > { %v4345_v19 = vpop.eup %4344 }
 0xda0   : > { %v3003_v17 = vsub.f32 %v2981_v28, %v3001_v30  ;;  %v3000_v57 = vmul.f32 0.6931472, %v4345_v19 }
 0xda2   : > { %3005 = vst [vmem:[%s641_s25] sm:$0xff] %v3003_v17  ;;  %v3002_v53 = vadd.f32 %v3000_v57, %v2986_v33 }
 0xda4   : > { %v3004_v50 = vsub.f32 %v5927_v59, %v3002_v53 }
 0xda6   : > { %3006 = vst [vmem:[%s641_s25 + $0x8] sm:$0xff] %v3004_v50 }
 0xda7   : > { %4650 = shalt.err (!%p4647_p3)
}
 0xda8   : > { %s4651_s6 = scalar_lea.hbm %s5976_s29, 256  ;;  %s4655_s14 = scalar_lea.hbm %s6221_s1, 512 }
 0xda9   : > { %p4652_p5 = scmp.ne.s32.totalorder %s5976_s29, %s4651_s6  ;;  %p4656_p0 = scmp.lt.u32.totalorder %s5976_s29, %s6221_s1 }
 0xdaa   : > { %p4657_p7 = scmp.lt.u32.totalorder %s4655_s14, %s4651_s6  ;;  %p4659_p12 = scmp.lt.u32.totalorder %s4651_s6, %s5976_s29 }
 0xdab   : > { %p4653_p11 = pnand %p4652_p5, %p6220_p13 }
 0xdac   : > { %p4658_p10 = por %p4657_p7, %p4656_p0 }
 0xdad   : > { %p4654_p2 = pneg %p4653_p11 }
 0xdae   : > { %p4660_p1 = por %p4659_p12, %p4658_p10 }
 0xdb0   : > { %p4661_p8 = pnand %p4660_p1, %p4654_p2 }
 0xdb2   : > { %4664 = shalt.err (!%p4661_p8)
}
 0xdb3   : > { %4137 = dma.vmem_to_hbm [thread:$0]  (%p6220_p13), %s5978_s24, 256, %s5976_s29, %s3008_s15, %s4740_s21, %s4740_s21, %s4741_s19  }
 0xdb4 PF: > { %s6222_s25 = sld [smem:[#allocation26_spill]]  ;;  %s6223_s7 = sld [smem:[#allocation28_spill]] }
 0xdb5   : > { %p6225_p4 = scmp.ge.s32.totalorder %s4723_s16, 2 }
 0xdba   : > { %s3057_s12 = sand.u32 1, %s6222_s25   ;;  %p6224_p9 = scmp.ne.s32.totalorder %s6223_s7, 0 }
 0xdbb   : > { %s3058_s28 = scalar_lea.sflag [#allocation4], %s3057_s12 }
 0xdbc   : > { %p4168_p6 = pnand %p6225_p4, %p6224_p9 }
 0xdbe   : > { %4702 = dma.done.wait (!%p4168_p6), %s3058_s28, 256  }
 0xdbf   : > { %4704 = vsyncadd (!%p4168_p6), %s3058_s28, 4294967040  ;;  %s3067_s23 = scalar_lea.sflag [#allocation18], %s3057_s12 }
 0xdc0   : > { %4706 = dma.done.wait (!%p4168_p6), %s3067_s23, 256  }
 0xdc1   : > { %4708 = vsyncadd (!%p4168_p6), %s3067_s23, 4294967040  ;;  %s6226_s16 = sld [smem:[#allocation29_spill]]  ;;  %s6227_s22 = sld [smem:[#allocation27_spill]] }
 0xdc2   : > { %s6228_s15 = sld [smem:[#allocation31_spill]]  ;;  %s6229_s29 = smov %s4715_s30 }
 0xdc7   : > { %p37_p13 = scmp.ge.s32.totalorder %s6226_s16, 4   ;;  %s6230_s30 = smov %s6227_s22 }
 0xdc9   :  { %39 = sbr.rel (!%p37_p13) target bundleno = 22 (0x16), region = 178 }
 0xdd0   :  { %3072 = vsyncpa [#allocation3], 1 }
 0xdd1   :  { %3074 = vsyncpa [#allocation3 + $0x1], 1 }
 0xdd2   :  { %3075 = vsyncpa [#allocation6], 1 }
 0xdd3   :  { %3077 = vsyncpa [#allocation6 + $0x1], 1 }
 0xdd4   :  { %3078 = vsyncpa [#allocation9], 1 }
 0xdd5   :  { %3079 = vsyncpa [#allocation12], 1 }
 0xdd6   :  { %3080 = vsyncpa [#allocation15], 1 }
 0xdd7   :  { %3081 = vsyncpa [#allocation4], 1 }
 0xdd8   :  { %3083 = vsyncpa [#allocation4 + $0x1], 1 }
 0xdd9   :  { %3084 = vsyncpa [#allocation18], 1 }
 0xdda   :  { %3086 = vsyncpa [#allocation18 + $0x1], 1 }

</bundles_post_ra>
